<compile_context>
chip_gen: v5e
topology: v5e:2x2
jax: 0.10.0
libtpu: 0.0.40
codegen_flags: <defaults>
</compile_context>

<pallas_src>
import functools

import jax
import jax.numpy as jnp
from jax.experimental import pallas as pl
from jax.experimental.pallas import tpu as pltpu


def _upsample_conv_kernel(x_ref, u_ref, wv_ref, b_ref, o_ref, *, C, H, W, nb):
    """nb batch elements: nearest x2 upsample + 3x3 'same' conv (NCHW in / out).

    x_ref : (nb, C*H, W)        original-resolution rows (ci, iy) on sublanes, W on lanes
    u_ref : (W, 2W)             constant 0/1 centered nearest column-upsample matrix
    wv_ref: (2*2*3*C*C,)  SMEM  vertically folded conv weights, index [py, ty, kx, co, ci]
    b_ref : (C,)          SMEM  bias
    o_ref : (nb, C, H, 2*2W)    per input row iy: [output row 2iy | output row 2iy+1]
    """
    Wo = 2 * W
    f32 = jnp.float32

    u = u_ref[...]                                        # (W, Wo) 0/1 selection matrix

    # Edge-validity masks: the rolls wrap one row / lane around, which must read as the
    # conv's zero padding instead.  One select per shifted variant (per ci), nothing per
    # (kx, ci) pair as before.
    row = jax.lax.broadcasted_iota(jnp.int32, (H, Wo), 0)
    lane = jax.lax.broadcasted_iota(jnp.int32, (H, Wo), 1)
    ok_left = lane >= 1           # kx = 0 : up[.., ox-1] invalid at ox == 0
    ok_right = lane <= Wo - 2     # kx = 2 : up[.., ox+1] invalid at ox == Wo-1
    ok_up = row >= 1              # dy = -1: input row iy-1 invalid at iy == 0
    ok_down = row <= H - 2        # dy = +1: input row iy+1 invalid at iy == H-1

    def wv(py, ty, kx, co, ci):   # folded vertical weight (scalar from SMEM)
        return wv_ref[(((py * 2 + ty) * 3 + kx) * C + co) * C + ci]

    for i in range(nb):
        # --- nearest x2 column upsample of all C*H rows: one small exact MXU matmul.
        # 0/1 selection matrix + HIGHEST keeps the replication bit-exact in f32 (every
        # output column is a plain copy of one input column).
        up_all = jnp.dot(x_ref[i], u, preferred_element_type=f32,
                         precision=jax.lax.Precision.HIGHEST)          # (C*H, Wo)

        # Accumulators: (co, output-row parity) -> (H, Wo), bias-initialized.  Small
        # dense slabs; these plus a few transient tap variants stay well under 64 vregs.
        acc = [[jnp.full((H, Wo), b_ref[co], f32) for _ in range(2)]
               for co in range(C)]

        for ci in range(C):
            up = up_all[ci * H:(ci + 1) * H, :]           # aligned value slice (H, Wo)

            # Horizontal taps: lane rolls (XLU, free slot) + one edge select each.
            lft = jnp.where(ok_left, pltpu.roll(up, shift=1, axis=1), 0.0)    # kx = 0
            rgt = jnp.where(ok_right, pltpu.roll(up, shift=Wo - 1, axis=1), 0.0)  # kx = 2
            lanes_kx = (lft, up, rgt)

            for kx in range(3):
                base = lanes_kx[kx]
                # Vertical taps: sublane rolls (XLU) + one edge select each, consumed
                # immediately by the FMAs below (bounded live range).
                vprev = jnp.where(ok_up, pltpu.roll(base, shift=1, axis=0), 0.0)
                vnext = jnp.where(ok_down, pltpu.roll(base, shift=H - 1, axis=0), 0.0)
                taps = {-1: vprev, 0: base, 1: vnext}

                for co in range(C):
                    for py in range(2):           # output row = 2*iy + py
                        for ty in range(2):
                            dy = py - 1 + ty
                            acc[co][py] = acc[co][py] + wv(py, ty, kx, co, ci) * taps[dy]

        # Direct slice stores (no concatenated temp, no relayout); lane-dense whenever
        # 2*Wo is a multiple of 128 (i.e. W >= 32).
        for co in range(C):
            o_ref[i, co, :, 0:Wo] = acc[co][0].astype(o_ref.dtype)
            o_ref[i, co, :, Wo:2 * Wo] = acc[co][1].astype(o_ref.dtype)


def _pick_batch_block(N, C, H, W, target_bytes=512 * 1024):
    """Batch elements per grid step: big enough blocks, but keep >= 2 parallel steps."""
    out_img_bytes = C * H * (4 * W) * 4
    nb = max(1, min(N, target_bytes // max(out_img_bytes, 1)))
    if N >= 2:
        nb = min(nb, max(1, N // 2))      # both v7x TensorCores get work
    while N % nb:                          # clean, evenly divided blocks
        nb -= 1
    return nb


def upsample_forward(x, w, b, *, batch_block=None):
    """Nearest x2 upsample followed by a 3x3 'same' conv (Pallas TPU kernel).

    x: (N, C, H, W) f32 NCHW,  w: (C, C, 3, 3) OIHW,  b: (C,)
    """
    N, C, H, W = x.shape
    Ho, Wo = 2 * H, 2 * W

    nb = batch_block if batch_block is not None else _pick_batch_block(N, C, H, W)
    assert N % nb == 0

    # ---- tiny weight-only / constant preprocessing (no data-sized HBM intermediates) ----
    # Fold the vertical (ky) taps of the conv-on-upsampled-image into per-(output-row
    # parity py, row offset ty) weights:
    #   Wv[py, ty, kx, co, ci] = sum_{ky in K(py, ty)} w[co, ci, ky, kx]
    F = jnp.array([[[1., 0., 0.], [0., 1., 1.]],
                   [[1., 1., 0.], [0., 0., 1.]]], dtype=jnp.float32)    # F[py, ty, ky]
    wv = jnp.einsum('ptk,oikx->ptxoi', F, w.astype(jnp.float32)).reshape(-1)

    # Centered nearest-upsample selection matrix: Uc[ix, ox] = 1 iff ox // 2 == ix.
    Uc = (jnp.arange(Wo)[None, :] // 2 == jnp.arange(W)[:, None]).astype(jnp.float32)

    x_rows = x.reshape(N, C * H, W)        # metadata-only reshape

    kernel = functools.partial(_upsample_conv_kernel, C=C, H=H, W=W, nb=nb)

    # VMEM budget: double-buffered in/out blocks + the small constant + headroom.
    in_block_bytes = nb * C * H * W * 4
    out_block_bytes = nb * C * H * 2 * Wo * 4
    need = 2 * (in_block_bytes + out_block_bytes) + W * Wo * 4 + (2 << 20)
    compiler_kwargs = dict(dimension_semantics=("parallel",))
    if need > (32 << 20):
        compiler_kwargs["vmem_limit_bytes"] = min(int(need), 100 << 20)

    out = pl.pallas_call(
        kernel,
        out_shape=jax.ShapeDtypeStruct((N, C, H, 2 * Wo), x.dtype),
        grid_spec=pltpu.PrefetchScalarGridSpec(
            num_scalar_prefetch=0,
            grid=(N // nb,),               # batch-blocked, batch-parallel grid
            in_specs=[
                pl.BlockSpec((nb, C * H, W), lambda n: (n, 0, 0)),
                pl.BlockSpec((W, Wo), lambda n: (0, 0)),
                pl.BlockSpec(memory_space=pltpu.MemorySpace.SMEM),   # folded weights
                pl.BlockSpec(memory_space=pltpu.MemorySpace.SMEM),   # bias
            ],
            out_specs=pl.BlockSpec((nb, C, H, 2 * Wo), lambda n: (n, 0, 0, 0)),
        ),
        compiler_params=pltpu.CompilerParams(**compiler_kwargs),
    )(x_rows, Uc, wv, b.astype(jnp.float32))

    # (N, C, H, [row 2iy | row 2iy+1]) -> (N, C, 2H, 2W): contiguous, free reshape.
    return out.reshape(N, C, Ho, Wo)


def _reference(x_nchw, w_oihw, bias):
    """Pure-JAX reference matching PyTorch semantics."""
    x_up = jnp.repeat(jnp.repeat(x_nchw, 2, axis=2), 2, axis=3)
    y = jax.lax.conv_general_dilated(
        x_up, w_oihw,
        window_strides=(1, 1),
        padding=((1, 1), (1, 1)),
        dimension_numbers=("NCHW", "OIHW", "NCHW"),
        precision=jax.lax.Precision.HIGHEST,
    )
    return y + bias.reshape(1, -1, 1, 1)


if __name__ == "__main__":
    key = jax.random.PRNGKey(0)
    k_x, k_w, k_b = jax.random.split(key, 3)

    N, C, H, W = 2, 4, 16, 16
    x = jax.random.normal(k_x, (N, C, H, W), dtype=jnp.float32)

    # Deterministic Conv2d(C, C, 3, padding=1) parameters (PyTorch-style uniform init).
    fan_in = C * 3 * 3
    bound = 1.0 / (fan_in ** 0.5)
    w = jax.random.uniform(k_w, (C, C, 3, 3), minval=-bound, maxval=bound,
                           dtype=jnp.float32)
    b = jax.random.uniform(k_b, (C,), minval=-bound, maxval=bound, dtype=jnp.float32)

    out = jax.block_until_ready(upsample_forward(x, w, b))
    ref = jax.block_until_ready(_reference(x, w, b))

    assert out.shape == (N, C, 2 * H, 2 * W), out.shape
    max_err = float(jnp.max(jnp.abs(out - ref)))
    assert max_err < 1e-3, max_err

    print("KERNEL_OK")
</pallas_src>

<mosaic_0001>
module attributes {stable_mosaic.version = 11 : i64} {
  func.func @_upsample_conv_kernel(%arg0: i32, %arg1: memref<1x64x16xf32, #tpu.memory_space<vmem>>, %arg2: memref<16x32xf32, #tpu.memory_space<vmem>>, %arg3: memref<192xf32, #tpu.memory_space<smem>>, %arg4: memref<4xf32, #tpu.memory_space<smem>>, %arg5: memref<1x4x16x64xf32, #tpu.memory_space<vmem>>) attributes {dimension_semantics = [#tpu.dimension_semantics<parallel>], iteration_bounds = array<i64: 2>, scalar_prefetch = 0 : i64, scratch_operands = 0 : i64, tpu.core_type = #tpu.core_type<tc>, window_params = [{transform_indices = @transform_0, window_bounds = array<i64: 1, 64, 16>}, {pipeline_mode = #tpu.pipeline_mode<synchronous>, transform_indices = @transform_1, window_bounds = array<i64: 16, 32>}, {transform_indices = @transform_2, window_bounds = array<i64: 192>}, {transform_indices = @transform_3, window_bounds = array<i64: 4>}, {transform_indices = @transform_4, window_bounds = array<i64: 1, 4, 16, 64>}]} {
    %c0 = arith.constant 0 : index
    %c0_0 = arith.constant 0 : index
    %0 = vector.load %arg2[%c0, %c0_0] : memref<16x32xf32, #tpu.memory_space<vmem>>, vector<16x32xf32>
    %1 = tpu.iota {dimensions = array<i32: 0>} : vector<16x32xi32>
    %2 = tpu.iota {dimensions = array<i32: 1>} : vector<16x32xi32>
    %c1_i32 = arith.constant 1 : i32
    %3 = vector.broadcast %c1_i32 : i32 to vector<16x32xi32>
    %4 = arith.cmpi sge, %2, %3 : vector<16x32xi32>
    %c30_i32 = arith.constant 30 : i32
    %5 = vector.broadcast %c30_i32 : i32 to vector<16x32xi32>
    %6 = arith.cmpi sle, %2, %5 : vector<16x32xi32>
    %c1_i32_1 = arith.constant 1 : i32
    %7 = vector.broadcast %c1_i32_1 : i32 to vector<16x32xi32>
    %8 = arith.cmpi sge, %1, %7 : vector<16x32xi32>
    %c14_i32 = arith.constant 14 : i32
    %9 = vector.broadcast %c14_i32 : i32 to vector<16x32xi32>
    %10 = arith.cmpi sle, %1, %9 : vector<16x32xi32>
    %c0_2 = arith.constant 0 : index
    %c0_3 = arith.constant 0 : index
    %c0_4 = arith.constant 0 : index
    %11 = vector.load %arg1[%c0_2, %c0_3, %c0_4] : memref<1x64x16xf32, #tpu.memory_space<vmem>>, vector<1x64x16xf32>
    %12 = vector.shape_cast %11 : vector<1x64x16xf32> to vector<64x16xf32>
    %cst = arith.constant dense<0.000000e+00> : vector<64x32xf32>
    %13 = tpu.matmul %12, %0, %cst {dimension_numbers = #tpu.dot_dimension_numbers<[1], [0], [0], [1], [0, 0, 1, 1], [], []>, precision = #tpu.contract_precision<fp32>} : vector<64x16xf32>, vector<16x32xf32>, vector<64x32xf32> -> vector<64x32xf32>
    %c0_5 = arith.constant 0 : index
    %14 = memref.load %arg4[%c0_5] : memref<4xf32, #tpu.memory_space<smem>>
    %15 = vector.broadcast %14 : f32 to vector<16x32xf32>
    %c0_6 = arith.constant 0 : index
    %16 = memref.load %arg4[%c0_6] : memref<4xf32, #tpu.memory_space<smem>>
    %17 = vector.broadcast %16 : f32 to vector<16x32xf32>
    %c1 = arith.constant 1 : index
    %18 = memref.load %arg4[%c1] : memref<4xf32, #tpu.memory_space<smem>>
    %19 = vector.broadcast %18 : f32 to vector<16x32xf32>
    %c1_7 = arith.constant 1 : index
    %20 = memref.load %arg4[%c1_7] : memref<4xf32, #tpu.memory_space<smem>>
    %21 = vector.broadcast %20 : f32 to vector<16x32xf32>
    %c2 = arith.constant 2 : index
    %22 = memref.load %arg4[%c2] : memref<4xf32, #tpu.memory_space<smem>>
    %23 = vector.broadcast %22 : f32 to vector<16x32xf32>
    %c2_8 = arith.constant 2 : index
    %24 = memref.load %arg4[%c2_8] : memref<4xf32, #tpu.memory_space<smem>>
    %25 = vector.broadcast %24 : f32 to vector<16x32xf32>
    %c3 = arith.constant 3 : index
    %26 = memref.load %arg4[%c3] : memref<4xf32, #tpu.memory_space<smem>>
    %27 = vector.broadcast %26 : f32 to vector<16x32xf32>
    %c3_9 = arith.constant 3 : index
    %28 = memref.load %arg4[%c3_9] : memref<4xf32, #tpu.memory_space<smem>>
    %29 = vector.broadcast %28 : f32 to vector<16x32xf32>
    %30 = vector.extract_strided_slice %13 {offsets = [0, 0], sizes = [16, 32], strides = [1, 1]} : vector<64x32xf32> to vector<16x32xf32>
    %c1_i32_10 = arith.constant 1 : i32
    %31 = tpu.dynamic_rotate %30 by %c1_i32_10 dim 1 : vector<16x32xf32>, i32 -> vector<16x32xf32>
    %cst_11 = arith.constant 0.000000e+00 : f32
    %32 = vector.broadcast %cst_11 : f32 to vector<16x32xf32>
    %33 = arith.select %4, %31, %32 : vector<16x32xi1>, vector<16x32xf32>
    %c31_i32 = arith.constant 31 : i32
    %34 = tpu.dynamic_rotate %30 by %c31_i32 dim 1 : vector<16x32xf32>, i32 -> vector<16x32xf32>
    %cst_12 = arith.constant 0.000000e+00 : f32
    %35 = vector.broadcast %cst_12 : f32 to vector<16x32xf32>
    %36 = arith.select %6, %34, %35 : vector<16x32xi1>, vector<16x32xf32>
    %c1_i32_13 = arith.constant 1 : i32
    %37 = tpu.dynamic_rotate %33 by %c1_i32_13 dim 0 : vector<16x32xf32>, i32 -> vector<16x32xf32>
    %cst_14 = arith.constant 0.000000e+00 : f32
    %38 = vector.broadcast %cst_14 : f32 to vector<16x32xf32>
    %39 = arith.select %8, %37, %38 : vector<16x32xi1>, vector<16x32xf32>
    %c15_i32 = arith.constant 15 : i32
    %40 = tpu.dynamic_rotate %33 by %c15_i32 dim 0 : vector<16x32xf32>, i32 -> vector<16x32xf32>
    %cst_15 = arith.constant 0.000000e+00 : f32
    %41 = vector.broadcast %cst_15 : f32 to vector<16x32xf32>
    %42 = arith.select %10, %40, %41 : vector<16x32xi1>, vector<16x32xf32>
    %c0_16 = arith.constant 0 : index
    %43 = memref.load %arg3[%c0_16] : memref<192xf32, #tpu.memory_space<smem>>
    %44 = vector.broadcast %43 : f32 to vector<16x32xf32>
    %45 = arith.mulf %44, %39 : vector<16x32xf32>
    %46 = arith.addf %15, %45 : vector<16x32xf32>
    %c48 = arith.constant 48 : index
    %47 = memref.load %arg3[%c48] : memref<192xf32, #tpu.memory_space<smem>>
    %48 = vector.broadcast %47 : f32 to vector<16x32xf32>
    %49 = arith.mulf %48, %33 : vector<16x32xf32>
    %50 = arith.addf %46, %49 : vector<16x32xf32>
    %c96 = arith.constant 96 : index
    %51 = memref.load %arg3[%c96] : memref<192xf32, #tpu.memory_space<smem>>
    %52 = vector.broadcast %51 : f32 to vector<16x32xf32>
    %53 = arith.mulf %52, %33 : vector<16x32xf32>
    %54 = arith.addf %17, %53 : vector<16x32xf32>
    %c144 = arith.constant 144 : index
    %55 = memref.load %arg3[%c144] : memref<192xf32, #tpu.memory_space<smem>>
    %56 = vector.broadcast %55 : f32 to vector<16x32xf32>
    %57 = arith.mulf %56, %42 : vector<16x32xf32>
    %58 = arith.addf %54, %57 : vector<16x32xf32>
    %c4 = arith.constant 4 : index
    %59 = memref.load %arg3[%c4] : memref<192xf32, #tpu.memory_space<smem>>
    %60 = vector.broadcast %59 : f32 to vector<16x32xf32>
    %61 = arith.mulf %60, %39 : vector<16x32xf32>
    %62 = arith.addf %19, %61 : vector<16x32xf32>
    %c52 = arith.constant 52 : index
    %63 = memref.load %arg3[%c52] : memref<192xf32, #tpu.memory_space<smem>>
    %64 = vector.broadcast %63 : f32 to vector<16x32xf32>
    %65 = arith.mulf %64, %33 : vector<16x32xf32>
    %66 = arith.addf %62, %65 : vector<16x32xf32>
    %c100 = arith.constant 100 : index
    %67 = memref.load %arg3[%c100] : memref<192xf32, #tpu.memory_space<smem>>
    %68 = vector.broadcast %67 : f32 to vector<16x32xf32>
    %69 = arith.mulf %68, %33 : vector<16x32xf32>
    %70 = arith.addf %21, %69 : vector<16x32xf32>
    %c148 = arith.constant 148 : index
    %71 = memref.load %arg3[%c148] : memref<192xf32, #tpu.memory_space<smem>>
    %72 = vector.broadcast %71 : f32 to vector<16x32xf32>
    %73 = arith.mulf %72, %42 : vector<16x32xf32>
    %74 = arith.addf %70, %73 : vector<16x32xf32>
    %c8 = arith.constant 8 : index
    %75 = memref.load %arg3[%c8] : memref<192xf32, #tpu.memory_space<smem>>
    %76 = vector.broadcast %75 : f32 to vector<16x32xf32>
    %77 = arith.mulf %76, %39 : vector<16x32xf32>
    %78 = arith.addf %23, %77 : vector<16x32xf32>
    %c56 = arith.constant 56 : index
    %79 = memref.load %arg3[%c56] : memref<192xf32, #tpu.memory_space<smem>>
    %80 = vector.broadcast %79 : f32 to vector<16x32xf32>
    %81 = arith.mulf %80, %33 : vector<16x32xf32>
    %82 = arith.addf %78, %81 : vector<16x32xf32>
    %c104 = arith.constant 104 : index
    %83 = memref.load %arg3[%c104] : memref<192xf32, #tpu.memory_space<smem>>
    %84 = vector.broadcast %83 : f32 to vector<16x32xf32>
    %85 = arith.mulf %84, %33 : vector<16x32xf32>
    %86 = arith.addf %25, %85 : vector<16x32xf32>
    %c152 = arith.constant 152 : index
    %87 = memref.load %arg3[%c152] : memref<192xf32, #tpu.memory_space<smem>>
    %88 = vector.broadcast %87 : f32 to vector<16x32xf32>
    %89 = arith.mulf %88, %42 : vector<16x32xf32>
    %90 = arith.addf %86, %89 : vector<16x32xf32>
    %c12 = arith.constant 12 : index
    %91 = memref.load %arg3[%c12] : memref<192xf32, #tpu.memory_space<smem>>
    %92 = vector.broadcast %91 : f32 to vector<16x32xf32>
    %93 = arith.mulf %92, %39 : vector<16x32xf32>
    %94 = arith.addf %27, %93 : vector<16x32xf32>
    %c60 = arith.constant 60 : index
    %95 = memref.load %arg3[%c60] : memref<192xf32, #tpu.memory_space<smem>>
    %96 = vector.broadcast %95 : f32 to vector<16x32xf32>
    %97 = arith.mulf %96, %33 : vector<16x32xf32>
    %98 = arith.addf %94, %97 : vector<16x32xf32>
    %c108 = arith.constant 108 : index
    %99 = memref.load %arg3[%c108] : memref<192xf32, #tpu.memory_space<smem>>
    %100 = vector.broadcast %99 : f32 to vector<16x32xf32>
    %101 = arith.mulf %100, %33 : vector<16x32xf32>
    %102 = arith.addf %29, %101 : vector<16x32xf32>
    %c156 = arith.constant 156 : index
    %103 = memref.load %arg3[%c156] : memref<192xf32, #tpu.memory_space<smem>>
    %104 = vector.broadcast %103 : f32 to vector<16x32xf32>
    %105 = arith.mulf %104, %42 : vector<16x32xf32>
    %106 = arith.addf %102, %105 : vector<16x32xf32>
    %c1_i32_17 = arith.constant 1 : i32
    %107 = tpu.dynamic_rotate %30 by %c1_i32_17 dim 0 : vector<16x32xf32>, i32 -> vector<16x32xf32>
    %cst_18 = arith.constant 0.000000e+00 : f32
    %108 = vector.broadcast %cst_18 : f32 to vector<16x32xf32>
    %109 = arith.select %8, %107, %108 : vector<16x32xi1>, vector<16x32xf32>
    %c15_i32_19 = arith.constant 15 : i32
    %110 = tpu.dynamic_rotate %30 by %c15_i32_19 dim 0 : vector<16x32xf32>, i32 -> vector<16x32xf32>
    %cst_20 = arith.constant 0.000000e+00 : f32
    %111 = vector.broadcast %cst_20 : f32 to vector<16x32xf32>
    %112 = arith.select %10, %110, %111 : vector<16x32xi1>, vector<16x32xf32>
    %c16 = arith.constant 16 : index
    %113 = memref.load %arg3[%c16] : memref<192xf32, #tpu.memory_space<smem>>
    %114 = vector.broadcast %113 : f32 to vector<16x32xf32>
    %115 = arith.mulf %114, %109 : vector<16x32xf32>
    %116 = arith.addf %50, %115 : vector<16x32xf32>
    %c64 = arith.constant 64 : index
    %117 = memref.load %arg3[%c64] : memref<192xf32, #tpu.memory_space<smem>>
    %118 = vector.broadcast %117 : f32 to vector<16x32xf32>
    %119 = arith.mulf %118, %30 : vector<16x32xf32>
    %120 = arith.addf %116, %119 : vector<16x32xf32>
    %c112 = arith.constant 112 : index
    %121 = memref.load %arg3[%c112] : memref<192xf32, #tpu.memory_space<smem>>
    %122 = vector.broadcast %121 : f32 to vector<16x32xf32>
    %123 = arith.mulf %122, %30 : vector<16x32xf32>
    %124 = arith.addf %58, %123 : vector<16x32xf32>
    %c160 = arith.constant 160 : index
    %125 = memref.load %arg3[%c160] : memref<192xf32, #tpu.memory_space<smem>>
    %126 = vector.broadcast %125 : f32 to vector<16x32xf32>
    %127 = arith.mulf %126, %112 : vector<16x32xf32>
    %128 = arith.addf %124, %127 : vector<16x32xf32>
    %c20 = arith.constant 20 : index
    %129 = memref.load %arg3[%c20] : memref<192xf32, #tpu.memory_space<smem>>
    %130 = vector.broadcast %129 : f32 to vector<16x32xf32>
    %131 = arith.mulf %130, %109 : vector<16x32xf32>
    %132 = arith.addf %66, %131 : vector<16x32xf32>
    %c68 = arith.constant 68 : index
    %133 = memref.load %arg3[%c68] : memref<192xf32, #tpu.memory_space<smem>>
    %134 = vector.broadcast %133 : f32 to vector<16x32xf32>
    %135 = arith.mulf %134, %30 : vector<16x32xf32>
    %136 = arith.addf %132, %135 : vector<16x32xf32>
    %c116 = arith.constant 116 : index
    %137 = memref.load %arg3[%c116] : memref<192xf32, #tpu.memory_space<smem>>
    %138 = vector.broadcast %137 : f32 to vector<16x32xf32>
    %139 = arith.mulf %138, %30 : vector<16x32xf32>
    %140 = arith.addf %74, %139 : vector<16x32xf32>
    %c164 = arith.constant 164 : index
    %141 = memref.load %arg3[%c164] : memref<192xf32, #tpu.memory_space<smem>>
    %142 = vector.broadcast %141 : f32 to vector<16x32xf32>
    %143 = arith.mulf %142, %112 : vector<16x32xf32>
    %144 = arith.addf %140, %143 : vector<16x32xf32>
    %c24 = arith.constant 24 : index
    %145 = memref.load %arg3[%c24] : memref<192xf32, #tpu.memory_space<smem>>
    %146 = vector.broadcast %145 : f32 to vector<16x32xf32>
    %147 = arith.mulf %146, %109 : vector<16x32xf32>
    %148 = arith.addf %82, %147 : vector<16x32xf32>
    %c72 = arith.constant 72 : index
    %149 = memref.load %arg3[%c72] : memref<192xf32, #tpu.memory_space<smem>>
    %150 = vector.broadcast %149 : f32 to vector<16x32xf32>
    %151 = arith.mulf %150, %30 : vector<16x32xf32>
    %152 = arith.addf %148, %151 : vector<16x32xf32>
    %c120 = arith.constant 120 : index
    %153 = memref.load %arg3[%c120] : memref<192xf32, #tpu.memory_space<smem>>
    %154 = vector.broadcast %153 : f32 to vector<16x32xf32>
    %155 = arith.mulf %154, %30 : vector<16x32xf32>
    %156 = arith.addf %90, %155 : vector<16x32xf32>
    %c168 = arith.constant 168 : index
    %157 = memref.load %arg3[%c168] : memref<192xf32, #tpu.memory_space<smem>>
    %158 = vector.broadcast %157 : f32 to vector<16x32xf32>
    %159 = arith.mulf %158, %112 : vector<16x32xf32>
    %160 = arith.addf %156, %159 : vector<16x32xf32>
    %c28 = arith.constant 28 : index
    %161 = memref.load %arg3[%c28] : memref<192xf32, #tpu.memory_space<smem>>
    %162 = vector.broadcast %161 : f32 to vector<16x32xf32>
    %163 = arith.mulf %162, %109 : vector<16x32xf32>
    %164 = arith.addf %98, %163 : vector<16x32xf32>
    %c76 = arith.constant 76 : index
    %165 = memref.load %arg3[%c76] : memref<192xf32, #tpu.memory_space<smem>>
    %166 = vector.broadcast %165 : f32 to vector<16x32xf32>
    %167 = arith.mulf %166, %30 : vector<16x32xf32>
    %168 = arith.addf %164, %167 : vector<16x32xf32>
    %c124 = arith.constant 124 : index
    %169 = memref.load %arg3[%c124] : memref<192xf32, #tpu.memory_space<smem>>
    %170 = vector.broadcast %169 : f32 to vector<16x32xf32>
    %171 = arith.mulf %170, %30 : vector<16x32xf32>
    %172 = arith.addf %106, %171 : vector<16x32xf32>
    %c172 = arith.constant 172 : index
    %173 = memref.load %arg3[%c172] : memref<192xf32, #tpu.memory_space<smem>>
    %174 = vector.broadcast %173 : f32 to vector<16x32xf32>
    %175 = arith.mulf %174, %112 : vector<16x32xf32>
    %176 = arith.addf %172, %175 : vector<16x32xf32>
    %c1_i32_21 = arith.constant 1 : i32
    %177 = tpu.dynamic_rotate %36 by %c1_i32_21 dim 0 : vector<16x32xf32>, i32 -> vector<16x32xf32>
    %cst_22 = arith.constant 0.000000e+00 : f32
    %178 = vector.broadcast %cst_22 : f32 to vector<16x32xf32>
    %179 = arith.select %8, %177, %178 : vector<16x32xi1>, vector<16x32xf32>
    %c15_i32_23 = arith.constant 15 : i32
    %180 = tpu.dynamic_rotate %36 by %c15_i32_23 dim 0 : vector<16x32xf32>, i32 -> vector<16x32xf32>
    %cst_24 = arith.constant 0.000000e+00 : f32
    %181 = vector.broadcast %cst_24 : f32 to vector<16x32xf32>
    %182 = arith.select %10, %180, %181 : vector<16x32xi1>, vector<16x32xf32>
    %c32 = arith.constant 32 : index
    %183 = memref.load %arg3[%c32] : memref<192xf32, #tpu.memory_space<smem>>
    %184 = vector.broadcast %183 : f32 to vector<16x32xf32>
    %185 = arith.mulf %184, %179 : vector<16x32xf32>
    %186 = arith.addf %120, %185 : vector<16x32xf32>
    %c80 = arith.constant 80 : index
    %187 = memref.load %arg3[%c80] : memref<192xf32, #tpu.memory_space<smem>>
    %188 = vector.broadcast %187 : f32 to vector<16x32xf32>
    %189 = arith.mulf %188, %36 : vector<16x32xf32>
    %190 = arith.addf %186, %189 : vector<16x32xf32>
    %c128 = arith.constant 128 : index
    %191 = memref.load %arg3[%c128] : memref<192xf32, #tpu.memory_space<smem>>
    %192 = vector.broadcast %191 : f32 to vector<16x32xf32>
    %193 = arith.mulf %192, %36 : vector<16x32xf32>
    %194 = arith.addf %128, %193 : vector<16x32xf32>
    %c176 = arith.constant 176 : index
    %195 = memref.load %arg3[%c176] : memref<192xf32, #tpu.memory_space<smem>>
    %196 = vector.broadcast %195 : f32 to vector<16x32xf32>
    %197 = arith.mulf %196, %182 : vector<16x32xf32>
    %198 = arith.addf %194, %197 : vector<16x32xf32>
    %c36 = arith.constant 36 : index
    %199 = memref.load %arg3[%c36] : memref<192xf32, #tpu.memory_space<smem>>
    %200 = vector.broadcast %199 : f32 to vector<16x32xf32>
    %201 = arith.mulf %200, %179 : vector<16x32xf32>
    %202 = arith.addf %136, %201 : vector<16x32xf32>
    %c84 = arith.constant 84 : index
    %203 = memref.load %arg3[%c84] : memref<192xf32, #tpu.memory_space<smem>>
    %204 = vector.broadcast %203 : f32 to vector<16x32xf32>
    %205 = arith.mulf %204, %36 : vector<16x32xf32>
    %206 = arith.addf %202, %205 : vector<16x32xf32>
    %c132 = arith.constant 132 : index
    %207 = memref.load %arg3[%c132] : memref<192xf32, #tpu.memory_space<smem>>
    %208 = vector.broadcast %207 : f32 to vector<16x32xf32>
    %209 = arith.mulf %208, %36 : vector<16x32xf32>
    %210 = arith.addf %144, %209 : vector<16x32xf32>
    %c180 = arith.constant 180 : index
    %211 = memref.load %arg3[%c180] : memref<192xf32, #tpu.memory_space<smem>>
    %212 = vector.broadcast %211 : f32 to vector<16x32xf32>
    %213 = arith.mulf %212, %182 : vector<16x32xf32>
    %214 = arith.addf %210, %213 : vector<16x32xf32>
    %c40 = arith.constant 40 : index
    %215 = memref.load %arg3[%c40] : memref<192xf32, #tpu.memory_space<smem>>
    %216 = vector.broadcast %215 : f32 to vector<16x32xf32>
    %217 = arith.mulf %216, %179 : vector<16x32xf32>
    %218 = arith.addf %152, %217 : vector<16x32xf32>
    %c88 = arith.constant 88 : index
    %219 = memref.load %arg3[%c88] : memref<192xf32, #tpu.memory_space<smem>>
    %220 = vector.broadcast %219 : f32 to vector<16x32xf32>
    %221 = arith.mulf %220, %36 : vector<16x32xf32>
    %222 = arith.addf %218, %221 : vector<16x32xf32>
    %c136 = arith.constant 136 : index
    %223 = memref.load %arg3[%c136] : memref<192xf32, #tpu.memory_space<smem>>
    %224 = vector.broadcast %223 : f32 to vector<16x32xf32>
    %225 = arith.mulf %224, %36 : vector<16x32xf32>
    %226 = arith.addf %160, %225 : vector<16x32xf32>
    %c184 = arith.constant 184 : index
    %227 = memref.load %arg3[%c184] : memref<192xf32, #tpu.memory_space<smem>>
    %228 = vector.broadcast %227 : f32 to vector<16x32xf32>
    %229 = arith.mulf %228, %182 : vector<16x32xf32>
    %230 = arith.addf %226, %229 : vector<16x32xf32>
    %c44 = arith.constant 44 : index
    %231 = memref.load %arg3[%c44] : memref<192xf32, #tpu.memory_space<smem>>
    %232 = vector.broadcast %231 : f32 to vector<16x32xf32>
    %233 = arith.mulf %232, %179 : vector<16x32xf32>
    %234 = arith.addf %168, %233 : vector<16x32xf32>
    %c92 = arith.constant 92 : index
    %235 = memref.load %arg3[%c92] : memref<192xf32, #tpu.memory_space<smem>>
    %236 = vector.broadcast %235 : f32 to vector<16x32xf32>
    %237 = arith.mulf %236, %36 : vector<16x32xf32>
    %238 = arith.addf %234, %237 : vector<16x32xf32>
    %c140 = arith.constant 140 : index
    %239 = memref.load %arg3[%c140] : memref<192xf32, #tpu.memory_space<smem>>
    %240 = vector.broadcast %239 : f32 to vector<16x32xf32>
    %241 = arith.mulf %240, %36 : vector<16x32xf32>
    %242 = arith.addf %176, %241 : vector<16x32xf32>
    %c188 = arith.constant 188 : index
    %243 = memref.load %arg3[%c188] : memref<192xf32, #tpu.memory_space<smem>>
    %244 = vector.broadcast %243 : f32 to vector<16x32xf32>
    %245 = arith.mulf %244, %182 : vector<16x32xf32>
    %246 = arith.addf %242, %245 : vector<16x32xf32>
    %247 = vector.extract_strided_slice %13 {offsets = [16, 0], sizes = [16, 32], strides = [1, 1]} : vector<64x32xf32> to vector<16x32xf32>
    %c1_i32_25 = arith.constant 1 : i32
    %248 = tpu.dynamic_rotate %247 by %c1_i32_25 dim 1 : vector<16x32xf32>, i32 -> vector<16x32xf32>
    %cst_26 = arith.constant 0.000000e+00 : f32
    %249 = vector.broadcast %cst_26 : f32 to vector<16x32xf32>
    %250 = arith.select %4, %248, %249 : vector<16x32xi1>, vector<16x32xf32>
    %c31_i32_27 = arith.constant 31 : i32
    %251 = tpu.dynamic_rotate %247 by %c31_i32_27 dim 1 : vector<16x32xf32>, i32 -> vector<16x32xf32>
    %cst_28 = arith.constant 0.000000e+00 : f32
    %252 = vector.broadcast %cst_28 : f32 to vector<16x32xf32>
    %253 = arith.select %6, %251, %252 : vector<16x32xi1>, vector<16x32xf32>
    %c1_i32_29 = arith.constant 1 : i32
    %254 = tpu.dynamic_rotate %250 by %c1_i32_29 dim 0 : vector<16x32xf32>, i32 -> vector<16x32xf32>
    %cst_30 = arith.constant 0.000000e+00 : f32
    %255 = vector.broadcast %cst_30 : f32 to vector<16x32xf32>
    %256 = arith.select %8, %254, %255 : vector<16x32xi1>, vector<16x32xf32>
    %c15_i32_31 = arith.constant 15 : i32
    %257 = tpu.dynamic_rotate %250 by %c15_i32_31 dim 0 : vector<16x32xf32>, i32 -> vector<16x32xf32>
    %cst_32 = arith.constant 0.000000e+00 : f32
    %258 = vector.broadcast %cst_32 : f32 to vector<16x32xf32>
    %259 = arith.select %10, %257, %258 : vector<16x32xi1>, vector<16x32xf32>
    %c1_33 = arith.constant 1 : index
    %260 = memref.load %arg3[%c1_33] : memref<192xf32, #tpu.memory_space<smem>>
    %261 = vector.broadcast %260 : f32 to vector<16x32xf32>
    %262 = arith.mulf %261, %256 : vector<16x32xf32>
    %263 = arith.addf %190, %262 : vector<16x32xf32>
    %c49 = arith.constant 49 : index
    %264 = memref.load %arg3[%c49] : memref<192xf32, #tpu.memory_space<smem>>
    %265 = vector.broadcast %264 : f32 to vector<16x32xf32>
    %266 = arith.mulf %265, %250 : vector<16x32xf32>
    %267 = arith.addf %263, %266 : vector<16x32xf32>
    %c97 = arith.constant 97 : index
    %268 = memref.load %arg3[%c97] : memref<192xf32, #tpu.memory_space<smem>>
    %269 = vector.broadcast %268 : f32 to vector<16x32xf32>
    %270 = arith.mulf %269, %250 : vector<16x32xf32>
    %271 = arith.addf %198, %270 : vector<16x32xf32>
    %c145 = arith.constant 145 : index
    %272 = memref.load %arg3[%c145] : memref<192xf32, #tpu.memory_space<smem>>
    %273 = vector.broadcast %272 : f32 to vector<16x32xf32>
    %274 = arith.mulf %273, %259 : vector<16x32xf32>
    %275 = arith.addf %271, %274 : vector<16x32xf32>
    %c5 = arith.constant 5 : index
    %276 = memref.load %arg3[%c5] : memref<192xf32, #tpu.memory_space<smem>>
    %277 = vector.broadcast %276 : f32 to vector<16x32xf32>
    %278 = arith.mulf %277, %256 : vector<16x32xf32>
    %279 = arith.addf %206, %278 : vector<16x32xf32>
    %c53 = arith.constant 53 : index
    %280 = memref.load %arg3[%c53] : memref<192xf32, #tpu.memory_space<smem>>
    %281 = vector.broadcast %280 : f32 to vector<16x32xf32>
    %282 = arith.mulf %281, %250 : vector<16x32xf32>
    %283 = arith.addf %279, %282 : vector<16x32xf32>
    %c101 = arith.constant 101 : index
    %284 = memref.load %arg3[%c101] : memref<192xf32, #tpu.memory_space<smem>>
    %285 = vector.broadcast %284 : f32 to vector<16x32xf32>
    %286 = arith.mulf %285, %250 : vector<16x32xf32>
    %287 = arith.addf %214, %286 : vector<16x32xf32>
    %c149 = arith.constant 149 : index
    %288 = memref.load %arg3[%c149] : memref<192xf32, #tpu.memory_space<smem>>
    %289 = vector.broadcast %288 : f32 to vector<16x32xf32>
    %290 = arith.mulf %289, %259 : vector<16x32xf32>
    %291 = arith.addf %287, %290 : vector<16x32xf32>
    %c9 = arith.constant 9 : index
    %292 = memref.load %arg3[%c9] : memref<192xf32, #tpu.memory_space<smem>>
    %293 = vector.broadcast %292 : f32 to vector<16x32xf32>
    %294 = arith.mulf %293, %256 : vector<16x32xf32>
    %295 = arith.addf %222, %294 : vector<16x32xf32>
    %c57 = arith.constant 57 : index
    %296 = memref.load %arg3[%c57] : memref<192xf32, #tpu.memory_space<smem>>
    %297 = vector.broadcast %296 : f32 to vector<16x32xf32>
    %298 = arith.mulf %297, %250 : vector<16x32xf32>
    %299 = arith.addf %295, %298 : vector<16x32xf32>
    %c105 = arith.constant 105 : index
    %300 = memref.load %arg3[%c105] : memref<192xf32, #tpu.memory_space<smem>>
    %301 = vector.broadcast %300 : f32 to vector<16x32xf32>
    %302 = arith.mulf %301, %250 : vector<16x32xf32>
    %303 = arith.addf %230, %302 : vector<16x32xf32>
    %c153 = arith.constant 153 : index
    %304 = memref.load %arg3[%c153] : memref<192xf32, #tpu.memory_space<smem>>
    %305 = vector.broadcast %304 : f32 to vector<16x32xf32>
    %306 = arith.mulf %305, %259 : vector<16x32xf32>
    %307 = arith.addf %303, %306 : vector<16x32xf32>
    %c13 = arith.constant 13 : index
    %308 = memref.load %arg3[%c13] : memref<192xf32, #tpu.memory_space<smem>>
    %309 = vector.broadcast %308 : f32 to vector<16x32xf32>
    %310 = arith.mulf %309, %256 : vector<16x32xf32>
    %311 = arith.addf %238, %310 : vector<16x32xf32>
    %c61 = arith.constant 61 : index
    %312 = memref.load %arg3[%c61] : memref<192xf32, #tpu.memory_space<smem>>
    %313 = vector.broadcast %312 : f32 to vector<16x32xf32>
    %314 = arith.mulf %313, %250 : vector<16x32xf32>
    %315 = arith.addf %311, %314 : vector<16x32xf32>
    %c109 = arith.constant 109 : index
    %316 = memref.load %arg3[%c109] : memref<192xf32, #tpu.memory_space<smem>>
    %317 = vector.broadcast %316 : f32 to vector<16x32xf32>
    %318 = arith.mulf %317, %250 : vector<16x32xf32>
    %319 = arith.addf %246, %318 : vector<16x32xf32>
    %c157 = arith.constant 157 : index
    %320 = memref.load %arg3[%c157] : memref<192xf32, #tpu.memory_space<smem>>
    %321 = vector.broadcast %320 : f32 to vector<16x32xf32>
    %322 = arith.mulf %321, %259 : vector<16x32xf32>
    %323 = arith.addf %319, %322 : vector<16x32xf32>
    %c1_i32_34 = arith.constant 1 : i32
    %324 = tpu.dynamic_rotate %247 by %c1_i32_34 dim 0 : vector<16x32xf32>, i32 -> vector<16x32xf32>
    %cst_35 = arith.constant 0.000000e+00 : f32
    %325 = vector.broadcast %cst_35 : f32 to vector<16x32xf32>
    %326 = arith.select %8, %324, %325 : vector<16x32xi1>, vector<16x32xf32>
    %c15_i32_36 = arith.constant 15 : i32
    %327 = tpu.dynamic_rotate %247 by %c15_i32_36 dim 0 : vector<16x32xf32>, i32 -> vector<16x32xf32>
    %cst_37 = arith.constant 0.000000e+00 : f32
    %328 = vector.broadcast %cst_37 : f32 to vector<16x32xf32>
    %329 = arith.select %10, %327, %328 : vector<16x32xi1>, vector<16x32xf32>
    %c17 = arith.constant 17 : index
    %330 = memref.load %arg3[%c17] : memref<192xf32, #tpu.memory_space<smem>>
    %331 = vector.broadcast %330 : f32 to vector<16x32xf32>
    %332 = arith.mulf %331, %326 : vector<16x32xf32>
    %333 = arith.addf %267, %332 : vector<16x32xf32>
    %c65 = arith.constant 65 : index
    %334 = memref.load %arg3[%c65] : memref<192xf32, #tpu.memory_space<smem>>
    %335 = vector.broadcast %334 : f32 to vector<16x32xf32>
    %336 = arith.mulf %335, %247 : vector<16x32xf32>
    %337 = arith.addf %333, %336 : vector<16x32xf32>
    %c113 = arith.constant 113 : index
    %338 = memref.load %arg3[%c113] : memref<192xf32, #tpu.memory_space<smem>>
    %339 = vector.broadcast %338 : f32 to vector<16x32xf32>
    %340 = arith.mulf %339, %247 : vector<16x32xf32>
    %341 = arith.addf %275, %340 : vector<16x32xf32>
    %c161 = arith.constant 161 : index
    %342 = memref.load %arg3[%c161] : memref<192xf32, #tpu.memory_space<smem>>
    %343 = vector.broadcast %342 : f32 to vector<16x32xf32>
    %344 = arith.mulf %343, %329 : vector<16x32xf32>
    %345 = arith.addf %341, %344 : vector<16x32xf32>
    %c21 = arith.constant 21 : index
    %346 = memref.load %arg3[%c21] : memref<192xf32, #tpu.memory_space<smem>>
    %347 = vector.broadcast %346 : f32 to vector<16x32xf32>
    %348 = arith.mulf %347, %326 : vector<16x32xf32>
    %349 = arith.addf %283, %348 : vector<16x32xf32>
    %c69 = arith.constant 69 : index
    %350 = memref.load %arg3[%c69] : memref<192xf32, #tpu.memory_space<smem>>
    %351 = vector.broadcast %350 : f32 to vector<16x32xf32>
    %352 = arith.mulf %351, %247 : vector<16x32xf32>
    %353 = arith.addf %349, %352 : vector<16x32xf32>
    %c117 = arith.constant 117 : index
    %354 = memref.load %arg3[%c117] : memref<192xf32, #tpu.memory_space<smem>>
    %355 = vector.broadcast %354 : f32 to vector<16x32xf32>
    %356 = arith.mulf %355, %247 : vector<16x32xf32>
    %357 = arith.addf %291, %356 : vector<16x32xf32>
    %c165 = arith.constant 165 : index
    %358 = memref.load %arg3[%c165] : memref<192xf32, #tpu.memory_space<smem>>
    %359 = vector.broadcast %358 : f32 to vector<16x32xf32>
    %360 = arith.mulf %359, %329 : vector<16x32xf32>
    %361 = arith.addf %357, %360 : vector<16x32xf32>
    %c25 = arith.constant 25 : index
    %362 = memref.load %arg3[%c25] : memref<192xf32, #tpu.memory_space<smem>>
    %363 = vector.broadcast %362 : f32 to vector<16x32xf32>
    %364 = arith.mulf %363, %326 : vector<16x32xf32>
    %365 = arith.addf %299, %364 : vector<16x32xf32>
    %c73 = arith.constant 73 : index
    %366 = memref.load %arg3[%c73] : memref<192xf32, #tpu.memory_space<smem>>
    %367 = vector.broadcast %366 : f32 to vector<16x32xf32>
    %368 = arith.mulf %367, %247 : vector<16x32xf32>
    %369 = arith.addf %365, %368 : vector<16x32xf32>
    %c121 = arith.constant 121 : index
    %370 = memref.load %arg3[%c121] : memref<192xf32, #tpu.memory_space<smem>>
    %371 = vector.broadcast %370 : f32 to vector<16x32xf32>
    %372 = arith.mulf %371, %247 : vector<16x32xf32>
    %373 = arith.addf %307, %372 : vector<16x32xf32>
    %c169 = arith.constant 169 : index
    %374 = memref.load %arg3[%c169] : memref<192xf32, #tpu.memory_space<smem>>
    %375 = vector.broadcast %374 : f32 to vector<16x32xf32>
    %376 = arith.mulf %375, %329 : vector<16x32xf32>
    %377 = arith.addf %373, %376 : vector<16x32xf32>
    %c29 = arith.constant 29 : index
    %378 = memref.load %arg3[%c29] : memref<192xf32, #tpu.memory_space<smem>>
    %379 = vector.broadcast %378 : f32 to vector<16x32xf32>
    %380 = arith.mulf %379, %326 : vector<16x32xf32>
    %381 = arith.addf %315, %380 : vector<16x32xf32>
    %c77 = arith.constant 77 : index
    %382 = memref.load %arg3[%c77] : memref<192xf32, #tpu.memory_space<smem>>
    %383 = vector.broadcast %382 : f32 to vector<16x32xf32>
    %384 = arith.mulf %383, %247 : vector<16x32xf32>
    %385 = arith.addf %381, %384 : vector<16x32xf32>
    %c125 = arith.constant 125 : index
    %386 = memref.load %arg3[%c125] : memref<192xf32, #tpu.memory_space<smem>>
    %387 = vector.broadcast %386 : f32 to vector<16x32xf32>
    %388 = arith.mulf %387, %247 : vector<16x32xf32>
    %389 = arith.addf %323, %388 : vector<16x32xf32>
    %c173 = arith.constant 173 : index
    %390 = memref.load %arg3[%c173] : memref<192xf32, #tpu.memory_space<smem>>
    %391 = vector.broadcast %390 : f32 to vector<16x32xf32>
    %392 = arith.mulf %391, %329 : vector<16x32xf32>
    %393 = arith.addf %389, %392 : vector<16x32xf32>
    %c1_i32_38 = arith.constant 1 : i32
    %394 = tpu.dynamic_rotate %253 by %c1_i32_38 dim 0 : vector<16x32xf32>, i32 -> vector<16x32xf32>
    %cst_39 = arith.constant 0.000000e+00 : f32
    %395 = vector.broadcast %cst_39 : f32 to vector<16x32xf32>
    %396 = arith.select %8, %394, %395 : vector<16x32xi1>, vector<16x32xf32>
    %c15_i32_40 = arith.constant 15 : i32
    %397 = tpu.dynamic_rotate %253 by %c15_i32_40 dim 0 : vector<16x32xf32>, i32 -> vector<16x32xf32>
    %cst_41 = arith.constant 0.000000e+00 : f32
    %398 = vector.broadcast %cst_41 : f32 to vector<16x32xf32>
    %399 = arith.select %10, %397, %398 : vector<16x32xi1>, vector<16x32xf32>
    %c33 = arith.constant 33 : index
    %400 = memref.load %arg3[%c33] : memref<192xf32, #tpu.memory_space<smem>>
    %401 = vector.broadcast %400 : f32 to vector<16x32xf32>
    %402 = arith.mulf %401, %396 : vector<16x32xf32>
    %403 = arith.addf %337, %402 : vector<16x32xf32>
    %c81 = arith.constant 81 : index
    %404 = memref.load %arg3[%c81] : memref<192xf32, #tpu.memory_space<smem>>
    %405 = vector.broadcast %404 : f32 to vector<16x32xf32>
    %406 = arith.mulf %405, %253 : vector<16x32xf32>
    %407 = arith.addf %403, %406 : vector<16x32xf32>
    %c129 = arith.constant 129 : index
    %408 = memref.load %arg3[%c129] : memref<192xf32, #tpu.memory_space<smem>>
    %409 = vector.broadcast %408 : f32 to vector<16x32xf32>
    %410 = arith.mulf %409, %253 : vector<16x32xf32>
    %411 = arith.addf %345, %410 : vector<16x32xf32>
    %c177 = arith.constant 177 : index
    %412 = memref.load %arg3[%c177] : memref<192xf32, #tpu.memory_space<smem>>
    %413 = vector.broadcast %412 : f32 to vector<16x32xf32>
    %414 = arith.mulf %413, %399 : vector<16x32xf32>
    %415 = arith.addf %411, %414 : vector<16x32xf32>
    %c37 = arith.constant 37 : index
    %416 = memref.load %arg3[%c37] : memref<192xf32, #tpu.memory_space<smem>>
    %417 = vector.broadcast %416 : f32 to vector<16x32xf32>
    %418 = arith.mulf %417, %396 : vector<16x32xf32>
    %419 = arith.addf %353, %418 : vector<16x32xf32>
    %c85 = arith.constant 85 : index
    %420 = memref.load %arg3[%c85] : memref<192xf32, #tpu.memory_space<smem>>
    %421 = vector.broadcast %420 : f32 to vector<16x32xf32>
    %422 = arith.mulf %421, %253 : vector<16x32xf32>
    %423 = arith.addf %419, %422 : vector<16x32xf32>
    %c133 = arith.constant 133 : index
    %424 = memref.load %arg3[%c133] : memref<192xf32, #tpu.memory_space<smem>>
    %425 = vector.broadcast %424 : f32 to vector<16x32xf32>
    %426 = arith.mulf %425, %253 : vector<16x32xf32>
    %427 = arith.addf %361, %426 : vector<16x32xf32>
    %c181 = arith.constant 181 : index
    %428 = memref.load %arg3[%c181] : memref<192xf32, #tpu.memory_space<smem>>
    %429 = vector.broadcast %428 : f32 to vector<16x32xf32>
    %430 = arith.mulf %429, %399 : vector<16x32xf32>
    %431 = arith.addf %427, %430 : vector<16x32xf32>
    %c41 = arith.constant 41 : index
    %432 = memref.load %arg3[%c41] : memref<192xf32, #tpu.memory_space<smem>>
    %433 = vector.broadcast %432 : f32 to vector<16x32xf32>
    %434 = arith.mulf %433, %396 : vector<16x32xf32>
    %435 = arith.addf %369, %434 : vector<16x32xf32>
    %c89 = arith.constant 89 : index
    %436 = memref.load %arg3[%c89] : memref<192xf32, #tpu.memory_space<smem>>
    %437 = vector.broadcast %436 : f32 to vector<16x32xf32>
    %438 = arith.mulf %437, %253 : vector<16x32xf32>
    %439 = arith.addf %435, %438 : vector<16x32xf32>
    %c137 = arith.constant 137 : index
    %440 = memref.load %arg3[%c137] : memref<192xf32, #tpu.memory_space<smem>>
    %441 = vector.broadcast %440 : f32 to vector<16x32xf32>
    %442 = arith.mulf %441, %253 : vector<16x32xf32>
    %443 = arith.addf %377, %442 : vector<16x32xf32>
    %c185 = arith.constant 185 : index
    %444 = memref.load %arg3[%c185] : memref<192xf32, #tpu.memory_space<smem>>
    %445 = vector.broadcast %444 : f32 to vector<16x32xf32>
    %446 = arith.mulf %445, %399 : vector<16x32xf32>
    %447 = arith.addf %443, %446 : vector<16x32xf32>
    %c45 = arith.constant 45 : index
    %448 = memref.load %arg3[%c45] : memref<192xf32, #tpu.memory_space<smem>>
    %449 = vector.broadcast %448 : f32 to vector<16x32xf32>
    %450 = arith.mulf %449, %396 : vector<16x32xf32>
    %451 = arith.addf %385, %450 : vector<16x32xf32>
    %c93 = arith.constant 93 : index
    %452 = memref.load %arg3[%c93] : memref<192xf32, #tpu.memory_space<smem>>
    %453 = vector.broadcast %452 : f32 to vector<16x32xf32>
    %454 = arith.mulf %453, %253 : vector<16x32xf32>
    %455 = arith.addf %451, %454 : vector<16x32xf32>
    %c141 = arith.constant 141 : index
    %456 = memref.load %arg3[%c141] : memref<192xf32, #tpu.memory_space<smem>>
    %457 = vector.broadcast %456 : f32 to vector<16x32xf32>
    %458 = arith.mulf %457, %253 : vector<16x32xf32>
    %459 = arith.addf %393, %458 : vector<16x32xf32>
    %c189 = arith.constant 189 : index
    %460 = memref.load %arg3[%c189] : memref<192xf32, #tpu.memory_space<smem>>
    %461 = vector.broadcast %460 : f32 to vector<16x32xf32>
    %462 = arith.mulf %461, %399 : vector<16x32xf32>
    %463 = arith.addf %459, %462 : vector<16x32xf32>
    %464 = vector.extract_strided_slice %13 {offsets = [32, 0], sizes = [16, 32], strides = [1, 1]} : vector<64x32xf32> to vector<16x32xf32>
    %c1_i32_42 = arith.constant 1 : i32
    %465 = tpu.dynamic_rotate %464 by %c1_i32_42 dim 1 : vector<16x32xf32>, i32 -> vector<16x32xf32>
    %cst_43 = arith.constant 0.000000e+00 : f32
    %466 = vector.broadcast %cst_43 : f32 to vector<16x32xf32>
    %467 = arith.select %4, %465, %466 : vector<16x32xi1>, vector<16x32xf32>
    %c31_i32_44 = arith.constant 31 : i32
    %468 = tpu.dynamic_rotate %464 by %c31_i32_44 dim 1 : vector<16x32xf32>, i32 -> vector<16x32xf32>
    %cst_45 = arith.constant 0.000000e+00 : f32
    %469 = vector.broadcast %cst_45 : f32 to vector<16x32xf32>
    %470 = arith.select %6, %468, %469 : vector<16x32xi1>, vector<16x32xf32>
    %c1_i32_46 = arith.constant 1 : i32
    %471 = tpu.dynamic_rotate %467 by %c1_i32_46 dim 0 : vector<16x32xf32>, i32 -> vector<16x32xf32>
    %cst_47 = arith.constant 0.000000e+00 : f32
    %472 = vector.broadcast %cst_47 : f32 to vector<16x32xf32>
    %473 = arith.select %8, %471, %472 : vector<16x32xi1>, vector<16x32xf32>
    %c15_i32_48 = arith.constant 15 : i32
    %474 = tpu.dynamic_rotate %467 by %c15_i32_48 dim 0 : vector<16x32xf32>, i32 -> vector<16x32xf32>
    %cst_49 = arith.constant 0.000000e+00 : f32
    %475 = vector.broadcast %cst_49 : f32 to vector<16x32xf32>
    %476 = arith.select %10, %474, %475 : vector<16x32xi1>, vector<16x32xf32>
    %c2_50 = arith.constant 2 : index
    %477 = memref.load %arg3[%c2_50] : memref<192xf32, #tpu.memory_space<smem>>
    %478 = vector.broadcast %477 : f32 to vector<16x32xf32>
    %479 = arith.mulf %478, %473 : vector<16x32xf32>
    %480 = arith.addf %407, %479 : vector<16x32xf32>
    %c50 = arith.constant 50 : index
    %481 = memref.load %arg3[%c50] : memref<192xf32, #tpu.memory_space<smem>>
    %482 = vector.broadcast %481 : f32 to vector<16x32xf32>
    %483 = arith.mulf %482, %467 : vector<16x32xf32>
    %484 = arith.addf %480, %483 : vector<16x32xf32>
    %c98 = arith.constant 98 : index
    %485 = memref.load %arg3[%c98] : memref<192xf32, #tpu.memory_space<smem>>
    %486 = vector.broadcast %485 : f32 to vector<16x32xf32>
    %487 = arith.mulf %486, %467 : vector<16x32xf32>
    %488 = arith.addf %415, %487 : vector<16x32xf32>
    %c146 = arith.constant 146 : index
    %489 = memref.load %arg3[%c146] : memref<192xf32, #tpu.memory_space<smem>>
    %490 = vector.broadcast %489 : f32 to vector<16x32xf32>
    %491 = arith.mulf %490, %476 : vector<16x32xf32>
    %492 = arith.addf %488, %491 : vector<16x32xf32>
    %c6 = arith.constant 6 : index
    %493 = memref.load %arg3[%c6] : memref<192xf32, #tpu.memory_space<smem>>
    %494 = vector.broadcast %493 : f32 to vector<16x32xf32>
    %495 = arith.mulf %494, %473 : vector<16x32xf32>
    %496 = arith.addf %423, %495 : vector<16x32xf32>
    %c54 = arith.constant 54 : index
    %497 = memref.load %arg3[%c54] : memref<192xf32, #tpu.memory_space<smem>>
    %498 = vector.broadcast %497 : f32 to vector<16x32xf32>
    %499 = arith.mulf %498, %467 : vector<16x32xf32>
    %500 = arith.addf %496, %499 : vector<16x32xf32>
    %c102 = arith.constant 102 : index
    %501 = memref.load %arg3[%c102] : memref<192xf32, #tpu.memory_space<smem>>
    %502 = vector.broadcast %501 : f32 to vector<16x32xf32>
    %503 = arith.mulf %502, %467 : vector<16x32xf32>
    %504 = arith.addf %431, %503 : vector<16x32xf32>
    %c150 = arith.constant 150 : index
    %505 = memref.load %arg3[%c150] : memref<192xf32, #tpu.memory_space<smem>>
    %506 = vector.broadcast %505 : f32 to vector<16x32xf32>
    %507 = arith.mulf %506, %476 : vector<16x32xf32>
    %508 = arith.addf %504, %507 : vector<16x32xf32>
    %c10 = arith.constant 10 : index
    %509 = memref.load %arg3[%c10] : memref<192xf32, #tpu.memory_space<smem>>
    %510 = vector.broadcast %509 : f32 to vector<16x32xf32>
    %511 = arith.mulf %510, %473 : vector<16x32xf32>
    %512 = arith.addf %439, %511 : vector<16x32xf32>
    %c58 = arith.constant 58 : index
    %513 = memref.load %arg3[%c58] : memref<192xf32, #tpu.memory_space<smem>>
    %514 = vector.broadcast %513 : f32 to vector<16x32xf32>
    %515 = arith.mulf %514, %467 : vector<16x32xf32>
    %516 = arith.addf %512, %515 : vector<16x32xf32>
    %c106 = arith.constant 106 : index
    %517 = memref.load %arg3[%c106] : memref<192xf32, #tpu.memory_space<smem>>
    %518 = vector.broadcast %517 : f32 to vector<16x32xf32>
    %519 = arith.mulf %518, %467 : vector<16x32xf32>
    %520 = arith.addf %447, %519 : vector<16x32xf32>
    %c154 = arith.constant 154 : index
    %521 = memref.load %arg3[%c154] : memref<192xf32, #tpu.memory_space<smem>>
    %522 = vector.broadcast %521 : f32 to vector<16x32xf32>
    %523 = arith.mulf %522, %476 : vector<16x32xf32>
    %524 = arith.addf %520, %523 : vector<16x32xf32>
    %c14 = arith.constant 14 : index
    %525 = memref.load %arg3[%c14] : memref<192xf32, #tpu.memory_space<smem>>
    %526 = vector.broadcast %525 : f32 to vector<16x32xf32>
    %527 = arith.mulf %526, %473 : vector<16x32xf32>
    %528 = arith.addf %455, %527 : vector<16x32xf32>
    %c62 = arith.constant 62 : index
    %529 = memref.load %arg3[%c62] : memref<192xf32, #tpu.memory_space<smem>>
    %530 = vector.broadcast %529 : f32 to vector<16x32xf32>
    %531 = arith.mulf %530, %467 : vector<16x32xf32>
    %532 = arith.addf %528, %531 : vector<16x32xf32>
    %c110 = arith.constant 110 : index
    %533 = memref.load %arg3[%c110] : memref<192xf32, #tpu.memory_space<smem>>
    %534 = vector.broadcast %533 : f32 to vector<16x32xf32>
    %535 = arith.mulf %534, %467 : vector<16x32xf32>
    %536 = arith.addf %463, %535 : vector<16x32xf32>
    %c158 = arith.constant 158 : index
    %537 = memref.load %arg3[%c158] : memref<192xf32, #tpu.memory_space<smem>>
    %538 = vector.broadcast %537 : f32 to vector<16x32xf32>
    %539 = arith.mulf %538, %476 : vector<16x32xf32>
    %540 = arith.addf %536, %539 : vector<16x32xf32>
    %c1_i32_51 = arith.constant 1 : i32
    %541 = tpu.dynamic_rotate %464 by %c1_i32_51 dim 0 : vector<16x32xf32>, i32 -> vector<16x32xf32>
    %cst_52 = arith.constant 0.000000e+00 : f32
    %542 = vector.broadcast %cst_52 : f32 to vector<16x32xf32>
    %543 = arith.select %8, %541, %542 : vector<16x32xi1>, vector<16x32xf32>
    %c15_i32_53 = arith.constant 15 : i32
    %544 = tpu.dynamic_rotate %464 by %c15_i32_53 dim 0 : vector<16x32xf32>, i32 -> vector<16x32xf32>
    %cst_54 = arith.constant 0.000000e+00 : f32
    %545 = vector.broadcast %cst_54 : f32 to vector<16x32xf32>
    %546 = arith.select %10, %544, %545 : vector<16x32xi1>, vector<16x32xf32>
    %c18 = arith.constant 18 : index
    %547 = memref.load %arg3[%c18] : memref<192xf32, #tpu.memory_space<smem>>
    %548 = vector.broadcast %547 : f32 to vector<16x32xf32>
    %549 = arith.mulf %548, %543 : vector<16x32xf32>
    %550 = arith.addf %484, %549 : vector<16x32xf32>
    %c66 = arith.constant 66 : index
    %551 = memref.load %arg3[%c66] : memref<192xf32, #tpu.memory_space<smem>>
    %552 = vector.broadcast %551 : f32 to vector<16x32xf32>
    %553 = arith.mulf %552, %464 : vector<16x32xf32>
    %554 = arith.addf %550, %553 : vector<16x32xf32>
    %c114 = arith.constant 114 : index
    %555 = memref.load %arg3[%c114] : memref<192xf32, #tpu.memory_space<smem>>
    %556 = vector.broadcast %555 : f32 to vector<16x32xf32>
    %557 = arith.mulf %556, %464 : vector<16x32xf32>
    %558 = arith.addf %492, %557 : vector<16x32xf32>
    %c162 = arith.constant 162 : index
    %559 = memref.load %arg3[%c162] : memref<192xf32, #tpu.memory_space<smem>>
    %560 = vector.broadcast %559 : f32 to vector<16x32xf32>
    %561 = arith.mulf %560, %546 : vector<16x32xf32>
    %562 = arith.addf %558, %561 : vector<16x32xf32>
    %c22 = arith.constant 22 : index
    %563 = memref.load %arg3[%c22] : memref<192xf32, #tpu.memory_space<smem>>
    %564 = vector.broadcast %563 : f32 to vector<16x32xf32>
    %565 = arith.mulf %564, %543 : vector<16x32xf32>
    %566 = arith.addf %500, %565 : vector<16x32xf32>
    %c70 = arith.constant 70 : index
    %567 = memref.load %arg3[%c70] : memref<192xf32, #tpu.memory_space<smem>>
    %568 = vector.broadcast %567 : f32 to vector<16x32xf32>
    %569 = arith.mulf %568, %464 : vector<16x32xf32>
    %570 = arith.addf %566, %569 : vector<16x32xf32>
    %c118 = arith.constant 118 : index
    %571 = memref.load %arg3[%c118] : memref<192xf32, #tpu.memory_space<smem>>
    %572 = vector.broadcast %571 : f32 to vector<16x32xf32>
    %573 = arith.mulf %572, %464 : vector<16x32xf32>
    %574 = arith.addf %508, %573 : vector<16x32xf32>
    %c166 = arith.constant 166 : index
    %575 = memref.load %arg3[%c166] : memref<192xf32, #tpu.memory_space<smem>>
    %576 = vector.broadcast %575 : f32 to vector<16x32xf32>
    %577 = arith.mulf %576, %546 : vector<16x32xf32>
    %578 = arith.addf %574, %577 : vector<16x32xf32>
    %c26 = arith.constant 26 : index
    %579 = memref.load %arg3[%c26] : memref<192xf32, #tpu.memory_space<smem>>
    %580 = vector.broadcast %579 : f32 to vector<16x32xf32>
    %581 = arith.mulf %580, %543 : vector<16x32xf32>
    %582 = arith.addf %516, %581 : vector<16x32xf32>
    %c74 = arith.constant 74 : index
    %583 = memref.load %arg3[%c74] : memref<192xf32, #tpu.memory_space<smem>>
    %584 = vector.broadcast %583 : f32 to vector<16x32xf32>
    %585 = arith.mulf %584, %464 : vector<16x32xf32>
    %586 = arith.addf %582, %585 : vector<16x32xf32>
    %c122 = arith.constant 122 : index
    %587 = memref.load %arg3[%c122] : memref<192xf32, #tpu.memory_space<smem>>
    %588 = vector.broadcast %587 : f32 to vector<16x32xf32>
    %589 = arith.mulf %588, %464 : vector<16x32xf32>
    %590 = arith.addf %524, %589 : vector<16x32xf32>
    %c170 = arith.constant 170 : index
    %591 = memref.load %arg3[%c170] : memref<192xf32, #tpu.memory_space<smem>>
    %592 = vector.broadcast %591 : f32 to vector<16x32xf32>
    %593 = arith.mulf %592, %546 : vector<16x32xf32>
    %594 = arith.addf %590, %593 : vector<16x32xf32>
    %c30 = arith.constant 30 : index
    %595 = memref.load %arg3[%c30] : memref<192xf32, #tpu.memory_space<smem>>
    %596 = vector.broadcast %595 : f32 to vector<16x32xf32>
    %597 = arith.mulf %596, %543 : vector<16x32xf32>
    %598 = arith.addf %532, %597 : vector<16x32xf32>
    %c78 = arith.constant 78 : index
    %599 = memref.load %arg3[%c78] : memref<192xf32, #tpu.memory_space<smem>>
    %600 = vector.broadcast %599 : f32 to vector<16x32xf32>
    %601 = arith.mulf %600, %464 : vector<16x32xf32>
    %602 = arith.addf %598, %601 : vector<16x32xf32>
    %c126 = arith.constant 126 : index
    %603 = memref.load %arg3[%c126] : memref<192xf32, #tpu.memory_space<smem>>
    %604 = vector.broadcast %603 : f32 to vector<16x32xf32>
    %605 = arith.mulf %604, %464 : vector<16x32xf32>
    %606 = arith.addf %540, %605 : vector<16x32xf32>
    %c174 = arith.constant 174 : index
    %607 = memref.load %arg3[%c174] : memref<192xf32, #tpu.memory_space<smem>>
    %608 = vector.broadcast %607 : f32 to vector<16x32xf32>
    %609 = arith.mulf %608, %546 : vector<16x32xf32>
    %610 = arith.addf %606, %609 : vector<16x32xf32>
    %c1_i32_55 = arith.constant 1 : i32
    %611 = tpu.dynamic_rotate %470 by %c1_i32_55 dim 0 : vector<16x32xf32>, i32 -> vector<16x32xf32>
    %cst_56 = arith.constant 0.000000e+00 : f32
    %612 = vector.broadcast %cst_56 : f32 to vector<16x32xf32>
    %613 = arith.select %8, %611, %612 : vector<16x32xi1>, vector<16x32xf32>
    %c15_i32_57 = arith.constant 15 : i32
    %614 = tpu.dynamic_rotate %470 by %c15_i32_57 dim 0 : vector<16x32xf32>, i32 -> vector<16x32xf32>
    %cst_58 = arith.constant 0.000000e+00 : f32
    %615 = vector.broadcast %cst_58 : f32 to vector<16x32xf32>
    %616 = arith.select %10, %614, %615 : vector<16x32xi1>, vector<16x32xf32>
    %c34 = arith.constant 34 : index
    %617 = memref.load %arg3[%c34] : memref<192xf32, #tpu.memory_space<smem>>
    %618 = vector.broadcast %617 : f32 to vector<16x32xf32>
    %619 = arith.mulf %618, %613 : vector<16x32xf32>
    %620 = arith.addf %554, %619 : vector<16x32xf32>
    %c82 = arith.constant 82 : index
    %621 = memref.load %arg3[%c82] : memref<192xf32, #tpu.memory_space<smem>>
    %622 = vector.broadcast %621 : f32 to vector<16x32xf32>
    %623 = arith.mulf %622, %470 : vector<16x32xf32>
    %624 = arith.addf %620, %623 : vector<16x32xf32>
    %c130 = arith.constant 130 : index
    %625 = memref.load %arg3[%c130] : memref<192xf32, #tpu.memory_space<smem>>
    %626 = vector.broadcast %625 : f32 to vector<16x32xf32>
    %627 = arith.mulf %626, %470 : vector<16x32xf32>
    %628 = arith.addf %562, %627 : vector<16x32xf32>
    %c178 = arith.constant 178 : index
    %629 = memref.load %arg3[%c178] : memref<192xf32, #tpu.memory_space<smem>>
    %630 = vector.broadcast %629 : f32 to vector<16x32xf32>
    %631 = arith.mulf %630, %616 : vector<16x32xf32>
    %632 = arith.addf %628, %631 : vector<16x32xf32>
    %c38 = arith.constant 38 : index
    %633 = memref.load %arg3[%c38] : memref<192xf32, #tpu.memory_space<smem>>
    %634 = vector.broadcast %633 : f32 to vector<16x32xf32>
    %635 = arith.mulf %634, %613 : vector<16x32xf32>
    %636 = arith.addf %570, %635 : vector<16x32xf32>
    %c86 = arith.constant 86 : index
    %637 = memref.load %arg3[%c86] : memref<192xf32, #tpu.memory_space<smem>>
    %638 = vector.broadcast %637 : f32 to vector<16x32xf32>
    %639 = arith.mulf %638, %470 : vector<16x32xf32>
    %640 = arith.addf %636, %639 : vector<16x32xf32>
    %c134 = arith.constant 134 : index
    %641 = memref.load %arg3[%c134] : memref<192xf32, #tpu.memory_space<smem>>
    %642 = vector.broadcast %641 : f32 to vector<16x32xf32>
    %643 = arith.mulf %642, %470 : vector<16x32xf32>
    %644 = arith.addf %578, %643 : vector<16x32xf32>
    %c182 = arith.constant 182 : index
    %645 = memref.load %arg3[%c182] : memref<192xf32, #tpu.memory_space<smem>>
    %646 = vector.broadcast %645 : f32 to vector<16x32xf32>
    %647 = arith.mulf %646, %616 : vector<16x32xf32>
    %648 = arith.addf %644, %647 : vector<16x32xf32>
    %c42 = arith.constant 42 : index
    %649 = memref.load %arg3[%c42] : memref<192xf32, #tpu.memory_space<smem>>
    %650 = vector.broadcast %649 : f32 to vector<16x32xf32>
    %651 = arith.mulf %650, %613 : vector<16x32xf32>
    %652 = arith.addf %586, %651 : vector<16x32xf32>
    %c90 = arith.constant 90 : index
    %653 = memref.load %arg3[%c90] : memref<192xf32, #tpu.memory_space<smem>>
    %654 = vector.broadcast %653 : f32 to vector<16x32xf32>
    %655 = arith.mulf %654, %470 : vector<16x32xf32>
    %656 = arith.addf %652, %655 : vector<16x32xf32>
    %c138 = arith.constant 138 : index
    %657 = memref.load %arg3[%c138] : memref<192xf32, #tpu.memory_space<smem>>
    %658 = vector.broadcast %657 : f32 to vector<16x32xf32>
    %659 = arith.mulf %658, %470 : vector<16x32xf32>
    %660 = arith.addf %594, %659 : vector<16x32xf32>
    %c186 = arith.constant 186 : index
    %661 = memref.load %arg3[%c186] : memref<192xf32, #tpu.memory_space<smem>>
    %662 = vector.broadcast %661 : f32 to vector<16x32xf32>
    %663 = arith.mulf %662, %616 : vector<16x32xf32>
    %664 = arith.addf %660, %663 : vector<16x32xf32>
    %c46 = arith.constant 46 : index
    %665 = memref.load %arg3[%c46] : memref<192xf32, #tpu.memory_space<smem>>
    %666 = vector.broadcast %665 : f32 to vector<16x32xf32>
    %667 = arith.mulf %666, %613 : vector<16x32xf32>
    %668 = arith.addf %602, %667 : vector<16x32xf32>
    %c94 = arith.constant 94 : index
    %669 = memref.load %arg3[%c94] : memref<192xf32, #tpu.memory_space<smem>>
    %670 = vector.broadcast %669 : f32 to vector<16x32xf32>
    %671 = arith.mulf %670, %470 : vector<16x32xf32>
    %672 = arith.addf %668, %671 : vector<16x32xf32>
    %c142 = arith.constant 142 : index
    %673 = memref.load %arg3[%c142] : memref<192xf32, #tpu.memory_space<smem>>
    %674 = vector.broadcast %673 : f32 to vector<16x32xf32>
    %675 = arith.mulf %674, %470 : vector<16x32xf32>
    %676 = arith.addf %610, %675 : vector<16x32xf32>
    %c190 = arith.constant 190 : index
    %677 = memref.load %arg3[%c190] : memref<192xf32, #tpu.memory_space<smem>>
    %678 = vector.broadcast %677 : f32 to vector<16x32xf32>
    %679 = arith.mulf %678, %616 : vector<16x32xf32>
    %680 = arith.addf %676, %679 : vector<16x32xf32>
    %681 = vector.extract_strided_slice %13 {offsets = [48, 0], sizes = [16, 32], strides = [1, 1]} : vector<64x32xf32> to vector<16x32xf32>
    %c1_i32_59 = arith.constant 1 : i32
    %682 = tpu.dynamic_rotate %681 by %c1_i32_59 dim 1 : vector<16x32xf32>, i32 -> vector<16x32xf32>
    %cst_60 = arith.constant 0.000000e+00 : f32
    %683 = vector.broadcast %cst_60 : f32 to vector<16x32xf32>
    %684 = arith.select %4, %682, %683 : vector<16x32xi1>, vector<16x32xf32>
    %c31_i32_61 = arith.constant 31 : i32
    %685 = tpu.dynamic_rotate %681 by %c31_i32_61 dim 1 : vector<16x32xf32>, i32 -> vector<16x32xf32>
    %cst_62 = arith.constant 0.000000e+00 : f32
    %686 = vector.broadcast %cst_62 : f32 to vector<16x32xf32>
    %687 = arith.select %6, %685, %686 : vector<16x32xi1>, vector<16x32xf32>
    %c1_i32_63 = arith.constant 1 : i32
    %688 = tpu.dynamic_rotate %684 by %c1_i32_63 dim 0 : vector<16x32xf32>, i32 -> vector<16x32xf32>
    %cst_64 = arith.constant 0.000000e+00 : f32
    %689 = vector.broadcast %cst_64 : f32 to vector<16x32xf32>
    %690 = arith.select %8, %688, %689 : vector<16x32xi1>, vector<16x32xf32>
    %c15_i32_65 = arith.constant 15 : i32
    %691 = tpu.dynamic_rotate %684 by %c15_i32_65 dim 0 : vector<16x32xf32>, i32 -> vector<16x32xf32>
    %cst_66 = arith.constant 0.000000e+00 : f32
    %692 = vector.broadcast %cst_66 : f32 to vector<16x32xf32>
    %693 = arith.select %10, %691, %692 : vector<16x32xi1>, vector<16x32xf32>
    %c3_67 = arith.constant 3 : index
    %694 = memref.load %arg3[%c3_67] : memref<192xf32, #tpu.memory_space<smem>>
    %695 = vector.broadcast %694 : f32 to vector<16x32xf32>
    %696 = arith.mulf %695, %690 : vector<16x32xf32>
    %697 = arith.addf %624, %696 : vector<16x32xf32>
    %c51 = arith.constant 51 : index
    %698 = memref.load %arg3[%c51] : memref<192xf32, #tpu.memory_space<smem>>
    %699 = vector.broadcast %698 : f32 to vector<16x32xf32>
    %700 = arith.mulf %699, %684 : vector<16x32xf32>
    %701 = arith.addf %697, %700 : vector<16x32xf32>
    %c99 = arith.constant 99 : index
    %702 = memref.load %arg3[%c99] : memref<192xf32, #tpu.memory_space<smem>>
    %703 = vector.broadcast %702 : f32 to vector<16x32xf32>
    %704 = arith.mulf %703, %684 : vector<16x32xf32>
    %705 = arith.addf %632, %704 : vector<16x32xf32>
    %c147 = arith.constant 147 : index
    %706 = memref.load %arg3[%c147] : memref<192xf32, #tpu.memory_space<smem>>
    %707 = vector.broadcast %706 : f32 to vector<16x32xf32>
    %708 = arith.mulf %707, %693 : vector<16x32xf32>
    %709 = arith.addf %705, %708 : vector<16x32xf32>
    %c7 = arith.constant 7 : index
    %710 = memref.load %arg3[%c7] : memref<192xf32, #tpu.memory_space<smem>>
    %711 = vector.broadcast %710 : f32 to vector<16x32xf32>
    %712 = arith.mulf %711, %690 : vector<16x32xf32>
    %713 = arith.addf %640, %712 : vector<16x32xf32>
    %c55 = arith.constant 55 : index
    %714 = memref.load %arg3[%c55] : memref<192xf32, #tpu.memory_space<smem>>
    %715 = vector.broadcast %714 : f32 to vector<16x32xf32>
    %716 = arith.mulf %715, %684 : vector<16x32xf32>
    %717 = arith.addf %713, %716 : vector<16x32xf32>
    %c103 = arith.constant 103 : index
    %718 = memref.load %arg3[%c103] : memref<192xf32, #tpu.memory_space<smem>>
    %719 = vector.broadcast %718 : f32 to vector<16x32xf32>
    %720 = arith.mulf %719, %684 : vector<16x32xf32>
    %721 = arith.addf %648, %720 : vector<16x32xf32>
    %c151 = arith.constant 151 : index
    %722 = memref.load %arg3[%c151] : memref<192xf32, #tpu.memory_space<smem>>
    %723 = vector.broadcast %722 : f32 to vector<16x32xf32>
    %724 = arith.mulf %723, %693 : vector<16x32xf32>
    %725 = arith.addf %721, %724 : vector<16x32xf32>
    %c11 = arith.constant 11 : index
    %726 = memref.load %arg3[%c11] : memref<192xf32, #tpu.memory_space<smem>>
    %727 = vector.broadcast %726 : f32 to vector<16x32xf32>
    %728 = arith.mulf %727, %690 : vector<16x32xf32>
    %729 = arith.addf %656, %728 : vector<16x32xf32>
    %c59 = arith.constant 59 : index
    %730 = memref.load %arg3[%c59] : memref<192xf32, #tpu.memory_space<smem>>
    %731 = vector.broadcast %730 : f32 to vector<16x32xf32>
    %732 = arith.mulf %731, %684 : vector<16x32xf32>
    %733 = arith.addf %729, %732 : vector<16x32xf32>
    %c107 = arith.constant 107 : index
    %734 = memref.load %arg3[%c107] : memref<192xf32, #tpu.memory_space<smem>>
    %735 = vector.broadcast %734 : f32 to vector<16x32xf32>
    %736 = arith.mulf %735, %684 : vector<16x32xf32>
    %737 = arith.addf %664, %736 : vector<16x32xf32>
    %c155 = arith.constant 155 : index
    %738 = memref.load %arg3[%c155] : memref<192xf32, #tpu.memory_space<smem>>
    %739 = vector.broadcast %738 : f32 to vector<16x32xf32>
    %740 = arith.mulf %739, %693 : vector<16x32xf32>
    %741 = arith.addf %737, %740 : vector<16x32xf32>
    %c15 = arith.constant 15 : index
    %742 = memref.load %arg3[%c15] : memref<192xf32, #tpu.memory_space<smem>>
    %743 = vector.broadcast %742 : f32 to vector<16x32xf32>
    %744 = arith.mulf %743, %690 : vector<16x32xf32>
    %745 = arith.addf %672, %744 : vector<16x32xf32>
    %c63 = arith.constant 63 : index
    %746 = memref.load %arg3[%c63] : memref<192xf32, #tpu.memory_space<smem>>
    %747 = vector.broadcast %746 : f32 to vector<16x32xf32>
    %748 = arith.mulf %747, %684 : vector<16x32xf32>
    %749 = arith.addf %745, %748 : vector<16x32xf32>
    %c111 = arith.constant 111 : index
    %750 = memref.load %arg3[%c111] : memref<192xf32, #tpu.memory_space<smem>>
    %751 = vector.broadcast %750 : f32 to vector<16x32xf32>
    %752 = arith.mulf %751, %684 : vector<16x32xf32>
    %753 = arith.addf %680, %752 : vector<16x32xf32>
    %c159 = arith.constant 159 : index
    %754 = memref.load %arg3[%c159] : memref<192xf32, #tpu.memory_space<smem>>
    %755 = vector.broadcast %754 : f32 to vector<16x32xf32>
    %756 = arith.mulf %755, %693 : vector<16x32xf32>
    %757 = arith.addf %753, %756 : vector<16x32xf32>
    %c1_i32_68 = arith.constant 1 : i32
    %758 = tpu.dynamic_rotate %681 by %c1_i32_68 dim 0 : vector<16x32xf32>, i32 -> vector<16x32xf32>
    %cst_69 = arith.constant 0.000000e+00 : f32
    %759 = vector.broadcast %cst_69 : f32 to vector<16x32xf32>
    %760 = arith.select %8, %758, %759 : vector<16x32xi1>, vector<16x32xf32>
    %c15_i32_70 = arith.constant 15 : i32
    %761 = tpu.dynamic_rotate %681 by %c15_i32_70 dim 0 : vector<16x32xf32>, i32 -> vector<16x32xf32>
    %cst_71 = arith.constant 0.000000e+00 : f32
    %762 = vector.broadcast %cst_71 : f32 to vector<16x32xf32>
    %763 = arith.select %10, %761, %762 : vector<16x32xi1>, vector<16x32xf32>
    %c19 = arith.constant 19 : index
    %764 = memref.load %arg3[%c19] : memref<192xf32, #tpu.memory_space<smem>>
    %765 = vector.broadcast %764 : f32 to vector<16x32xf32>
    %766 = arith.mulf %765, %760 : vector<16x32xf32>
    %767 = arith.addf %701, %766 : vector<16x32xf32>
    %c67 = arith.constant 67 : index
    %768 = memref.load %arg3[%c67] : memref<192xf32, #tpu.memory_space<smem>>
    %769 = vector.broadcast %768 : f32 to vector<16x32xf32>
    %770 = arith.mulf %769, %681 : vector<16x32xf32>
    %771 = arith.addf %767, %770 : vector<16x32xf32>
    %c115 = arith.constant 115 : index
    %772 = memref.load %arg3[%c115] : memref<192xf32, #tpu.memory_space<smem>>
    %773 = vector.broadcast %772 : f32 to vector<16x32xf32>
    %774 = arith.mulf %773, %681 : vector<16x32xf32>
    %775 = arith.addf %709, %774 : vector<16x32xf32>
    %c163 = arith.constant 163 : index
    %776 = memref.load %arg3[%c163] : memref<192xf32, #tpu.memory_space<smem>>
    %777 = vector.broadcast %776 : f32 to vector<16x32xf32>
    %778 = arith.mulf %777, %763 : vector<16x32xf32>
    %779 = arith.addf %775, %778 : vector<16x32xf32>
    %c23 = arith.constant 23 : index
    %780 = memref.load %arg3[%c23] : memref<192xf32, #tpu.memory_space<smem>>
    %781 = vector.broadcast %780 : f32 to vector<16x32xf32>
    %782 = arith.mulf %781, %760 : vector<16x32xf32>
    %783 = arith.addf %717, %782 : vector<16x32xf32>
    %c71 = arith.constant 71 : index
    %784 = memref.load %arg3[%c71] : memref<192xf32, #tpu.memory_space<smem>>
    %785 = vector.broadcast %784 : f32 to vector<16x32xf32>
    %786 = arith.mulf %785, %681 : vector<16x32xf32>
    %787 = arith.addf %783, %786 : vector<16x32xf32>
    %c119 = arith.constant 119 : index
    %788 = memref.load %arg3[%c119] : memref<192xf32, #tpu.memory_space<smem>>
    %789 = vector.broadcast %788 : f32 to vector<16x32xf32>
    %790 = arith.mulf %789, %681 : vector<16x32xf32>
    %791 = arith.addf %725, %790 : vector<16x32xf32>
    %c167 = arith.constant 167 : index
    %792 = memref.load %arg3[%c167] : memref<192xf32, #tpu.memory_space<smem>>
    %793 = vector.broadcast %792 : f32 to vector<16x32xf32>
    %794 = arith.mulf %793, %763 : vector<16x32xf32>
    %795 = arith.addf %791, %794 : vector<16x32xf32>
    %c27 = arith.constant 27 : index
    %796 = memref.load %arg3[%c27] : memref<192xf32, #tpu.memory_space<smem>>
    %797 = vector.broadcast %796 : f32 to vector<16x32xf32>
    %798 = arith.mulf %797, %760 : vector<16x32xf32>
    %799 = arith.addf %733, %798 : vector<16x32xf32>
    %c75 = arith.constant 75 : index
    %800 = memref.load %arg3[%c75] : memref<192xf32, #tpu.memory_space<smem>>
    %801 = vector.broadcast %800 : f32 to vector<16x32xf32>
    %802 = arith.mulf %801, %681 : vector<16x32xf32>
    %803 = arith.addf %799, %802 : vector<16x32xf32>
    %c123 = arith.constant 123 : index
    %804 = memref.load %arg3[%c123] : memref<192xf32, #tpu.memory_space<smem>>
    %805 = vector.broadcast %804 : f32 to vector<16x32xf32>
    %806 = arith.mulf %805, %681 : vector<16x32xf32>
    %807 = arith.addf %741, %806 : vector<16x32xf32>
    %c171 = arith.constant 171 : index
    %808 = memref.load %arg3[%c171] : memref<192xf32, #tpu.memory_space<smem>>
    %809 = vector.broadcast %808 : f32 to vector<16x32xf32>
    %810 = arith.mulf %809, %763 : vector<16x32xf32>
    %811 = arith.addf %807, %810 : vector<16x32xf32>
    %c31 = arith.constant 31 : index
    %812 = memref.load %arg3[%c31] : memref<192xf32, #tpu.memory_space<smem>>
    %813 = vector.broadcast %812 : f32 to vector<16x32xf32>
    %814 = arith.mulf %813, %760 : vector<16x32xf32>
    %815 = arith.addf %749, %814 : vector<16x32xf32>
    %c79 = arith.constant 79 : index
    %816 = memref.load %arg3[%c79] : memref<192xf32, #tpu.memory_space<smem>>
    %817 = vector.broadcast %816 : f32 to vector<16x32xf32>
    %818 = arith.mulf %817, %681 : vector<16x32xf32>
    %819 = arith.addf %815, %818 : vector<16x32xf32>
    %c127 = arith.constant 127 : index
    %820 = memref.load %arg3[%c127] : memref<192xf32, #tpu.memory_space<smem>>
    %821 = vector.broadcast %820 : f32 to vector<16x32xf32>
    %822 = arith.mulf %821, %681 : vector<16x32xf32>
    %823 = arith.addf %757, %822 : vector<16x32xf32>
    %c175 = arith.constant 175 : index
    %824 = memref.load %arg3[%c175] : memref<192xf32, #tpu.memory_space<smem>>
    %825 = vector.broadcast %824 : f32 to vector<16x32xf32>
    %826 = arith.mulf %825, %763 : vector<16x32xf32>
    %827 = arith.addf %823, %826 : vector<16x32xf32>
    %c1_i32_72 = arith.constant 1 : i32
    %828 = tpu.dynamic_rotate %687 by %c1_i32_72 dim 0 : vector<16x32xf32>, i32 -> vector<16x32xf32>
    %cst_73 = arith.constant 0.000000e+00 : f32
    %829 = vector.broadcast %cst_73 : f32 to vector<16x32xf32>
    %830 = arith.select %8, %828, %829 : vector<16x32xi1>, vector<16x32xf32>
    %c15_i32_74 = arith.constant 15 : i32
    %831 = tpu.dynamic_rotate %687 by %c15_i32_74 dim 0 : vector<16x32xf32>, i32 -> vector<16x32xf32>
    %cst_75 = arith.constant 0.000000e+00 : f32
    %832 = vector.broadcast %cst_75 : f32 to vector<16x32xf32>
    %833 = arith.select %10, %831, %832 : vector<16x32xi1>, vector<16x32xf32>
    %c35 = arith.constant 35 : index
    %834 = memref.load %arg3[%c35] : memref<192xf32, #tpu.memory_space<smem>>
    %835 = vector.broadcast %834 : f32 to vector<16x32xf32>
    %836 = arith.mulf %835, %830 : vector<16x32xf32>
    %837 = arith.addf %771, %836 : vector<16x32xf32>
    %c83 = arith.constant 83 : index
    %838 = memref.load %arg3[%c83] : memref<192xf32, #tpu.memory_space<smem>>
    %839 = vector.broadcast %838 : f32 to vector<16x32xf32>
    %840 = arith.mulf %839, %687 : vector<16x32xf32>
    %841 = arith.addf %837, %840 : vector<16x32xf32>
    %c131 = arith.constant 131 : index
    %842 = memref.load %arg3[%c131] : memref<192xf32, #tpu.memory_space<smem>>
    %843 = vector.broadcast %842 : f32 to vector<16x32xf32>
    %844 = arith.mulf %843, %687 : vector<16x32xf32>
    %845 = arith.addf %779, %844 : vector<16x32xf32>
    %c179 = arith.constant 179 : index
    %846 = memref.load %arg3[%c179] : memref<192xf32, #tpu.memory_space<smem>>
    %847 = vector.broadcast %846 : f32 to vector<16x32xf32>
    %848 = arith.mulf %847, %833 : vector<16x32xf32>
    %849 = arith.addf %845, %848 : vector<16x32xf32>
    %c39 = arith.constant 39 : index
    %850 = memref.load %arg3[%c39] : memref<192xf32, #tpu.memory_space<smem>>
    %851 = vector.broadcast %850 : f32 to vector<16x32xf32>
    %852 = arith.mulf %851, %830 : vector<16x32xf32>
    %853 = arith.addf %787, %852 : vector<16x32xf32>
    %c87 = arith.constant 87 : index
    %854 = memref.load %arg3[%c87] : memref<192xf32, #tpu.memory_space<smem>>
    %855 = vector.broadcast %854 : f32 to vector<16x32xf32>
    %856 = arith.mulf %855, %687 : vector<16x32xf32>
    %857 = arith.addf %853, %856 : vector<16x32xf32>
    %c135 = arith.constant 135 : index
    %858 = memref.load %arg3[%c135] : memref<192xf32, #tpu.memory_space<smem>>
    %859 = vector.broadcast %858 : f32 to vector<16x32xf32>
    %860 = arith.mulf %859, %687 : vector<16x32xf32>
    %861 = arith.addf %795, %860 : vector<16x32xf32>
    %c183 = arith.constant 183 : index
    %862 = memref.load %arg3[%c183] : memref<192xf32, #tpu.memory_space<smem>>
    %863 = vector.broadcast %862 : f32 to vector<16x32xf32>
    %864 = arith.mulf %863, %833 : vector<16x32xf32>
    %865 = arith.addf %861, %864 : vector<16x32xf32>
    %c43 = arith.constant 43 : index
    %866 = memref.load %arg3[%c43] : memref<192xf32, #tpu.memory_space<smem>>
    %867 = vector.broadcast %866 : f32 to vector<16x32xf32>
    %868 = arith.mulf %867, %830 : vector<16x32xf32>
    %869 = arith.addf %803, %868 : vector<16x32xf32>
    %c91 = arith.constant 91 : index
    %870 = memref.load %arg3[%c91] : memref<192xf32, #tpu.memory_space<smem>>
    %871 = vector.broadcast %870 : f32 to vector<16x32xf32>
    %872 = arith.mulf %871, %687 : vector<16x32xf32>
    %873 = arith.addf %869, %872 : vector<16x32xf32>
    %c139 = arith.constant 139 : index
    %874 = memref.load %arg3[%c139] : memref<192xf32, #tpu.memory_space<smem>>
    %875 = vector.broadcast %874 : f32 to vector<16x32xf32>
    %876 = arith.mulf %875, %687 : vector<16x32xf32>
    %877 = arith.addf %811, %876 : vector<16x32xf32>
    %c187 = arith.constant 187 : index
    %878 = memref.load %arg3[%c187] : memref<192xf32, #tpu.memory_space<smem>>
    %879 = vector.broadcast %878 : f32 to vector<16x32xf32>
    %880 = arith.mulf %879, %833 : vector<16x32xf32>
    %881 = arith.addf %877, %880 : vector<16x32xf32>
    %c47 = arith.constant 47 : index
    %882 = memref.load %arg3[%c47] : memref<192xf32, #tpu.memory_space<smem>>
    %883 = vector.broadcast %882 : f32 to vector<16x32xf32>
    %884 = arith.mulf %883, %830 : vector<16x32xf32>
    %885 = arith.addf %819, %884 : vector<16x32xf32>
    %c95 = arith.constant 95 : index
    %886 = memref.load %arg3[%c95] : memref<192xf32, #tpu.memory_space<smem>>
    %887 = vector.broadcast %886 : f32 to vector<16x32xf32>
    %888 = arith.mulf %887, %687 : vector<16x32xf32>
    %889 = arith.addf %885, %888 : vector<16x32xf32>
    %c143 = arith.constant 143 : index
    %890 = memref.load %arg3[%c143] : memref<192xf32, #tpu.memory_space<smem>>
    %891 = vector.broadcast %890 : f32 to vector<16x32xf32>
    %892 = arith.mulf %891, %687 : vector<16x32xf32>
    %893 = arith.addf %827, %892 : vector<16x32xf32>
    %c191 = arith.constant 191 : index
    %894 = memref.load %arg3[%c191] : memref<192xf32, #tpu.memory_space<smem>>
    %895 = vector.broadcast %894 : f32 to vector<16x32xf32>
    %896 = arith.mulf %895, %833 : vector<16x32xf32>
    %897 = arith.addf %893, %896 : vector<16x32xf32>
    %c0_76 = arith.constant 0 : index
    %c0_77 = arith.constant 0 : index
    %c0_78 = arith.constant 0 : index
    %c0_79 = arith.constant 0 : index
    %898 = vector.load %arg5[%c0_76, %c0_77, %c0_78, %c0_79] : memref<1x4x16x64xf32, #tpu.memory_space<vmem>>, vector<1x1x16x32xf32>
    %899 = vector.shape_cast %898 : vector<1x1x16x32xf32> to vector<16x32xf32>
    %900 = vector.shape_cast %841 : vector<16x32xf32> to vector<1x1x16x32xf32>
    tpu.vector_store %arg5[%c0_76, %c0_77, %c0_78, %c0_79], %900 {strides = array<i32>} : memref<1x4x16x64xf32, #tpu.memory_space<vmem>>, vector<1x1x16x32xf32>,
    %c0_80 = arith.constant 0 : index
    %c0_81 = arith.constant 0 : index
    %c0_82 = arith.constant 0 : index
    %c32_83 = arith.constant 32 : index
    %901 = vector.load %arg5[%c0_80, %c0_81, %c0_82, %c32_83] : memref<1x4x16x64xf32, #tpu.memory_space<vmem>>, vector<1x1x16x32xf32>
    %902 = vector.shape_cast %901 : vector<1x1x16x32xf32> to vector<16x32xf32>
    %903 = vector.shape_cast %849 : vector<16x32xf32> to vector<1x1x16x32xf32>
    tpu.vector_store %arg5[%c0_80, %c0_81, %c0_82, %c32_83], %903 {strides = array<i32>} : memref<1x4x16x64xf32, #tpu.memory_space<vmem>>, vector<1x1x16x32xf32>,
    %c0_84 = arith.constant 0 : index
    %c1_85 = arith.constant 1 : index
    %c0_86 = arith.constant 0 : index
    %c0_87 = arith.constant 0 : index
    %904 = vector.load %arg5[%c0_84, %c1_85, %c0_86, %c0_87] : memref<1x4x16x64xf32, #tpu.memory_space<vmem>>, vector<1x1x16x32xf32>
    %905 = vector.shape_cast %904 : vector<1x1x16x32xf32> to vector<16x32xf32>
    %906 = vector.shape_cast %857 : vector<16x32xf32> to vector<1x1x16x32xf32>
    tpu.vector_store %arg5[%c0_84, %c1_85, %c0_86, %c0_87], %906 {strides = array<i32>} : memref<1x4x16x64xf32, #tpu.memory_space<vmem>>, vector<1x1x16x32xf32>,
    %c0_88 = arith.constant 0 : index
    %c1_89 = arith.constant 1 : index
    %c0_90 = arith.constant 0 : index
    %c32_91 = arith.constant 32 : index
    %907 = vector.load %arg5[%c0_88, %c1_89, %c0_90, %c32_91] : memref<1x4x16x64xf32, #tpu.memory_space<vmem>>, vector<1x1x16x32xf32>
    %908 = vector.shape_cast %907 : vector<1x1x16x32xf32> to vector<16x32xf32>
    %909 = vector.shape_cast %865 : vector<16x32xf32> to vector<1x1x16x32xf32>
    tpu.vector_store %arg5[%c0_88, %c1_89, %c0_90, %c32_91], %909 {strides = array<i32>} : memref<1x4x16x64xf32, #tpu.memory_space<vmem>>, vector<1x1x16x32xf32>,
    %c0_92 = arith.constant 0 : index
    %c2_93 = arith.constant 2 : index
    %c0_94 = arith.constant 0 : index
    %c0_95 = arith.constant 0 : index
    %910 = vector.load %arg5[%c0_92, %c2_93, %c0_94, %c0_95] : memref<1x4x16x64xf32, #tpu.memory_space<vmem>>, vector<1x1x16x32xf32>
    %911 = vector.shape_cast %910 : vector<1x1x16x32xf32> to vector<16x32xf32>
    %912 = vector.shape_cast %873 : vector<16x32xf32> to vector<1x1x16x32xf32>
    tpu.vector_store %arg5[%c0_92, %c2_93, %c0_94, %c0_95], %912 {strides = array<i32>} : memref<1x4x16x64xf32, #tpu.memory_space<vmem>>, vector<1x1x16x32xf32>,
    %c0_96 = arith.constant 0 : index
    %c2_97 = arith.constant 2 : index
    %c0_98 = arith.constant 0 : index
    %c32_99 = arith.constant 32 : index
    %913 = vector.load %arg5[%c0_96, %c2_97, %c0_98, %c32_99] : memref<1x4x16x64xf32, #tpu.memory_space<vmem>>, vector<1x1x16x32xf32>
    %914 = vector.shape_cast %913 : vector<1x1x16x32xf32> to vector<16x32xf32>
    %915 = vector.shape_cast %881 : vector<16x32xf32> to vector<1x1x16x32xf32>
    tpu.vector_store %arg5[%c0_96, %c2_97, %c0_98, %c32_99], %915 {strides = array<i32>} : memref<1x4x16x64xf32, #tpu.memory_space<vmem>>, vector<1x1x16x32xf32>,
    %c0_100 = arith.constant 0 : index
    %c3_101 = arith.constant 3 : index
    %c0_102 = arith.constant 0 : index
    %c0_103 = arith.constant 0 : index
    %916 = vector.load %arg5[%c0_100, %c3_101, %c0_102, %c0_103] : memref<1x4x16x64xf32, #tpu.memory_space<vmem>>, vector<1x1x16x32xf32>
    %917 = vector.shape_cast %916 : vector<1x1x16x32xf32> to vector<16x32xf32>
    %918 = vector.shape_cast %889 : vector<16x32xf32> to vector<1x1x16x32xf32>
    tpu.vector_store %arg5[%c0_100, %c3_101, %c0_102, %c0_103], %918 {strides = array<i32>} : memref<1x4x16x64xf32, #tpu.memory_space<vmem>>, vector<1x1x16x32xf32>,
    %c0_104 = arith.constant 0 : index
    %c3_105 = arith.constant 3 : index
    %c0_106 = arith.constant 0 : index
    %c32_107 = arith.constant 32 : index
    %919 = vector.load %arg5[%c0_104, %c3_105, %c0_106, %c32_107] : memref<1x4x16x64xf32, #tpu.memory_space<vmem>>, vector<1x1x16x32xf32>
    %920 = vector.shape_cast %919 : vector<1x1x16x32xf32> to vector<16x32xf32>
    %921 = vector.shape_cast %897 : vector<16x32xf32> to vector<1x1x16x32xf32>
    tpu.vector_store %arg5[%c0_104, %c3_105, %c0_106, %c32_107], %921 {strides = array<i32>} : memref<1x4x16x64xf32, #tpu.memory_space<vmem>>, vector<1x1x16x32xf32>,
    return
  }
  func.func @transform_0(%arg0: i32) -> (i32, i32, i32) {
    %c0_i32 = arith.constant 0 : i32
    %c0_i32_0 = arith.constant 0 : i32
    %c0_i32_1 = arith.constant 0 : i32
    return %arg0, %c0_i32, %c0_i32_0 : i32, i32, i32
  }
  func.func @transform_1(%arg0: i32) -> (i32, i32) {
    %c0_i32 = arith.constant 0 : i32
    %c0_i32_0 = arith.constant 0 : i32
    %c0_i32_1 = arith.constant 0 : i32
    return %c0_i32, %c0_i32_0 : i32, i32
  }
  func.func @transform_2(%arg0: i32) -> i32 {
    %c0_i32 = arith.constant 0 : i32
    %c0_i32_0 = arith.constant 0 : i32
    return %c0_i32 : i32
  }
  func.func @transform_3(%arg0: i32) -> i32 {
    %c0_i32 = arith.constant 0 : i32
    %c0_i32_0 = arith.constant 0 : i32
    return %c0_i32 : i32
  }
  func.func @transform_4(%arg0: i32) -> (i32, i32, i32, i32) {
    %c0_i32 = arith.constant 0 : i32
    %c0_i32_0 = arith.constant 0 : i32
    %c0_i32_1 = arith.constant 0 : i32
    %c0_i32_2 = arith.constant 0 : i32
    return %arg0, %c0_i32, %c0_i32_0, %c0_i32_1 : i32, i32, i32, i32
  }
}

</mosaic_0001>

<bundles_post_ra>
// kernel: tpu_custom_call.1
= control target key start
LH: loop header
LB: loop body
LE: loop exit
PB: predicated region body
PF: predicated region fallthrough
CT: control target
= control target key end

     0   :  { %s5333_s0 = inlined_call_operand.vmem [shape: f32[2,64,16], index: 0, kind: input, shape index: {}]   ;;  %s5334_s1 = inlined_call_operand.vmem [shape: f32[16,32], index: 1, kind: input, shape index: {}]   ;;  %s5335_s2 = inlined_call_operand.vmem [shape: f32[192], index: 2, kind: input, shape index: {}]   ;;  %s5336_s3 = inlined_call_operand.vmem [shape: f32[4], index: 3, kind: input, shape index: {}]   ;;  %s5337_s4 = inlined_call_operand.hbm [shape: f32[2,4,16,64], index: 4, kind: output, shape index: {}]  }
   0x1   :  { %5428 = sst [smem:[#allocation195_spill]] %s5333_s0 }
   0x2   :  { %5429 = sst [smem:[#allocation196_spill]] %s5334_s1 }
   0x3   :  { %5430 = sst [smem:[#allocation197_spill]] %s5335_s2 }
   0x4   :  { %5431 = sst [smem:[#allocation198_spill]] %s5336_s3 }
   0x5   :  { %5432 = sst [smem:[#allocation199_spill]] %s5337_s4 }
   0x6   :  { %9 = vsyncpa [#allocation4], 0 }
   0x7   :  { %10 = vsyncpa [#allocation6], 0 }
   0x8   :  { %11 = vsyncpa [#allocation3], 0 }
   0x9   :  { %13 = vsyncpa [#allocation3 + $0x1], 0  ;;  %s2652_s15 = smov 0   ;;  %s2654_s16 = smov 0  }
   0xa   :  { %s2656_s17 = smov 0   ;;  %s2658_s18 = smov 0  }
   0xb LB: > { %5433 = sst [smem:[#allocation11_spill]] %s2606_s15  ;;  %s2673_s19 = sadd.s32 4294967295, %s2618_s18   ;;  %s2618_s18 = sphi %s2658_s18, %s6069_s18   ;;  %s2614_s17 = sphi %s2656_s17, %s6072_s17   ;;  %s2610_s16 = sphi %s2654_s16, %s6071_s16   ;;  %s2606_s15 = sphi %s2652_s15, %s6070_s15  }
   0xc   : > { %5434 = sst [smem:[#allocation12_spill]] %s2610_s16  ;;  %s2225_s20 = sadd.s32 4294967294, %s2618_s18  }
   0xd   : > { %5435 = sst [smem:[#allocation13_spill]] %s2614_s17  ;;  %s2677_s21 = sadd.s32 1, %s2618_s18  }
   0xe   : > { %5436 = sst [smem:[#allocation14_spill]] %s2618_s18  ;;  %s115_s22 = sadd.s32 1, %s2614_s17 }
   0xf   : > { %5437 = sst [smem:[#allocation15_spill]] %s2673_s19  ;;  %s112_s23 = ssub.s32 %s2618_s18, %s2677_s21 }
  0x10   : > { %5438 = sst [smem:[#allocation16_spill]] %s2677_s21  ;;  %p125_p0 = scmp.ne.s32.totalorder %s2614_s17, %s2610_s16 }
  0x11   : > { %p113_p1 = scmp.eq.s32.totalorder %s112_s23, 0  ;;  %p126_p2 = scmp.eq.s32.totalorder %s2673_s19, 1 }
  0x12   : > { %p131_p3 = scmp.ne.s32.totalorder %s2610_s16, %s2606_s15  ;;  %p132_p4 = scmp.eq.s32.totalorder %s2225_s20, 1 }
  0x13   : > { %s2688_s24 = scalar_select %p113_p1, %s2614_s17, %s115_s22  }
  0x14   : > { %p2690_p5 = por %p126_p2, %p125_p0  ;;  %p2694_p6 = por %p132_p4, %p131_p3 }
  0x15   : > { %5439 = sst [smem:[#allocation17_spill]] %s2688_s24  ;;  %p2226_p7 = scmp.ge.s32.totalorder %s2618_s18, 1 }
  0x16   : > { %s5440_s25 = scalar_select %p2690_p5, 1, 0 }
  0x17   : > { %s5442_s26 = scalar_select %p2694_p6, 1, 0 }
  0x18   : > { %5441 = sst [smem:[#allocation18_spill]] %s5440_s25  ;;  %p139_p8 = scmp.lt.s32.totalorder %s2618_s18, 3 }
  0x19   : > { %5443 = sst [smem:[#allocation19_spill]] %s5442_s26  ;;  %p2474_p9 = scmp.eq.s32.totalorder %s2673_s19, 0 }
  0x1a   : > { %p140_p10 = pnand %p2226_p7, %p139_p8  ;;  %s5444_s2 = sld [smem:[#allocation197_spill]] }
  0x1b   : > { %s5445_s3 = sld [smem:[#allocation198_spill]]  ;;  %s2620_s7 = smov [#allocation2]  }
  0x1c   : > { %p2463_p11 = pneg %p140_p10  ;;  %s2621_s8 = smov [#allocation5]  }
  0x1e   : > { %p2464_p12 = pnand %p2474_p9, %p2463_p11 }
  0x1f   : > { %185 = sbr.rel (%p140_p10) target bundleno = 919 (0x397), region = 36 }
  0x20   : > { %s154_s29 = sshll.u32 %s5444_s2, 4  ;;  %s155_s29 = int_to_ptr.vmem [resolvable:$true] %s154_s29 }
  0x21   : > { %s164_s6 = sshll.u32 %s5445_s3, 4  ;;  %s165_s6 = int_to_ptr.vmem [resolvable:$true] %s164_s6 }
  0x22   : > { %2466 = dma.vmem_to_smem (!%p2464_p12), %s155_s29, 32, %s2620_s7, [#allocation4]  }
  0x23   : > { %2469 = dma.vmem_to_smem (!%p2464_p12), %s165_s6, 16, %s2621_s8, [#allocation6]  }
  0x24   : > { %2593 = dma.done.wait (%p2474_p9), [#allocation4], 32  }
  0x25   : > { %2595 = vsyncadd (%p2474_p9), [#allocation4], 4294967264 }
  0x26   : > { %2597 = dma.done.wait (%p2474_p9), [#allocation6], 16  }
  0x27   : > { %2599 = vsyncadd (%p2474_p9), [#allocation6], 4294967280 }
  0x28   : > { %197 = sfence }
  0x29   : > { %s5446_s1 = sld [smem:[#allocation196_spill]]  ;;  %p218_p13 = scmp.lt.s32.totalorder %s2673_s19, 1  ;;  %vm244_vm0 = vcmask 130048   ;;  %vm653_vm1 = vcmask 1047808   ;;  %vm2072_vm8 = vcmask 261120   ;;  %vm2083_vm9 = vcmask 523520  }
  0x2a   : > { %s5447_s0 = sld [smem:[#allocation195_spill]]  ;;  %s5338_s27 = smov 32  }
  0x2b   : > { %s219_s13 = scalar_select %p218_p13, %s2673_s19, 1 }
  0x2c   : > { %s5346_s28 = smov 97   ;;  %s5340_s29 = smov 127  }
  0x2d   : > { %s2447_s14 = sshll.u32 %s219_s13, 6  ;;  %s2871_s30 = sld [smem:[#allocation2 + $0x40]] }
  0x2e   : > { %s2873_s5 = sld [smem:[#allocation2 + $0x10]]  ;;  %s5451_s15 = smov 97  }
  0x2f   : > { %v224_v0 = vld [vmem:[%s5446_s1 + $0x8] sm:$0xff]  ;;  %v223_v1 = vld [vmem:[%s5446_s1] sm:$0xff]  ;;  %s2875_s6 = sld [smem:[#allocation2 + $0x14]] }
  0x30   : > { %v283_v2 = vand.u32 4294901760, %v224_v0  ;;  %v285_v3 = vand.u32 4294901760, %v223_v1  ;;  %s2728_s23 = scalar_lea.vmem %s5447_s0, %s2447_s14  ;;  %s2877_s7 = sld [smem:[#allocation2 + $0x18]] }
  0x31   : > { %v240_v8 = vld [vmem:[%s2728_s23 + $0x20] sm:$0xff]  ;;  %v241_v9 = vld [vmem:[%s2728_s23 + $0x28] sm:$0xff]  ;;  %v242_v19 = vld [vmem:[%s2728_s23 + $0x30] sm:$0xff]  ;;  %s2879_s8 = sld [smem:[#allocation2 + $0x1c]] }
  0x32   : > { %2449 = vmatpush.msra.mxu2 %v283_v2  ;;  %v367_v4 = vsub.f32 %v224_v0, %v283_v2  ;;  %v373_v5 = vsub.f32 %v223_v1, %v285_v3  ;;  %284 = vmatpush.msra.mxu0 %v283_v2  ;;  %v236_v10 = vld [vmem:[%s2728_s23] sm:$0xff]  ;;  %v258_v13 = vsel %vm244_vm0, %v240_v8, 0  ;;  %v261_v14 = vsel %vm244_vm0, %v241_v9, 0  ;;  %v237_v15 = vld [vmem:[%s2728_s23 + $0x8] sm:$0xff]  ;;  %v238_v23 = vld [vmem:[%s2728_s23 + $0x10] sm:$0xff]  ;;  %s2881_s9 = sld [smem:[#allocation2 + $0x70]] }
  0x33   : > { %v2736_v16 = vand.u32 4294901760, %v258_v13  ;;  %v2738_v17 = vand.u32 4294901760, %v261_v14  ;;  %v246_v18 = vsel %vm244_vm0, %v236_v10, 0  ;;  %v249_v26 = vsel %vm244_vm0, %v237_v15, 0  ;;  %v243_v41 = vld [vmem:[%s2728_s23 + $0x38] sm:$0xff]  ;;  %s2883_s10 = sld [smem:[#allocation2 + $0x44]] }
  0x34   : > { %v368_v6 = vand.u32 4294901760, %v367_v4  ;;  %2450 = vmatpush.msra.mxu2 %v285_v3  ;;  %v374_v7 = vand.u32 4294901760, %v373_v5  ;;  %286 = vmatpush.msra.mxu0 %v285_v3  ;;  %v2742_v22 = vand.u32 4294901760, %v246_v18  ;;  %v264_v28 = vsel %vm244_vm0, %v242_v19, 0  ;;  %v239_v43 = vld [vmem:[%s2728_s23 + $0x18] sm:$0xff]  ;;  %s2885_s11 = sld [smem:[#allocation2 + $0x74]] }
  0x35   : > { %v2746_v24 = vsub.f32 %v258_v13, %v2736_v16  ;;  %v2749_v25 = vsub.f32 %v261_v14, %v2738_v17  ;;  %v2756_v29 = vand.u32 4294901760, %v249_v26  ;;  %v252_v31 = vsel %vm244_vm0, %v238_v23, 0  ;;  %s2887_s12 = sld [smem:[#allocation2 + $0x48]] }
  0x36   : > { %427 = vmatpush.msrb.mxu2 %v367_v4  ;;  %v369_v11 = vsub.f32 %v367_v4, %v368_v6  ;;  %v375_v12 = vsub.f32 %v373_v5, %v374_v7  ;;  %556 = vmatpush.msrb.mxu0 %v368_v6  ;;  %v2753_v27 = vsub.f32 %v246_v18, %v2742_v22  ;;  %v2768_v36 = vand.u32 4294901760, %v264_v28  ;;  %s2889_s13 = sld [smem:[#allocation2 + $0x78]] }
  0x37   : > { %v321_v30 = vand.u32 4294901760, %v2746_v24  ;;  %v296_v33 = vsub.f32 %v249_v26, %v2756_v29  ;;  %v329_v35 = vand.u32 4294901760, %v2749_v25  ;;  %v303_v39 = vand.u32 4294901760, %v252_v31  ;;  %s2891_s14 = sld [smem:[#allocation2 + $0x4c]] }
  0x38   : > { %430 = vmatpush.msrb.mxu2 %v373_v5  ;;  %v370_v20 = vand.u32 4294901760, %v369_v11  ;;  %v376_v21 = vand.u32 4294901760, %v375_v12  ;;  %560 = vmatpush.msrb.mxu0 %v374_v7  ;;  %v289_v32 = vand.u32 4294901760, %v2753_v27  ;;  %v336_v45 = vsub.f32 %v264_v28, %v2768_v36  ;;  %s2893_s20 = sld [smem:[#allocation2 + $0x7c]] }
  0x39   : > { %v322_v34 = vsub.f32 %v2746_v24, %v321_v30  ;;  %v297_v38 = vand.u32 4294901760, %v296_v33  ;;  %v330_v44 = vsub.f32 %v2749_v25, %v329_v35  ;;  %v267_v47 = vsel %vm244_vm0, %v243_v41, 0  ;;  %s2895_s22 = sld [smem:[#allocation2 + $0xa0]] }
  0x3a   : > { %2451 = vmatpush.msra.mxu3 %v370_v20  ;;  %371 = vmatpush.msra.mxu1 %v370_v20  ;;  %v290_v37 = vsub.f32 %v2753_v27, %v289_v32  ;;  %v304_v48 = vsub.f32 %v252_v31, %v303_v39  ;;  %v255_v49 = vsel %vm244_vm0, %v239_v43, 0  ;;  %v337_v51 = vand.u32 4294901760, %v336_v45  ;;  %s2897_s23 = sld [smem:[#allocation2 + $0xa4]] }
  0x3b   : > { %v323_v40 = vand.u32 4294901760, %v322_v34  ;;  %v298_v46 = vsub.f32 %v296_v33, %v297_v38  ;;  %v331_v50 = vand.u32 4294901760, %v330_v44  ;;  %v343_v52 = vand.u32 4294901760, %v267_v47  ;;  %s2906_s0 = sld [smem:[#allocation2 + $0x11]] }
  0x3c   : > { %2452 = vmatpush.msra.mxu3 %v376_v21  ;;  %377 = vmatpush.msra.mxu1 %v376_v21  ;;  %v291_v42 = vand.u32 4294901760, %v290_v37  ;;  %v305_v54 = vand.u32 4294901760, %v304_v48  ;;  %v311_v55 = vand.u32 4294901760, %v255_v49  ;;  %v338_v56 = vsub.f32 %v336_v45, %v337_v51  ;;  %s2908_s1 = sld [smem:[#allocation2 + $0x15]] }
  0x3d   : > { %395 = vmatmul.f32.vlgmr.msra.gmra.mxu3 %v2736_v16  ;;  %379 = vmatmul.f32.vlgmr.msra.gmra.mxu1 %v2742_v22  ;;  %v299_v53 = vand.u32 4294901760, %v298_v46  ;;  %v344_v57 = vsub.f32 %v267_v47, %v343_v52  ;;  %s2910_s2 = sld [smem:[#allocation2 + $0x19]] }
  0x3e   : > { %487 = vmatpush.msrb.mxu3 %v283_v2  ;;  %609 = vmatpush.msrb.mxu1 %v283_v2  ;;  %v306_v58 = vsub.f32 %v304_v48, %v305_v54  ;;  %v312_v59 = vsub.f32 %v255_v49, %v311_v55  ;;  %v339_v60 = vand.u32 4294901760, %v338_v56  ;;  %s2912_s3 = sld [smem:[#allocation2 + $0x1d]] }
  0x3f   : > { %324 = vmatmul.f32.vlgmr.msra.gmra.mxu2 %v323_v40  ;;  %292 = vmatmul.f32.vlgmr.msra.gmra.mxu0 %v291_v42  ;;  %v345_v61 = vand.u32 4294901760, %v344_v57  ;;  %s2914_s24 = sld [smem:[#allocation2 + $0x41]] }
  0x40   : > { %489 = vmatpush.msrb.mxu3 %v285_v3  ;;  %611 = vmatpush.msrb.mxu1 %v285_v3  ;;  %v307_v62 = vand.u32 4294901760, %v306_v58  ;;  %v313_v63 = vand.u32 4294901760, %v312_v59  ;;  %s2916_s17 = sld [smem:[#allocation2 + $0x71]] }
  0x41   : > { %v346_v0 = vsub.f32 %v344_v57, %v345_v61  ;;  %s2918_s21 = sld [smem:[#allocation2 + $0x45]] }
  0x42   : > { %v314_v1 = vsub.f32 %v312_v59, %v313_v63  ;;  %s2922_s26 = sld [smem:[#allocation2 + $0x75]] }
  0x43   : > { %v347_v2 = vand.u32 4294901760, %v346_v0  ;;  %s2926_s18 = sld [smem:[#allocation2 + $0x49]] }
  0x44   : > { %v315_v3 = vand.u32 4294901760, %v314_v1  ;;  %5448 = sst [smem:[#allocation20_spill]] %s2912_s3 }
  0x45   : > { %399 = vmatmul.f32.gmra.mxu3 %v2738_v17  ;;  %383 = vmatmul.f32.gmra.mxu1 %v2756_v29  ;;  %s2928_s4 = sld [smem:[#allocation2 + $0x79]] }
  0x46   : > { %s2930_s25 = sld [smem:[#allocation2 + $0x4d]] }
  0x47   : > { %332 = vmatmul.f32.gmra.mxu2 %v331_v50  ;;  %300 = vmatmul.f32.gmra.mxu0 %v299_v53  ;;  %s2932_s19 = sld [smem:[#allocation2 + $0xa1]] }
  0x48   : > { %5449 = sst [smem:[#allocation21_spill]] %s2922_s26 }
  0x49   : > { %s2934_s16 = sld [smem:[#allocation2 + $0xa5]] }
  0x4a   : > { %s2936_s3 = sld [smem:[#allocation2 + $0xa9]] }
  0x4b   : > { %5452 = sst [smem:[#allocation22_spill]] %s2928_s4 }
  0x4c   : > { %5453 = sst [smem:[#allocation23_spill]] %s2930_s25 }
  0x4d   : > { %403 = vmatmul.f32.gmra.mxu3 %v2768_v36  ;;  %387 = vmatmul.f32.gmra.mxu1 %v303_v39  ;;  %5454 = sst [smem:[#allocation24_spill]] %s2932_s19 }
  0x4e   : > { %s2938_s26 = sld [smem:[#allocation2 + $0x7d]] }
  0x4f   : > { %340 = vmatmul.f32.gmra.mxu2 %v339_v60  ;;  %308 = vmatmul.f32.gmra.mxu0 %v307_v62  ;;  %5455 = sst [smem:[#allocation25_spill]] %s2934_s16 }
  0x50   : > { %5456 = sst [smem:[#allocation26_spill]] %s2936_s3 }
  0x51   : > { %s2946_s4 = sld [smem:[#allocation2 + $0xad]] }
  0x52   : > { %s2951_s3 = sld [smem:[#allocation2 + $0x12]] }
  0x53   : > { %s2954_s16 = sld [smem:[#allocation2 + $0x16]] }
  0x54   : > { %5457 = sst [smem:[#allocation27_spill]] %s2938_s26 }
  0x55   : > { %407 = vmatmul.f32.gmra.mxu3 %v343_v52  ;;  %391 = vmatmul.f32.gmra.mxu1 %v311_v55  ;;  %s2959_s19 = sld [smem:[#allocation2 + $0x1a]] }
  0x56   : > { %s2961_s26 = sld [smem:[#allocation2 + $0x1e]] }
  0x57   : > { %348 = vmatmul.f32.gmra.mxu2 %v347_v2  ;;  %316 = vmatmul.f32.gmra.mxu0 %v315_v3  ;;  %5458 = sst [smem:[#allocation28_spill]] %s2946_s4 }
  0x58   : > { %5459 = sst [smem:[#allocation29_spill]] %s2951_s3 }
  0x59   : > { %s2963_s25 = sld [smem:[#allocation2 + $0x7a]] }
  0x5a   : > { %s2965_s4 = sld [smem:[#allocation2 + $0xaa]] }
  0x5b   : > { %5461 = sst [smem:[#allocation31_spill]] %s2959_s19 }
  0x5c   : > { %s2970_s3 = sld [smem:[#allocation2 + $0x76]] }
  0x5d   : > { %493 = vmatmul.f32.vlgmr.msrb.gmra.mxu3 %v289_v32  ;;  %613 = vmatmul.f32.vlgmr.msrb.gmra.mxu1 %v2742_v22  ;;  %s2974_s19 = sld [smem:[#allocation2 + $0x72]] }
  0x5f   : > { %433 = vmatmul.f32.vlgmr.msrb.gmra.mxu2 %v2753_v27  ;;  %562 = vmatmul.f32.vlgmr.msrb.gmra.mxu0 %v2742_v22 }
  0x60   : > { %5462 = sst [smem:[#allocation32_spill]] %s2965_s4 }
  0x61   : > { %s2978_s4 = sld [smem:[#allocation2 + $0xa6]] }
  0x62   : > { %5464 = sst [smem:[#allocation34_spill]] %s2970_s3 }
  0x63   : > { %5465 = sst [smem:[#allocation35_spill]] %s2974_s19 }
  0x64   : > { %s2984_s19 = sld [smem:[#allocation2 + $0x7b]] }
  0x65   : > { %499 = vmatmul.f32.gmra.mxu3 %v297_v38  ;;  %617 = vmatmul.f32.gmra.mxu1 %v2756_v29  ;;  %s2996_s3 = sld [smem:[#allocation2 + $0x77]] }
  0x67   : > { %438 = vmatmul.f32.gmra.mxu2 %v296_v33  ;;  %566 = vmatmul.f32.gmra.mxu0 %v2756_v29  ;;  %5466 = sst [smem:[#allocation36_spill]] %s2978_s4 }
  0x68   : > { %s2990_s4 = sld [smem:[#allocation2 + $0xa2]] }
  0x6a   : > { %5467 = sst [smem:[#allocation37_spill]] %s2984_s19 }
  0x6b   : > { %s3002_s19 = sld [smem:[#allocation2 + $0x7e]] }
  0x6d   : > { %505 = vmatmul.f32.gmra.mxu3 %v305_v54  ;;  %621 = vmatmul.f32.gmra.mxu1 %v303_v39 }
  0x6f   : > { %443 = vmatmul.f32.gmra.mxu2 %v304_v48  ;;  %570 = vmatmul.f32.gmra.mxu0 %v303_v39 }
  0x75   : > { %511 = vmatmul.f32.gmra.mxu3 %v313_v63  ;;  %625 = vmatmul.f32.gmra.mxu1 %v311_v55 }
  0x77   : > { %448 = vmatmul.f32.gmra.mxu2 %v312_v59  ;;  %574 = vmatmul.f32.gmra.mxu0 %v311_v55 }
  0x7d   : > { %517 = vmatmul.f32.gmra.mxu3 %v321_v30  ;;  %629 = vmatmul.f32.gmra.mxu1 %v2736_v16 }
  0x7f   : > { %453 = vmatmul.f32.gmra.mxu2 %v2746_v24  ;;  %578 = vmatmul.f32.gmra.mxu0 %v2736_v16 }
  0x85   : > { %523 = vmatmul.f32.gmra.mxu3 %v329_v35  ;;  %633 = vmatmul.f32.gmra.mxu1 %v2738_v17 }
  0x87   : > { %458 = vmatmul.f32.gmra.mxu2 %v2749_v25  ;;  %582 = vmatmul.f32.gmra.mxu0 %v2738_v17 }
  0x8d   : > { %529 = vmatmul.f32.gmra.mxu3 %v337_v51  ;;  %637 = vmatmul.f32.gmra.mxu1 %v2768_v36 }
  0x8f   : > { %463 = vmatmul.f32.gmra.mxu2 %v336_v45  ;;  %586 = vmatmul.f32.gmra.mxu0 %v2768_v36 }
  0x95   : > { %535 = vmatmul.f32.gmra.mxu3 %v345_v61  ;;  %641 = vmatmul.f32.gmra.mxu1 %v343_v52 }
  0x97   : > { %468 = vmatmul.f32.gmra.mxu2 %v344_v57  ;;  %590 = vmatmul.f32.gmra.mxu0 %v343_v52 }
  0xba   : > { %v380_v4 = vpop.f32.mrf.mxu1 }
  0xbc   : > { %v293_v5 = vpop.f32.mrf.mxu0 }
  0xbd   : > { %v381_v23 = vadd.f32 %v380_v4, %v293_v5 }
  0xc0   : > { %v396_v6 = vpop.f32.mrf.mxu3 }
  0xc2   : > { %v384_v7 = vpop.f32.mrf.mxu1  ;;  %v325_v8 = vpop.f32.mrf.mxu2 }
  0xc3   : > { %v397_v58 = vadd.f32 %v396_v6, %v325_v8 }
  0xc4   : > { %v301_v9 = vpop.f32.mrf.mxu0 }
  0xc5   : > { %v385_v31 = vadd.f32 %v384_v7, %v301_v9 }
  0xc8   : > { %v400_v10 = vpop.f32.mrf.mxu3 }
  0xca   : > { %v388_v11 = vpop.f32.mrf.mxu1  ;;  %v333_v12 = vpop.f32.mrf.mxu2 }
  0xcb   : > { %v401_v2 = vadd.f32 %v400_v10, %v333_v12 }
  0xcc   : > { %v309_v13 = vpop.f32.mrf.mxu0 }
  0xcd   : > { %v389_v40 = vadd.f32 %v388_v11, %v309_v13 }
  0xd0   : > { %v2799_v14 = vpop.f32.mrf.mxu3 }
  0xd2   : > { %v392_v15 = vpop.f32.mrf.mxu1  ;;  %v2801_v16 = vpop.f32.mrf.mxu2 }
  0xd3   : > { %v405_v11 = vadd.f32 %v2799_v14, %v2801_v16 }
  0xd4   : > { %v317_v17 = vpop.f32.mrf.mxu0 }
  0xd5   : > { %v393_v49 = vadd.f32 %v392_v15, %v317_v17 }
  0xd8   : > { %v2803_v18 = vpop.f32.mrf.mxu3 }
  0xda   : > { %v614_v19 = vpop.f32.mrf.mxu1  ;;  %v2805_v20 = vpop.f32.mrf.mxu2 }
  0xdc   : > { %v563_v21 = vpop.f32.mrf.mxu0 }
  0xe0   : > { %v494_v22 = vpop.f32.mrf.mxu3 }
  0xe2   : > { %v434_v24 = vpop.f32.mrf.mxu2  ;;  %v618_v25 = vpop.f32.mrf.mxu1 }
  0xe3   : > { %v435_v26 = vadd.f32 %v434_v24, %v381_v23 }
  0xe4   : > { %v567_v28 = vpop.f32.mrf.mxu0 }
  0xe5   : > { %v495_v27 = vadd.f32 %v494_v22, %v435_v26  ;;  %v409_v22 = vadd.f32 %v2803_v18, %v2805_v20 }
  0xe7   : > { %v564_v30 = vadd.f32 %v563_v21, %v495_v27 }
  0xe8   : > { %v500_v29 = vpop.f32.mrf.mxu3 }
  0xe9   : > { %v2807_v32 = vadd.f32 %v614_v19, %v564_v30 }
  0xea   : > { %v439_v33 = vpop.f32.mrf.mxu2  ;;  %v622_v35 = vpop.f32.mrf.mxu1 }
  0xeb   : > { %v440_v34 = vadd.f32 %v439_v33, %v385_v31  ;;  %654 = vrot.lane.b32.xlu0 %v2807_v32, %s5338_s27 }
  0xec   : > { %v571_v37 = vpop.f32.mrf.mxu0 }
  0xed   : > { %v501_v36 = vadd.f32 %v500_v29, %v440_v34 }
  0xef   : > { %v568_v39 = vadd.f32 %v567_v28, %v501_v36 }
  0xf0   : > { %v506_v38 = vpop.f32.mrf.mxu3 }
  0xf1   : > { %v2811_v41 = vadd.f32 %v618_v25, %v568_v39 }
  0xf2   : > { %v444_v42 = vpop.f32.mrf.mxu2  ;;  %v626_v47 = vpop.f32.mrf.mxu1 }
  0xf3   : > { %v445_v43 = vadd.f32 %v444_v42, %v389_v40  ;;  %657 = vrot.lane.b32.xlu0 %v2811_v41, %s5338_s27 }
  0xf4   : > { %v575_v45 = vpop.f32.mrf.mxu0 }
  0xf5   : > { %v507_v44 = vadd.f32 %v506_v38, %v445_v43 }
  0xf7   : > { %v572_v48 = vadd.f32 %v571_v37, %v507_v44 }
  0xf8   : > { %v512_v46 = vpop.f32.mrf.mxu3 }
  0xf9   : > { %v2815_v50 = vadd.f32 %v622_v35, %v572_v48 }
  0xfa   : > { %v449_v51 = vpop.f32.mrf.mxu2  ;;  %v630_v57 = vpop.f32.mrf.mxu1 }
  0xfb   : > { %v450_v52 = vadd.f32 %v449_v51, %v393_v49  ;;  %1010 = vrot.lane.b32.xlu1 %v2815_v50, %s5338_s27 }
  0xfc   : > { %v579_v55 = vpop.f32.mrf.mxu0 }
  0xfd   : > { %v513_v53 = vadd.f32 %v512_v46, %v450_v52 }
  0xff   : > { %v576_v56 = vadd.f32 %v575_v45, %v513_v53 }
 0x100   : > { %v518_v54 = vpop.f32.mrf.mxu3 }
 0x101   : > { %v2819_v59 = vadd.f32 %v626_v47, %v576_v56 }
 0x102   : > { %v454_v60 = vpop.f32.mrf.mxu2  ;;  %v634_v5 = vpop.f32.mrf.mxu1 }
 0x103   : > { %v455_v61 = vadd.f32 %v454_v60, %v397_v58  ;;  %1013 = vrot.lane.b32.xlu1 %v2819_v59, %s5338_s27 }
 0x104   : > { %v583_v1 = vpop.f32.mrf.mxu0 }
 0x105   : > { %v519_v62 = vadd.f32 %v518_v54, %v455_v61 }
 0x107   : > { %v580_v0 = vadd.f32 %v579_v55, %v519_v62  ;;  %v5359_v55 = vlaneseq }
 0x108   : > { %v524_v63 = vpop.f32.mrf.mxu3 }
 0x109   : > { %v2823_v3 = vadd.f32 %v630_v57, %v580_v0  ;;  %v2957_v58 = vshrl.u32 %v5359_v55, 7  ;;  %v831_v0 = vstv %s2875_s6  ;;  %s3032_s6 = sld [smem:[#allocation2 + $0xa7]] }
 0x10a   : > { %v459_v4 = vpop.f32.mrf.mxu2  ;;  %v638_v10 = vpop.f32.mrf.mxu1 }
 0x10b   : > { %v460_v7 = vadd.f32 %v459_v4, %v401_v2  ;;  %1364 = vrot.lane.b32.xlu2 %v2823_v3, %s5338_s27  ;;  %5460 = vst [vmem:[#allocation30_spill] sm:$0xff] %v2957_v58  ;;  %v2968_v61 = vadd.s32 8, %v2957_v58  ;;  %vm232_vm2 = vcmp.ge.s32.totalorder %v2957_v58, 1  ;;  %vm686_vm3 = vcmp.lt.s32.totalorder %v2957_v58, 1 }
 0x10c   : > { %v587_v17 = vpop.f32.mrf.mxu0  ;;  %vm693_vm4 = vcmp.lt.s32.totalorder %v2957_v58, 7  ;;  %v795_v2 = vrot.slane %v2811_v41, 7  ;;  %v855_v4 = vstv %s2877_s7  ;;  %s3046_s7 = sld [smem:[#allocation2 + $0xae]] }
 0x10d   : > { %v525_v6 = vadd.f32 %v524_v63, %v460_v7  ;;  %5463 = vst [vmem:[#allocation33_spill] sm:$0xff] %v2968_v61  ;;  %vm235_vm5 = vcmp.le.s32.totalorder %v2968_v61, 14  ;;  %v807_v63 = vstv %s2873_s5  ;;  %v837_v7 = vstv %s2883_s10  ;;  %s3020_s5 = sld [smem:[#allocation2 + $0x73]] }
 0x10e   : > { %s3100_s10 = sld [smem:[#allocation2 + $0x4a]] }
 0x10f   : > { %v584_v8 = vadd.f32 %v583_v1, %v525_v6  ;;  %v813_v1 = vstv %s2871_s30  ;;  %s3008_s30 = sld [smem:[#allocation2 + $0xab]] }
 0x110   : > { %v530_v9 = vpop.f32.mrf.mxu3 }
 0x111   : > { %v2829_v13 = vadd.f32 %v634_v5, %v584_v8  ;;  %v819_v5 = vstv %s2881_s9  ;;  %v879_v8 = vstv %s2879_s8  ;;  %s3056_s8 = sld [smem:[#allocation2 + $0xa3]] }
 0x112   : > { %v464_v15 = vpop.f32.mrf.mxu2  ;;  %v642_v27 = vpop.f32.mrf.mxu1  ;;  %s3067_s9 = sld [smem:[#allocation2 + $0x42]] }
 0x113   : > { %v465_v19 = vadd.f32 %v464_v15, %v405_v11  ;;  %1367 = vrot.lane.b32.xlu2 %v2829_v13, %s5338_s27  ;;  %v861_v11 = vstv %s2887_s12  ;;  %v867_v15 = vstv %s2889_s13  ;;  %s3120_s12 = sld [smem:[#allocation2 + $0x43]] }
 0x114   : > { %v591_v14 = vpop.f32.mrf.mxu0  ;;  %s5484_s13 = sld [smem:[#allocation20_spill]] }
 0x115   : > { %v531_v12 = vadd.f32 %v530_v9, %v465_v19  ;;  %v843_v9 = vstv %s2885_s11  ;;  %v801_v19 = vrot.slane %v2811_v41, 1  ;;  %s3111_s11 = sld [smem:[#allocation2 + $0x7f]] }
 0x117   : > { %v588_v21 = vadd.f32 %v587_v17, %v531_v12  ;;  %v794_v17 = vrot.slane %v2807_v32, 7  ;;  %v891_v12 = vstv %s2893_s20  ;;  %s5490_s20 = sld [smem:[#allocation21_spill]] }
 0x118   : > { %v536_v25 = vpop.f32.mrf.mxu3 }
 0x119   : > { %v2835_v23 = vadd.f32 %v638_v10, %v588_v21  ;;  %v885_v10 = vstv %s2891_s14  ;;  %v800_v21 = vrot.slane %v2807_v32, 1  ;;  %5483 = sst [smem:[#allocation53_spill]] %s3120_s12 }
 0x11a   : > { %v469_v24 = vpop.f32.mrf.mxu2  ;;  %s3132_s14 = sld [smem:[#allocation2 + $0x47]] }
 0x11b   : > { %v470_v26 = vadd.f32 %v469_v24, %v409_v22  ;;  %1718 = vrot.lane.b32.xlu0 %v2835_v23, %s5338_s27  ;;  %v3012_v22 = vmul.f32 %v813_v1, %v2807_v32  ;;  %v3015_v24 = vmul.f32 %v819_v5, %v2807_v32  ;;  %5479 = sst [smem:[#allocation49_spill]] %s3111_s11 }
 0x11c   : > { %s5492_s12 = sld [smem:[#allocation23_spill]] }
 0x11d   : > { %v537_v16 = vadd.f32 %v536_v25, %v470_v26  ;;  %v3018_v25 = vmul.f32 %v837_v7, %v2807_v32  ;;  %s5493_s11 = sld [smem:[#allocation27_spill]] }
 0x11f   : > { %v592_v28 = vadd.f32 %v591_v14, %v537_v16  ;;  %5468 = vst [vmem:[#allocation38_spill] sm:$0xff] %v3018_v25  ;;  %v797_v14 = vsel %vm686_vm3, %v795_v2, %v794_v17  ;;  %v3027_v16 = vmul.f32 %v843_v9, %v2807_v32 }
 0x121   : > { %v2839_v29 = vadd.f32 %v642_v27, %v592_v28  ;;  %v3030_v27 = vmul.f32 %v861_v11, %v2807_v32  ;;  %v825_v28 = vstv %s2895_s22  ;;  %s3139_s22 = sld [smem:[#allocation2 + $0x4f]] }
 0x123   : > { %1721 = vrot.lane.b32.xlu1 %v2839_v29, %s5338_s27  ;;  %5469 = vst [vmem:[#allocation39_spill] sm:$0xff] %v3030_v27 }
 0x15d   : > { %v655_v30 = vpop.permute.xlu0 %654 }
 0x15e   : > { %v656_v18 = vsel %vm653_vm1, %v655_v30, %v2807_v32  ;;  %v3038_v30 = vmul.f32 %v867_v15, %v2807_v32 }
 0x15f   : > { %660 = vrot.lane.b32.xlu2 %v656_v18, %s5338_s27  ;;  %v3041_v18 = vmul.f32 %v885_v10, %v2807_v32 }
 0x161   : > { %5470 = vst [vmem:[#allocation40_spill] sm:$0xff] %v3041_v18 }
 0x165   : > { %v658_v20 = vpop.permute.xlu0 %657  ;;  %v1365_v33 = vpop.permute.xlu2 %1364 }
 0x166   : > { %v659_v31 = vsel %vm653_vm1, %v658_v20, %v2811_v41  ;;  %v1366_v35 = vsel %vm653_vm1, %v1365_v33, %v2823_v3  ;;  %v3044_v20 = vmul.f32 %v891_v12, %v2807_v32  ;;  %v803_v33 = vsel %vm693_vm4, %v801_v19, %v800_v21 }
 0x167   : > { %662 = vrot.lane.b32.xlu0 %v659_v31, %s5338_s27  ;;  %v796_v31 = vsel %vm686_vm3, %v794_v17, %v795_v2  ;;  %v3125_v2 = vmul.f32 %v885_v10, %v2811_v41  ;;  %v1191_v17 = vstv %s2918_s21  ;;  %s5499_s21 = sld [smem:[#allocation25_spill]] }
 0x168   : > { %5471 = vst [vmem:[#allocation41_spill] sm:$0xff] %v3044_v20 }
 0x169   : > { %5486 = vst [vmem:[#allocation55_spill] sm:$0xff] %v3125_v2 }
 0x16d   : > { %v1011_v34 = vpop.permute.xlu1 %1010  ;;  %v1368_v37 = vpop.permute.xlu2 %1367 }
 0x16e   : > { %v1012_v36 = vsel %vm653_vm1, %v1011_v34, %v2815_v50  ;;  %v1369_v39 = vsel %vm653_vm1, %v1368_v37, %v2829_v13  ;;  %v849_v34 = vstv %s2897_s23  ;;  %v3064_v37 = vmul.f32 %v819_v5, %v2811_v41  ;;  %s5491_s23 = sld [smem:[#allocation22_spill]] }
 0x16f   : > { %1370 = vrot.lane.b32.xlu0 %v1366_v35, %s5338_s27  ;;  %1016 = vrot.lane.b32.xlu1 %v1012_v36, %s5338_s27  ;;  %v798_v36 = vsel %vm232_vm2, %v797_v14, 0.0 }
 0x175   : > { %v1014_v38 = vpop.permute.xlu1 %1013 }
 0x176   : > { %v1015_v40 = vsel %vm653_vm1, %v1014_v38, %v2819_v59 }
 0x177   : > { %1372 = vrot.lane.b32.xlu1 %v1369_v39, %s5338_s27  ;;  %1018 = vrot.lane.b32.xlu2 %v1015_v40, %s5338_s27  ;;  %v802_v39 = vsel %vm693_vm4, %v800_v21, %v801_v19  ;;  %v3072_v40 = vmul.f32 %v837_v7, %v2811_v41  ;;  %v5360_v19 = vstv %s5484_s13  ;;  %v1155_v21 = vrot.slane %v2819_v59, 1 }
 0x179   : > { %5472 = vst [vmem:[#allocation42_spill] sm:$0xff] %v3072_v40 }
 0x18d   : > { %v1719_v42 = vpop.permute.xlu0 %1718 }
 0x18e   : > { %v1720_v43 = vsel %vm653_vm1, %v1719_v42, %v2835_v23  ;;  %v3075_v42 = vmul.f32 %v843_v9, %v2811_v41  ;;  %v1173_v9 = vstv %s2916_s17  ;;  %s3152_s17 = sld [smem:[#allocation2 + $0x4b]] }
 0x18f   : > { %1724 = vrot.lane.b32.xlu2 %v1720_v43, %s5338_s27  ;;  %v3078_v43 = vmul.f32 %v861_v11, %v2811_v41  ;;  %v1161_v11 = vstv %s2906_s0  ;;  %v3158_v14 = vmul.f32 %v1173_v9, %v2815_v50  ;;  %s3162_s0 = sld [smem:[#allocation2 + $0x13]] }
 0x190   : > { %5473 = vst [vmem:[#allocation43_spill] sm:$0xff] %v3075_v42 }
 0x191   : > { %5474 = vst [vmem:[#allocation44_spill] sm:$0xff] %v3078_v43 }
 0x192   : > { %5495 = vst [vmem:[#allocation60_spill] sm:$0xff] %v3158_v14 }
 0x195   : > { %v1722_v44 = vpop.permute.xlu1 %1721 }
 0x196   : > { %v1723_v45 = vsel %vm653_vm1, %v1722_v44, %v2839_v29  ;;  %v3082_v44 = vmul.f32 %v807_v63, %v796_v31 }
 0x197   : > { %1726 = vrot.lane.b32.xlu0 %v1723_v45, %s5338_s27  ;;  %s2899_s27 = sld [smem:[#allocation2 + $0xa8]]  ;;  %v3084_v45 = vmul.f32 %v831_v0, %v796_v31 }
 0x19d   : > { %v873_v35 = vstv %s2899_s27  ;;  %s3080_s27 = sld [smem:[#allocation2 + $0x46]] }
 0x1a3   : > { %5475 = sst [smem:[#allocation45_spill]] %s3080_s27 }
 0x1a4   : > { %s3145_s27 = sld [smem:[#allocation2 + $0xaf]] }
 0x1b9   : > { %v661_v46 = vpop.permute.xlu2 %660 }
 0x1ba   : > { %v664_v47 = vsel %vm653_vm1, %v661_v46, %v2807_v32  ;;  %v3061_v32 = vmul.f32 %v813_v1, %v2811_v41  ;;  %v3086_v46 = vmul.f32 %v855_v4, %v796_v31 }
 0x1bb   : > { %668 = vrot.lane.b32.xlu1 %v664_v47, %s5346_s28  ;;  %676 = vrot.lane.b32.xlu0 %v664_v47, %s5340_s29  ;;  %s2903_s29 = sld [smem:[#allocation2 + $0xac]]  ;;  %v805_v47 = vsel %vm235_vm5, %v803_v33, 0.0  ;;  %v3165_v33 = vmul.f32 %v1191_v17, %v2815_v50 }
 0x1bc   : > { %v3122_v1 = vmul.f32 %v873_v35, %v805_v47 }
 0x1bd   : > { %5496 = vst [vmem:[#allocation61_spill] sm:$0xff] %v3165_v33 }
 0x1be   : > { %5485 = vst [vmem:[#allocation54_spill] sm:$0xff] %v3122_v1 }
 0x1c1   : > { %v897_v38 = vstv %s2903_s29  ;;  %s3090_s29 = sld [smem:[#allocation2 + $0x4e]] }
 0x1c2   : > { %v3130_v5 = vmul.f32 %v897_v38, %v802_v39  ;;  %v3134_v7 = vmul.f32 %v897_v38, %v805_v47 }
 0x1c4   : > { %5488 = vst [vmem:[#allocation57_spill] sm:$0xff] %v3130_v5 }
 0x1c5   : > { %5489 = vst [vmem:[#allocation58_spill] sm:$0xff] %v3134_v7 }
 0x1d1   : > { %v1019_v48 = vpop.permute.xlu2 %1018 }
 0x1d2   : > { %v1021_v49 = vsel %vm653_vm1, %v1019_v48, %v2819_v59  ;;  %v3092_v48 = vmul.f32 %v807_v63, %v798_v36  ;;  %v3117_v63 = vmul.f32 %v873_v35, %v802_v39  ;;  %v1239_v35 = vstv %s5492_s12  ;;  %s3194_s12 = sld [smem:[#allocation2 + $0x1b]] }
 0x1d3   : > { %1026 = vrot.lane.b32.xlu0 %v1021_v49, %s5346_s28  ;;  %s5450_s28 = smov 127  }
 0x1d4   : > { %5482 = vst [vmem:[#allocation52_spill] sm:$0xff] %v3117_v63 }
 0x1d8   : > { %5508 = sst [smem:[#allocation21_spill]] %s3194_s12 }
 0x1d9   : > { %v663_v51 = vpop.permute.xlu0 %662  ;;  %s3295_s12 = sld [smem:[#allocation2 + $0x60]] }
 0x1da   : > { %v665_v52 = vsel %vm653_vm1, %v663_v51, %v2811_v41  ;;  %v3096_v51 = vmul.f32 %v855_v4, %v798_v36  ;;  %v3128_v4 = vmul.f32 %v891_v12, %v2811_v41  ;;  %v1154_v12 = vrot.slane %v2815_v50, 1 }
 0x1db   : > { %678 = vrot.lane.b32.xlu1 %v665_v52, %s5450_s28  ;;  %670 = vrot.lane.b32.xlu2 %v665_v52, %s5451_s15  ;;  %v3098_v52 = vmul.f32 %v879_v8, %v798_v36 }
 0x1dc   : > { %5487 = vst [vmem:[#allocation56_spill] sm:$0xff] %v3128_v4 }
 0x1e1   : > { %v1371_v53 = vpop.permute.xlu0 %1370  ;;  %v1017_v54 = vpop.permute.xlu1 %1016 }
 0x1e2   : > { %v2942_v56 = vsel %vm653_vm1, %v1371_v53, %v2823_v3  ;;  %v1020_v57 = vsel %vm653_vm1, %v1017_v54, %v2815_v50  ;;  %v3102_v53 = vmul.f32 %v879_v8, %v796_v31  ;;  %v3104_v54 = vmul.f32 %v825_v28, %v802_v39 }
 0x1e3   : > { %1378 = vrot.lane.b32.xlu0 %v2942_v56, %s5451_s15  ;;  %1032 = vrot.lane.b32.xlu1 %v1020_v57, %s5450_s28  ;;  %v1167_v8 = vstv %s2914_s24  ;;  %v1215_v31 = vstv %s2926_s18  ;;  %s5501_s24 = sld [smem:[#allocation26_spill]] }
 0x1e4   : > { %1024 = vrot.lane.b32.xlu2 %v1020_v57, %s5451_s15  ;;  %5476 = vst [vmem:[#allocation46_spill] sm:$0xff] %v3104_v54  ;;  %v3109_v57 = vmul.f32 %v867_v15, %v2811_v41  ;;  %v1185_v15 = vstv %s2908_s1  ;;  %v1209_v41 = vstv %s2910_s2  ;;  %s5497_s1 = sld [smem:[#allocation24_spill]]  ;;  %v3190_v14 = vmul.f32 %v1215_v31, %v2815_v50 }
 0x1e5   : > { %s3170_s2 = sld [smem:[#allocation2 + $0x17]] }
 0x1e6   : > { %5478 = vst [vmem:[#allocation48_spill] sm:$0xff] %v3109_v57  ;;  %s3180_s18 = sld [smem:[#allocation2 + $0x1f]] }
 0x1e7   : > { %5507 = vst [vmem:[#allocation67_spill] sm:$0xff] %v3190_v14  ;;  %v1203_v14 = vstv %s5499_s21  ;;  %s5520_s21 = sld [smem:[#allocation29_spill]] }
 0x1e9   : > { %v1373_v60 = vpop.permute.xlu1 %1372  ;;  %v1725_v6 = vpop.permute.xlu2 %1724 }
 0x1ea   : > { %v1375_v62 = vsel %vm653_vm1, %v1373_v60, %v2829_v13  ;;  %v1728_v26 = vsel %vm653_vm1, %v1725_v6, %v2835_v23  ;;  %v3113_v60 = vmul.f32 %v825_v28, %v805_v47  ;;  %v1148_v6 = vrot.slane %v2815_v50, 7 }
 0x1eb   : > { %1388 = vrot.lane.b32.xlu0 %v1375_v62, %s5450_s28  ;;  %1380 = vrot.lane.b32.xlu1 %v1375_v62, %s5451_s15  ;;  %v3115_v62 = vmul.f32 %v849_v34, %v805_v47  ;;  %v1197_v28 = vstv %s5490_s20  ;;  %s3196_s20 = sld [smem:[#allocation2 + $0x50]] }
 0x1ec   : > { %1034 = vrot.lane.b32.xlu2 %v1021_v49, %s5450_s28  ;;  %v3094_v49 = vmul.f32 %v831_v0, %v798_v36  ;;  %5480 = vst [vmem:[#allocation50_spill] sm:$0xff] %v3113_v60  ;;  %v1149_v0 = vrot.slane %v2819_v59, 7  ;;  %v1245_v36 = vstv %s5493_s11  ;;  %5503 = sst [smem:[#allocation20_spill]] %s3180_s18  ;;  %v3187_v33 = vmul.f32 %v1197_v28, %v2815_v50 }
 0x1ed   : > { %5481 = vst [vmem:[#allocation51_spill] sm:$0xff] %v3115_v62  ;;  %s5505_s11 = sld [smem:[#allocation28_spill]] }
 0x1ee   : > { %v1150_v10 = vsel %vm686_vm3, %v1148_v6, %v1149_v0  ;;  %v1151_v55 = vsel %vm686_vm3, %v1149_v0, %v1148_v6  ;;  %5506 = vst [vmem:[#allocation66_spill] sm:$0xff] %v3187_v33  ;;  %v1179_v0 = vstv %s5497_s1  ;;  %v1227_v33 = vstv %s5501_s24  ;;  %s3216_s1 = sld [smem:[#allocation2 + $0x54]] }
 0x1ef   : > { %v3172_v38 = vmul.f32 %v1161_v11, %v1150_v10  ;;  %v3176_v47 = vmul.f32 %v1209_v41, %v1150_v10  ;;  %s3239_s24 = sld [smem:[#allocation2 + $0x58]] }
 0x1f1   : > { %5498 = vst [vmem:[#allocation62_spill] sm:$0xff] %v3172_v38  ;;  %5509 = sst [smem:[#allocation22_spill]] %s3196_s20 }
 0x1f2   : > { %5502 = vst [vmem:[#allocation64_spill] sm:$0xff] %v3176_v47  ;;  %v1156_v47 = vsel %vm693_vm4, %v1154_v12, %v1155_v21  ;;  %s5545_s20 = sld [smem:[#allocation36_spill]] }
 0x1f3   : > { %1740 = vrot.lane.b32.xlu0 %v1728_v26, %s5450_s28  ;;  %1732 = vrot.lane.b32.xlu1 %v1728_v26, %s5451_s15  ;;  %v3155_v26 = vmul.f32 %v1167_v8, %v2815_v50  ;;  %v1251_v38 = vstv %s5505_s11  ;;  %s3249_s11 = sld [smem:[#allocation2 + $0x88]] }
 0x1f4   : > { %1386 = vrot.lane.b32.xlu2 %v2942_v56, %s5450_s28  ;;  %v3106_v56 = vmul.f32 %v849_v34, %v802_v39  ;;  %v1221_v34 = vstv %s5491_s23  ;;  %v3174_v39 = vmul.f32 %v1185_v15, %v1150_v10  ;;  %s3208_s23 = sld [smem:[#allocation2 + $0x80]] }
 0x1f5   : > { %5494 = vst [vmem:[#allocation59_spill] sm:$0xff] %v3155_v26  ;;  %v3184_v26 = vmul.f32 %v5360_v19, %v1150_v10  ;;  %v3200_v6 = vmul.f32 %v1221_v34, %v2815_v50  ;;  %v3203_v10 = vmul.f32 %v1239_v35, %v2815_v50  ;;  %v3206_v19 = vmul.f32 %v1245_v36, %v2815_v50  ;;  %5514 = sst [smem:[#allocation27_spill]] %s3216_s1 }
 0x1f6   : > { %5477 = vst [vmem:[#allocation47_spill] sm:$0xff] %v3106_v56  ;;  %5522 = sst [smem:[#allocation25_spill]] %s3239_s24  ;;  %v3246_v50 = vmul.f32 %v1221_v34, %v2819_v59  ;;  %v5533_v34 = vrot.slane %v2829_v13, 7 }
 0x1f7   : > { %5500 = vst [vmem:[#allocation63_spill] sm:$0xff] %v3174_v39  ;;  %v1157_v39 = vsel %vm693_vm4, %v1155_v21, %v1154_v12  ;;  %v3234_v12 = vmul.f32 %v1197_v28, %v2819_v59  ;;  %v3237_v21 = vmul.f32 %v1215_v31, %v2819_v59  ;;  %v3255_v31 = vmul.f32 %v1203_v14, %v1156_v47  ;;  %s3259_s24 = sld [smem:[#allocation2 + $0x5c]] }
 0x1f8   : > { %5504 = vst [vmem:[#allocation65_spill] sm:$0xff] %v3184_v26  ;;  %v1152_v26 = vsel %vm232_vm2, %v1151_v55, 0.0  ;;  %v3231_v55 = vmul.f32 %v1191_v17, %v2819_v59  ;;  %s3285_s1 = sld [smem:[#allocation2 + $0x30]] }
 0x1f9   : > { %5510 = vst [vmem:[#allocation68_spill] sm:$0xff] %v3200_v6  ;;  %v1159_v6 = vsel %vm235_vm5, %v1157_v39, 0.0  ;;  %v3243_v39 = vmul.f32 %v1179_v0, %v1156_v47  ;;  %5526 = sst [smem:[#allocation26_spill]] %s3249_s11  ;;  %v3253_v28 = vmul.f32 %v1185_v15, %v1152_v26  ;;  %v1509_v15 = vrot.slane %v2829_v13, 1 }
 0x1fa   : > { %5511 = vst [vmem:[#allocation69_spill] sm:$0xff] %v3203_v10  ;;  %5513 = sst [smem:[#allocation23_spill]] %s3208_s23  ;;  %v3222_v10 = vmul.f32 %v1167_v8, %v2819_v59  ;;  %v3241_v8 = vmul.f32 %v1161_v11, %v1152_v26  ;;  %v3251_v17 = vmul.f32 %v1179_v0, %v1159_v6 }
 0x1fb   : > { %5512 = vst [vmem:[#allocation70_spill] sm:$0xff] %v3206_v19  ;;  %s3225_s23 = sld [smem:[#allocation2 + $0x84]]  ;;  %v3228_v19 = vmul.f32 %v1173_v9, %v2819_v59  ;;  %v5369_v9 = vrot.slane %v2823_v3, 7 }
 0x1fc   : > { %5515 = vst [vmem:[#allocation71_spill] sm:$0xff] %v3222_v10  ;;  %s5534_s11 = sld [smem:[#allocation31_spill]] }
 0x1fd   : > { %5517 = vst [vmem:[#allocation72_spill] sm:$0xff] %v3228_v19  ;;  %5531 = sst [smem:[#allocation28_spill]] %s3259_s24  ;;  %v3261_v19 = vmul.f32 %v1209_v41, %v1152_v26  ;;  %v1504_v0 = vsel %vm686_vm3, %v5369_v9, %v5533_v34  ;;  %v3277_v41 = vmul.f32 %v1227_v33, %v1159_v6  ;;  %v3291_v34 = vmul.f32 %v1245_v36, %v2819_v59 }
 0x1fe   : > { %5518 = vst [vmem:[#allocation73_spill] sm:$0xff] %v3231_v55  ;;  %s5540_s24 = sld [smem:[#allocation32_spill]] }
 0x1ff   : > { %5519 = vst [vmem:[#allocation74_spill] sm:$0xff] %v3234_v12  ;;  %v3257_v12 = vmul.f32 %v1203_v14, %v1159_v6  ;;  %5541 = sst [smem:[#allocation31_spill]] %s3285_s1 }
 0x200   : > { %5521 = vst [vmem:[#allocation75_spill] sm:$0xff] %v3237_v21  ;;  %5547 = sst [smem:[#allocation32_spill]] %s3295_s12 }
 0x201   : > { %5516 = sst [smem:[#allocation24_spill]] %s3225_s23  ;;  %5523 = vst [vmem:[#allocation76_spill] sm:$0xff] %v3241_v8 }
 0x202   : > { %5524 = vst [vmem:[#allocation77_spill] sm:$0xff] %v3243_v39  ;;  %s3273_s23 = sld [smem:[#allocation2 + $0x8c]] }
 0x203   : > { %5525 = vst [vmem:[#allocation78_spill] sm:$0xff] %v3246_v50  ;;  %v5371_v50 = vstv %s5520_s21  ;;  %s3315_s12 = sld [smem:[#allocation5 + $0x1]] }
 0x204   : > { %5527 = vst [vmem:[#allocation79_spill] sm:$0xff] %v3251_v17  ;;  %v5538_v17 = vstv %s5484_s13  ;;  %s5546_s13 = sld [smem:[#allocation35_spill]] }
 0x205   : > { %5528 = vst [vmem:[#allocation80_spill] sm:$0xff] %v3253_v28  ;;  %v3281_v21 = vmul.f32 %v5538_v17, %v1152_v26  ;;  %v1508_v26 = vrot.slane %v2823_v3, 1  ;;  %v3297_v17 = vmul.f32 %v1251_v38, %v1156_v47  ;;  %s3324_s1 = sld [smem:[#allocation5 + $0x2]] }
 0x206   : > { %5529 = vst [vmem:[#allocation81_spill] sm:$0xff] %v3255_v31 }
 0x207   : > { %5530 = vst [vmem:[#allocation82_spill] sm:$0xff] %v3257_v12  ;;  %v3275_v12 = vmul.f32 %v1227_v33, %v1156_v47  ;;  %v3311_v36 = vsel %vm693_vm4, %v1508_v26, %v1509_v15  ;;  %v1575_v33 = vstv %s2963_s25  ;;  %v1581_v47 = vstv %s5540_s24  ;;  %s3331_s25 = sld [smem:[#allocation5 + $0x3]] }
 0x208   : > { %5532 = vst [vmem:[#allocation83_spill] sm:$0xff] %v3261_v19  ;;  %5535 = sst [smem:[#allocation29_spill]] %s3273_s23  ;;  %v3342_v10 = vmul.f32 %v1575_v33, %v2823_v3 }
 0x209   : > { %v1727_v11 = vpop.permute.xlu0 %1726  ;;  %5536 = vst [vmem:[#allocation84_spill] sm:$0xff] %v3275_v12  ;;  %s5543_s23 = sld [smem:[#allocation34_spill]]  ;;  %v3390_v12 = vmul.f32 %v1575_v33, %v2829_v13 }
 0x20a   : > { %v1729_v14 = vsel %vm653_vm1, %v1727_v11, %v2839_v29  ;;  %5537 = vst [vmem:[#allocation85_spill] sm:$0xff] %v3277_v41  ;;  %v3288_v11 = vmul.f32 %v1239_v35, %v2819_v59  ;;  %v3303_v35 = vmul.f32 %v5371_v50, %v1504_v0  ;;  %v1557_v50 = vstv %s5545_s20  ;;  %s3357_s20 = sld [smem:[#allocation2 + $0x64]] }
 0x20b   : > { %5539 = vst [vmem:[#allocation86_spill] sm:$0xff] %v3281_v21  ;;  %1734 = vrot.lane.b32.xlu2 %v1729_v14, %s5451_s15  ;;  %1742 = vrot.lane.b32.xlu1 %v1729_v14, %s5450_s28  ;;  %s5549_s15 = sld [smem:[#allocation37_spill]]  ;;  %v3299_v14 = vmul.f32 %v1251_v38, %v1159_v6  ;;  %v5552_v38 = vstv %s2954_s16  ;;  %v1527_v9 = vstv %s5546_s13  ;;  %v1863_v59 = vrot.slane %v2839_v29, 1 }
 0x20c   : > { %5542 = vst [vmem:[#allocation87_spill] sm:$0xff] %v3288_v11  ;;  %s3306_s28 = sld [smem:[#allocation5]]  ;;  %v3319_v6 = vmul.f32 %v5552_v38, %v1504_v0  ;;  %v1533_v41 = vstv %s2990_s4  ;;  %v5554_v11 = vstv %s5534_s11  ;;  %v5556_v38 = vstv %s2961_s26 }
 0x20d   : > { %5544 = vst [vmem:[#allocation88_spill] sm:$0xff] %v3291_v34  ;;  %v3335_v55 = vmul.f32 %v5554_v11, %v1504_v0  ;;  %s3347_s4 = sld [smem:[#allocation2 + $0x34]]  ;;  %v1905_v11 = vstv %s2996_s3 }
 0x20e   : > { %5548 = vst [vmem:[#allocation89_spill] sm:$0xff] %v3297_v17  ;;  %v3345_v17 = vmul.f32 %v1581_v47, %v3311_v36  ;;  %s3381_s3 = sld [smem:[#allocation2 + $0x68]] }
 0x20f   : > { %5550 = vst [vmem:[#allocation90_spill] sm:$0xff] %v3299_v14  ;;  %v1551_v14 = vstv %s5543_s23  ;;  %s3370_s23 = sld [smem:[#allocation2 + $0x38]] }
 0x210   : > { %5551 = vst [vmem:[#allocation91_spill] sm:$0xff] %v3303_v35  ;;  %v1511_v35 = vsel %vm693_vm4, %v1509_v15, %v1508_v26  ;;  %v1862_v15 = vrot.slane %v2835_v23, 1  ;;  %v3351_v26 = vmul.f32 %v1551_v14, %v2823_v3  ;;  %s3392_s24 = sld [smem:[#allocation2 + $0x3c]] }
 0x211   : > { %5553 = vst [vmem:[#allocation92_spill] sm:$0xff] %v3319_v6  ;;  %v1929_v34 = vstv %s5549_s15  ;;  %v3339_v6 = vmul.f32 %v5556_v38, %v1504_v0  ;;  %v3363_v38 = vmul.f32 %v1557_v50, %v3311_v36  ;;  %s3448_s13 = sld [smem:[#allocation2 + $0x94]] }
 0x212   : > { %5555 = vst [vmem:[#allocation93_spill] sm:$0xff] %v3335_v55  ;;  %v3355_v55 = vmul.f32 %v1527_v9, %v2823_v3  ;;  %v3360_v0 = vmul.f32 %v1929_v34, %v2835_v23  ;;  %s5590_s15 = sld [smem:[#allocation53_spill]] }
 0x213   : > { %5557 = vst [vmem:[#allocation94_spill] sm:$0xff] %v3339_v6  ;;  %5560 = sst [smem:[#allocation34_spill]] %s3347_s4  ;;  %v1881_v6 = vstv %s3020_s5 }
 0x214   : > { %5558 = vst [vmem:[#allocation95_spill] sm:$0xff] %v3342_v10  ;;  %v1513_v10 = vsel %vm235_vm5, %v1511_v35, 0.0  ;;  %v1865_v35 = vsel %vm693_vm4, %v1863_v59, %v1862_v15  ;;  %s3413_s5 = sld [smem:[#allocation2]] }
 0x215   : > { %5559 = vst [vmem:[#allocation96_spill] sm:$0xff] %v3345_v17  ;;  %v3366_v17 = vmul.f32 %v1533_v41, %v3311_v36  ;;  %5566 = sst [smem:[#allocation36_spill]] %s3370_s23  ;;  %v3394_v31 = vmul.f32 %v1533_v41, %v1513_v10  ;;  %v3396_v39 = vmul.f32 %v1581_v47, %v1513_v10  ;;  %v3410_v33 = vmul.f32 %v1557_v50, %v1513_v10 }
 0x216   : > { %5561 = vst [vmem:[#allocation97_spill] sm:$0xff] %v3351_v26  ;;  %v1935_v26 = vstv %s3008_s30  ;;  %s3402_s30 = sld [smem:[#allocation2 + $0x6c]]  ;;  %v1605_v41 = vstv %s3046_s7  ;;  %v1887_v47 = vstv %s3056_s8  ;;  %v3430_v50 = vmul.f32 %v1929_v34, %v2839_v29 }
 0x217   : > { %5562 = vst [vmem:[#allocation98_spill] sm:$0xff] %v3355_v55  ;;  %v3374_v55 = vsel %vm693_vm4, %v1862_v15, %v1863_v59  ;;  %v3408_v59 = vmul.f32 %v1881_v6, %v2835_v23  ;;  %v1867_v15 = vsel %vm235_vm5, %v1865_v35, 0.0  ;;  %v1521_v35 = vstv %s3067_s9  ;;  %s3439_s7 = sld [smem:[#allocation2 + $0x4]] }
 0x218   : > { %5563 = vst [vmem:[#allocation99_spill] sm:$0xff] %v3360_v0  ;;  %v3379_v0 = vmul.f32 %v1527_v9, %v2829_v13  ;;  %v3399_v9 = vmul.f32 %v1551_v14, %v2829_v13  ;;  %s5585_s8 = sld [smem:[#allocation49_spill]]  ;;  %v1569_v34 = vstv %s3100_s10 }
 0x219   : > { %5564 = vst [vmem:[#allocation100_spill] sm:$0xff] %v3363_v38  ;;  %v1911_v38 = vstv %s3032_s6  ;;  %s5583_s6 = sld [smem:[#allocation45_spill]] }
 0x21a   : > { %5565 = vst [vmem:[#allocation101_spill] sm:$0xff] %v3366_v17  ;;  %v3384_v17 = vmul.f32 %v1905_v11, %v2835_v23  ;;  %v3416_v14 = vmul.f32 %v1911_v38, %v3374_v55  ;;  %5587 = sst [smem:[#allocation37_spill]] %s3448_s13 }
 0x21b   : > { %5567 = vst [vmem:[#allocation102_spill] sm:$0xff] %v3379_v0  ;;  %v1599_v0 = vstv %s3002_s19  ;;  %s3424_s19 = sld [smem:[#allocation2 + $0x90]] }
 0x21c   : > { %5568 = vst [vmem:[#allocation103_spill] sm:$0xff] %v3384_v17  ;;  %v3405_v17 = vmul.f32 %v1935_v26, %v3374_v55  ;;  %s3460_s9 = sld [smem:[#allocation2 + $0x8]] }
 0x21d   : > { %5569 = vst [vmem:[#allocation104_spill] sm:$0xff] %v3390_v12  ;;  %v5582_v12 = vrot.slane %v2829_v13, 7  ;;  %s3480_s10 = sld [smem:[#allocation2 + $0xc]] }
 0x21e   : > { %5570 = vst [vmem:[#allocation105_spill] sm:$0xff] %v3394_v31  ;;  %v3453_v31 = vmul.f32 %v1887_v47, %v1867_v15  ;;  %s3654_s23 = sld [smem:[#allocation2 + $0x51]] }
 0x21f   : > { %5571 = vst [vmem:[#allocation106_spill] sm:$0xff] %v3396_v39  ;;  %v3427_v39 = vmul.f32 %v1881_v6, %v2839_v29  ;;  %v3444_v6 = vmul.f32 %v1599_v0, %v2823_v3  ;;  %s5665_s13 = sld [smem:[#allocation22_spill]] }
 0x220   : > { %5572 = vst [vmem:[#allocation107_spill] sm:$0xff] %v3399_v9  ;;  %v3422_v9 = vmul.f32 %v1599_v0, %v2829_v13  ;;  %s3676_s4 = sld [smem:[#allocation2 + $0x85]] }
 0x221   : > { %5573 = vst [vmem:[#allocation108_spill] sm:$0xff] %v3405_v17  ;;  %5578 = sst [smem:[#allocation35_spill]] %s3424_s19  ;;  %v1893_v17 = vstv %s3170_s2 }
 0x222   : > { %5574 = vst [vmem:[#allocation109_spill] sm:$0xff] %v3408_v59  ;;  %s5633_s2 = sld [smem:[#allocation27_spill]] }
 0x223   : > { %5575 = vst [vmem:[#allocation110_spill] sm:$0xff] %v3410_v33  ;;  %v5581_v33 = vrot.slane %v2823_v3, 7  ;;  %s3663_s19 = sld [smem:[#allocation2 + $0x81]] }
 0x224   : > { %5576 = vst [vmem:[#allocation111_spill] sm:$0xff] %v3416_v14  ;;  %v5615_v14 = vstv %s2954_s16  ;;  %s3616_s16 = sld [smem:[#allocation2 + $0x95]] }
 0x225   : > { %5577 = vst [vmem:[#allocation112_spill] sm:$0xff] %v3422_v9  ;;  %v1505_v59 = vsel %vm686_vm3, %v5582_v12, %v5581_v33  ;;  %v3441_v9 = vmul.f32 %v1605_v41, %v1513_v10  ;;  %v3455_v12 = vmul.f32 %v1935_v26, %v1867_v15  ;;  %v3458_v10 = vmul.f32 %v1905_v11, %v2839_v29 }
 0x226   : > { %5579 = vst [vmem:[#allocation113_spill] sm:$0xff] %v3427_v39  ;;  %v1593_v39 = vstv %s3090_s29  ;;  %v1506_v0 = vsel %vm232_vm2, %v1505_v59, 0.0  ;;  %v3465_v33 = vmul.f32 %v1521_v35, %v2823_v3  ;;  %s3469_s29 = sld [smem:[#allocation2 + $0x98]]  ;;  %v3471_v26 = vmul.f32 %v1911_v38, %v1867_v15 }
 0x227   : > { %5580 = vst [vmem:[#allocation114_spill] sm:$0xff] %v3430_v50  ;;  %v3451_v50 = vmul.f32 %v1887_v47, %v3374_v55  ;;  %v1857_v47 = vrot.slane %v2839_v29, 7  ;;  %v3475_v11 = vmul.f32 %v1593_v39, %v2823_v3  ;;  %v3483_v59 = vmul.f32 %v1605_v41, %v3311_v36 }
 0x228   : > { %5584 = vst [vmem:[#allocation115_spill] sm:$0xff] %v3441_v9  ;;  %v1875_v9 = vstv %s5590_s15  ;;  %v1947_v38 = vstv %s3139_s22  ;;  %s5610_s22 = sld [smem:[#allocation21_spill]] }
 0x229   : > { %5586 = vst [vmem:[#allocation116_spill] sm:$0xff] %v3444_v6  ;;  %v1545_v6 = vstv %s5583_s6  ;;  %s3488_s6 = sld [smem:[#allocation2 + $0x9c]] }
 0x22a   : > { %5588 = vst [vmem:[#allocation117_spill] sm:$0xff] %v3451_v50  ;;  %v3502_v36 = vmul.f32 %v1545_v6, %v2823_v3  ;;  %s5635_s15 = sld [smem:[#allocation24_spill]] }
 0x22b   : > { %5589 = vst [vmem:[#allocation118_spill] sm:$0xff] %v3453_v31 }
 0x22c   : > { %5591 = vst [vmem:[#allocation119_spill] sm:$0xff] %v3455_v12  ;;  %5594 = sst [smem:[#allocation45_spill]] %s3469_s29  ;;  %v1953_v12 = vstv %s5585_s8 }
 0x22d   : > { %5592 = vst [vmem:[#allocation120_spill] sm:$0xff] %v3458_v10  ;;  %v3478_v10 = vmul.f32 %v1569_v34, %v2823_v3  ;;  %s3504_s8 = sld [smem:[#allocation2 + $0x31]]  ;;  %v3507_v41 = vmul.f32 %v1953_v12, %v2835_v23  ;;  %v3520_v3 = vmul.f32 %v1875_v9, %v2835_v23 }
 0x22e   : > { %5593 = vst [vmem:[#allocation121_spill] sm:$0xff] %v3465_v33  ;;  %v1856_v33 = vrot.slane %v2835_v23, 7  ;;  %s3669_s29 = sld [smem:[#allocation2 + $0x55]] }
 0x22f   : > { %5595 = vst [vmem:[#allocation122_spill] sm:$0xff] %v3471_v26  ;;  %5599 = sst [smem:[#allocation49_spill]] %s3488_s6  ;;  %v5600_v26 = vstv %s5520_s21 }
 0x230   : > { %5596 = vst [vmem:[#allocation123_spill] sm:$0xff] %v3475_v11  ;;  %v3492_v31 = vmul.f32 %v5600_v26, %v1506_v0  ;;  %v3495_v11 = vmul.f32 %v1545_v6, %v2829_v13  ;;  %v1859_v26 = vsel %vm686_vm3, %v1857_v47, %v1856_v33  ;;  %v3523_v6 = vmul.f32 %v1947_v38, %v2835_v23  ;;  %s3526_s21 = sld [smem:[#allocation2 + $0x35]] }
 0x231   : > { %5597 = vst [vmem:[#allocation124_spill] sm:$0xff] %v3478_v10  ;;  %v5603_v10 = vstv %s2961_s26  ;;  %s3516_s26 = sld [smem:[#allocation2 + $0x61]] }
 0x232   : > { %5598 = vst [vmem:[#allocation125_spill] sm:$0xff] %v3483_v59  ;;  %v3499_v50 = vmul.f32 %v5603_v10, %v1506_v0  ;;  %v5607_v59 = vstv %s5534_s11  ;;  %v1959_v10 = vstv %s3145_s27  ;;  %s3539_s27 = sld [smem:[#allocation2 + $0x65]] }
 0x233   : > { %5601 = vst [vmem:[#allocation126_spill] sm:$0xff] %v3492_v31  ;;  %v1899_v31 = vstv %s3132_s14  ;;  %s3549_s14 = sld [smem:[#allocation2 + $0x39]] }
 0x234   : > { %5602 = vst [vmem:[#allocation127_spill] sm:$0xff] %v3495_v11  ;;  %v3514_v11 = vmul.f32 %v5607_v59, %v1506_v0  ;;  %v3534_v59 = vmul.f32 %v5615_v14, %v1506_v0  ;;  %v1917_v14 = vstv %s5610_s22  ;;  %v3558_v0 = vmul.f32 %v1569_v34, %v2829_v13  ;;  %s3577_s11 = sld [smem:[#allocation2 + $0x3d]] }
 0x235   : > { %5604 = vst [vmem:[#allocation128_spill] sm:$0xff] %v3499_v50  ;;  %v3529_v50 = vmul.f32 %v1953_v12, %v2839_v29  ;;  %v5630_v12 = vlaneseq  ;;  %s3628_s22 = sld [smem:[#allocation2 + $0x9d]] }
 0x236   : > { %5605 = vst [vmem:[#allocation129_spill] sm:$0xff] %v3502_v36  ;;  %v1923_v36 = vstv %s3152_s17  ;;  %5613 = sst [smem:[#allocation21_spill]] %s3526_s21 }
 0x237   : > { %5606 = vst [vmem:[#allocation130_spill] sm:$0xff] %v3507_v41  ;;  %5609 = sst [smem:[#allocation53_spill]] %s3516_s26  ;;  %v1869_v41 = vstv %s3162_s0 }
 0x238   : > { %5608 = vst [vmem:[#allocation131_spill] sm:$0xff] %v3514_v11  ;;  %v3537_v11 = vmul.f32 %v1521_v35, %v2829_v13  ;;  %5618 = sst [smem:[#allocation137_spill]] %s3539_s27  ;;  %v3555_v35 = vmul.f32 %v1923_v36, %v2835_v23 }
 0x239   : > { %5611 = vst [vmem:[#allocation132_spill] sm:$0xff] %v3520_v3  ;;  %v1860_v3 = vsel %vm232_vm2, %v1859_v26, 0.0  ;;  %5620 = sst [smem:[#allocation139_spill]] %s3549_s14  ;;  %v3569_v26 = vmul.f32 %v1899_v31, %v2835_v23 }
 0x23a   : > { %5612 = vst [vmem:[#allocation133_spill] sm:$0xff] %v3523_v6  ;;  %v3545_v6 = vsel %vm686_vm3, %v1856_v33, %v1857_v47  ;;  %s3560_s17 = sld [smem:[#allocation2 + $0x69]]  ;;  %v3563_v33 = vmul.f32 %v1959_v10, %v3374_v55  ;;  %v3566_v47 = vmul.f32 %v1899_v31, %v2839_v29  ;;  %v3579_v34 = vmul.f32 %v1869_v41, %v1860_v3 }
 0x23b   : > { %5614 = vst [vmem:[#allocation134_spill] sm:$0xff] %v3529_v50  ;;  %v3551_v50 = vmul.f32 %v1959_v10, %v1867_v15  ;;  %v3572_v15 = vmul.f32 %v1593_v39, %v2829_v13  ;;  %s5631_s0 = sld [smem:[#allocation23_spill]]  ;;  %v3582_v55 = vmul.f32 %v1893_v17, %v3545_v6  ;;  %v5639_v10 = vstv %s3180_s18 }
 0x23c   : > { %5616 = vst [vmem:[#allocation135_spill] sm:$0xff] %v3534_v59  ;;  %5634 = sst [smem:[#allocation149_spill]] %s3577_s11  ;;  %v3586_v23 = vmul.f32 %v5639_v10, %v1860_v3  ;;  %v3590_v13 = vmul.f32 %v1917_v14, %v1860_v3  ;;  %v3592_v39 = vmul.f32 %v1893_v17, %v1860_v3  ;;  %v3595_v31 = vmul.f32 %v1869_v41, %v3545_v6 }
 0x23d   : > { %5617 = vst [vmem:[#allocation136_spill] sm:$0xff] %v3537_v11  ;;  %s5641_s14 = sld [smem:[#allocation26_spill]]  ;;  %v3604_v10 = vmul.f32 %v1917_v14, %v3545_v6  ;;  %v3610_v17 = vmul.f32 %v1947_v38, %v2839_v29  ;;  %v3634_v14 = vstv %s3315_s12  ;;  %v3641_v41 = vstv %s3331_s25 }
 0x23e   : > { %5619 = vst [vmem:[#allocation138_spill] sm:$0xff] %v3545_v6  ;;  %s5643_s27 = sld [smem:[#allocation28_spill]]  ;;  %v5668_v6 = vstv %s5665_s13 }
 0x23f   : > { %5621 = vst [vmem:[#allocation140_spill] sm:$0xff] %v3551_v50  ;;  %s3601_s18 = sld [smem:[#allocation2 + $0x91]]  ;;  %v5690_v50 = vstv %s3402_s30 }
 0x240   : > { %5622 = vst [vmem:[#allocation141_spill] sm:$0xff] %v3555_v35  ;;  %5625 = sst [smem:[#allocation143_spill]] %s3560_s17  ;;  %v3575_v35 = vand.u32 127, %v5630_v12  ;;  %v3598_v12 = vmul.f32 %v1875_v9, %v2839_v29  ;;  %v3631_v9 = vstv %s3306_s28 }
 0x241   : > { %5623 = vst [vmem:[#allocation142_spill] sm:$0xff] %v3558_v0  ;;  %s3588_s17 = sld [smem:[#allocation2 + $0x6d]] }
 0x242   : > { %5626 = vst [vmem:[#allocation144_spill] sm:$0xff] %v3563_v33  ;;  %s5650_s26 = sld [smem:[#allocation32_spill]]  ;;  %vm231_vm6 = vcmp.le.s32.totalorder %v3575_v35, 30  ;;  %vm230_vm7 = vcmp.ge.s32.totalorder %v3575_v35, 1 }
 0x243   : > { %5627 = vst [vmem:[#allocation145_spill] sm:$0xff] %v3566_v47  ;;  %5654 = sst [smem:[#allocation26_spill]] %s3616_s16 }
 0x244   : > { %5628 = vst [vmem:[#allocation146_spill] sm:$0xff] %v3569_v26  ;;  %5656 = sst [smem:[#allocation160_spill]] %s3628_s22  ;;  %v5685_v59 = vstv %s5643_s27 }
 0x245   : > { %5629 = vst [vmem:[#allocation147_spill] sm:$0xff] %v3572_v15  ;;  %5649 = sst [smem:[#allocation24_spill]] %s3601_s18 }
 0x246   : > { %5632 = vst [vmem:[#allocation148_spill] sm:$0xff] %v3575_v35  ;;  %s3622_s18 = sld [smem:[#allocation2 + $0x99]] }
 0x247   : > { %5636 = vst [vmem:[#allocation150_spill] sm:$0xff] %v3579_v34  ;;  %s5658_s21 = sld [smem:[#allocation21_spill]] }
 0x248   : > { %5638 = vst [vmem:[#allocation151_spill] sm:$0xff] %v3582_v55  ;;  %s5659_s28 = sld [smem:[#allocation137_spill]]  ;;  %v5680_v26 = vstv %s5650_s26  ;;  %v5689_v55 = vstv %s3381_s3 }
 0x249   : > { %5640 = vst [vmem:[#allocation152_spill] sm:$0xff] %v3586_v23  ;;  %s5663_s25 = sld [smem:[#allocation24_spill]] }
 0x24a   : > { %5642 = vst [vmem:[#allocation153_spill] sm:$0xff] %v3590_v13  ;;  %v3607_v13 = vmul.f32 %v1923_v36, %v2839_v29  ;;  %v3637_v29 = vstv %s3324_s1  ;;  %s5662_s1 = sld [smem:[#allocation149_spill]]  ;;  %v5672_v36 = vstv %s5633_s2 }
 0x24b   : > { %5644 = vst [vmem:[#allocation154_spill] sm:$0xff] %v3592_v39  ;;  %v669_v39 = vpop.permute.xlu1 %668  ;;  %s5666_s6 = sld [smem:[#allocation25_spill]] }
 0x24c   : > { %5646 = vst [vmem:[#allocation155_spill] sm:$0xff] %v3595_v31  ;;  %5655 = sst [smem:[#allocation32_spill]] %s3622_s18  ;;  %v5675_v31 = vstv %s5635_s15 }
 0x24d   : > { %5647 = vst [vmem:[#allocation156_spill] sm:$0xff] %v3598_v12  ;;  %s5667_s12 = sld [smem:[#allocation29_spill]]  ;;  %v5670_v12 = vstv %s5631_s0 }
 0x24e   : > { %5651 = vst [vmem:[#allocation157_spill] sm:$0xff] %v3604_v10  ;;  %s3682_s11 = sld [smem:[#allocation2 + $0x59]] }
 0x24f   : > { %5652 = vst [vmem:[#allocation158_spill] sm:$0xff] %v3607_v13  ;;  %s5674_s18 = sld [smem:[#allocation31_spill]] }
 0x250   : > { %5653 = vst [vmem:[#allocation159_spill] sm:$0xff] %v3610_v17  ;;  %v677_v17 = vpop.permute.xlu0 %676  ;;  %s3700_s22 = sld [smem:[#allocation2 + $0x89]] }
 0x251   : > { %v3658_v3 = vsel %vm231_vm6, %v677_v17, 0.0  ;;  %v674_v17 = vsel %vm230_vm7, %v669_v39, 0.0  ;;  %s5676_s16 = sld [smem:[#allocation34_spill]] }
 0x252   : > { %5664 = vst [vmem:[#allocation161_spill] sm:$0xff] %v3658_v3  ;;  %v3688_v10 = vmul.f32 %v5668_v6, %v3658_v3  ;;  %v3693_v13 = vmul.f32 %v5670_v12, %v3658_v3  ;;  %v3698_v15 = vmul.f32 %v5672_v36, %v3658_v3  ;;  %v3705_v39 = vmul.f32 %v5675_v31, %v3658_v3  ;;  %s3716_s0 = sld [smem:[#allocation2 + $0x5d]] }
 0x253   : > { %v5678_v6 = vstv %s5666_s6  ;;  %v712_v23 = vmul.f32 %v5680_v26, %v674_v17  ;;  %v5681_v12 = vstv %s3357_s20  ;;  %v5682_v36 = vstv %s5641_s14  ;;  %s5683_s2 = sld [smem:[#allocation36_spill]]  ;;  %v671_v26 = vpop.permute.xlu2 %670 }
 0x254   : > { %5669 = vst [vmem:[#allocation162_spill] sm:$0xff] %v3688_v10  ;;  %v3710_v38 = vmul.f32 %v5678_v6, %v3658_v3  ;;  %v736_v0 = vmul.f32 %v5681_v12, %v674_v17  ;;  %v3721_v11 = vmul.f32 %v5682_v36, %v3658_v3  ;;  %v3726_v31 = vmul.f32 %v5685_v59, %v3658_v3  ;;  %s5698_s27 = sld [smem:[#allocation35_spill]] }
 0x255   : > { %5671 = vst [vmem:[#allocation163_spill] sm:$0xff] %v3693_v13  ;;  %v5687_v47 = vstv %s5667_s12  ;;  %v684_v34 = vrot.slane %v674_v17, 7  ;;  %v691_v12 = vrot.slane %v674_v17, 1  ;;  %v760_v33 = vmul.f32 %v5689_v55, %v674_v17 }
 0x256   : > { %5673 = vst [vmem:[#allocation164_spill] sm:$0xff] %v3698_v15  ;;  %v3731_v6 = vmul.f32 %v5687_v47, %v3658_v3  ;;  %v784_v21 = vmul.f32 %v5690_v50, %v674_v17  ;;  %v3739_v36 = vsel %vm230_vm7, %v671_v26, 0.0  ;;  %v5691_v8 = vstv %s5674_s18 }
 0x257   : > { %5677 = vst [vmem:[#allocation165_spill] sm:$0xff] %v3705_v39  ;;  %v706_v59 = vmul.f32 %v5691_v8, %v674_v17  ;;  %v5692_v19 = vstv %s5676_s16  ;;  %v685_v47 = vrot.slane %v3739_v36, 7  ;;  %v692_v10 = vrot.slane %v3739_v36, 1 }
 0x258   : > { %5679 = vst [vmem:[#allocation166_spill] sm:$0xff] %v3710_v38  ;;  %v730_v28 = vmul.f32 %v5692_v19, %v674_v17  ;;  %v714_v55 = vadd.f32 %v712_v23, %v3631_v9  ;;  %v738_v50 = vadd.f32 %v736_v0, %v3634_v14  ;;  %v5694_v38 = vstv %s3392_s24 }
 0x259   : > { %5684 = vst [vmem:[#allocation167_spill] sm:$0xff] %v3721_v11  ;;  %v3753_v8 = vmul.f32 %v5694_v38, %v674_v17  ;;  %v687_v19 = vsel %vm686_vm3, %v684_v34, %v685_v47  ;;  %v688_v15 = vsel %vm686_vm3, %v685_v47, %v684_v34  ;;  %v762_v0 = vadd.f32 %v760_v33, %v3637_v29 }
 0x25a   : > { %5686 = vst [vmem:[#allocation168_spill] sm:$0xff] %v3726_v31  ;;  %v5693_v31 = vstv %s5683_s2  ;;  %v689_v38 = vsel %vm232_vm2, %v688_v15, 0.0  ;;  %v5695_v34 = vstv %s3439_s7  ;;  %v5696_v33 = vstv %s3413_s5  ;;  %s5705_s5 = sld [smem:[#allocation37_spill]] }
 0x25b   : > { %5688 = vst [vmem:[#allocation169_spill] sm:$0xff] %v3731_v6  ;;  %v754_v26 = vmul.f32 %v5693_v31, %v674_v17  ;;  %v3763_v6 = vadd.f32 %v784_v21, %v3641_v41  ;;  %v695_v31 = vsel %vm693_vm4, %v692_v10, %v691_v12  ;;  %v724_v47 = vmul.f32 %v5695_v34, %v689_v38 }
 0x25c   : > { %v701_v21 = vmul.f32 %v5696_v33, %v687_v19  ;;  %v5697_v11 = vstv %s5650_s26  ;;  %v694_v17 = vsel %vm693_vm4, %v691_v12, %v692_v10  ;;  %v5699_v13 = vmov %v5696_v33  ;;  %s5740_s26 = sld [smem:[#allocation26_spill]] }
 0x25d   : > { %v713_v39 = vmul.f32 %v5697_v11, %v3739_v36  ;;  %v700_v5 = vmul.f32 %v5699_v13, %v689_v38  ;;  %v5700_v34 = vstv %s5674_s18  ;;  %v726_v23 = vadd.f32 %v724_v47, %v3634_v14  ;;  %s5711_s18 = sld [smem:[#allocation45_spill]] }
 0x25e   : > { %v707_v3 = vmul.f32 %v5700_v34, %v3739_v36  ;;  %v697_v33 = vsel %vm235_vm5, %v695_v31, 0.0  ;;  %v5701_v2 = vstv %s5676_s16  ;;  %v5702_v15 = vstv %s3357_s20  ;;  %s5715_s20 = sld [smem:[#allocation49_spill]] }
 0x25f   : > { %v731_v11 = vmul.f32 %v5701_v2, %v3739_v36  ;;  %v737_v7 = vmul.f32 %v5702_v15, %v3739_v36  ;;  %v5703_v10 = vstv %s5683_s2  ;;  %v5704_v13 = vstv %s3439_s7  ;;  %s3880_s7 = sld [smem:[#allocation2 + $0x8d]] }
 0x260   : > { %v755_v12 = vmul.f32 %v5703_v10, %v3739_v36  ;;  %v725_v18 = vmul.f32 %v5704_v13, %v687_v19  ;;  %v732_v34 = vadd.f32 %v730_v28, %v726_v23  ;;  %v5706_v47 = vstv %s3460_s9  ;;  %v1025_v10 = vpop.permute.xlu2 %1024  ;;  %s3894_s9 = sld [smem:[#allocation2 + $0x52]] }
 0x261   : > { %v748_v1 = vmul.f32 %v5706_v47, %v689_v38  ;;  %v5707_v62 = vmov %v5706_v47  ;;  %v703_v63 = vadd.f32 %v701_v21, %v3631_v9  ;;  %v715_v2 = vadd.f32 %v713_v39, %v3631_v9  ;;  %s3950_s16 = sld [smem:[#allocation2 + $0x5a]] }
 0x262   : > { %v749_v31 = vmul.f32 %v5707_v62, %v687_v19  ;;  %v5708_v43 = vstv %s5698_s27  ;;  %v5709_v15 = vstv %s3381_s3  ;;  %v702_v13 = vadd.f32 %v700_v5, %v3631_v9  ;;  %s5723_s3 = sld [smem:[#allocation53_spill]] }
 0x263   : > { %v718_v27 = vmul.f32 %v5708_v43, %v694_v17  ;;  %v761_v60 = vmul.f32 %v5709_v15, %v3739_v36  ;;  %v750_v28 = vadd.f32 %v748_v1, %v3637_v29  ;;  %v5710_v47 = vstv %s3480_s10  ;;  %s3906_s10 = sld [smem:[#allocation2 + $0x56]] }
 0x264   : > { %v751_v23 = vadd.f32 %v749_v31, %v3637_v29  ;;  %v772_v62 = vmul.f32 %v5710_v47, %v689_v38  ;;  %v5712_v4 = vmov %v5708_v43  ;;  %v739_v39 = vadd.f32 %v737_v7, %v3634_v14  ;;  %s5743_s27 = sld [smem:[#allocation32_spill]] }
 0x265   : > { %v719_v21 = vmul.f32 %v5712_v4, %v697_v33  ;;  %v5713_v43 = vstv %s5705_s5  ;;  %v5714_v15 = vmov %v5710_v47  ;;  %v727_v5 = vadd.f32 %v725_v18, %v3634_v14  ;;  %s4002_s2 = sld [smem:[#allocation2 + $0x20]] }
 0x266   : > { %v742_v56 = vmul.f32 %v5713_v43, %v694_v17  ;;  %v773_v40 = vmul.f32 %v5714_v15, %v687_v19  ;;  %v5716_v1 = vmov %v5713_v43  ;;  %v756_v31 = vadd.f32 %v754_v26, %v750_v28  ;;  %s4080_s5 = sld [smem:[#allocation2 + $0xb8]] }
 0x267   : > { %v743_v9 = vmul.f32 %v5716_v1, %v697_v33  ;;  %v757_v25 = vadd.f32 %v755_v12, %v751_v23  ;;  %v3828_v20 = vadd.f32 %v718_v27, %v714_v55  ;;  %v774_v38 = vadd.f32 %v772_v62, %v3641_v41 }
 0x268   : > { %v775_v4 = vadd.f32 %v773_v40, %v3641_v41  ;;  %v5717_v7 = vstv %s3402_s30  ;;  %v708_v43 = vadd.f32 %v706_v59, %v702_v13  ;;  %v709_v54 = vadd.f32 %v707_v3, %v703_v63  ;;  %v1027_v3 = vpop.permute.xlu0 %1026  ;;  %s5725_s30 = sld [smem:[#allocation143_spill]] }
 0x269   : > { %v785_v47 = vmul.f32 %v5717_v7, %v3739_v36  ;;  %v5718_v57 = vstv %s5711_s18  ;;  %v3839_v18 = vadd.f32 %v719_v21, %v715_v2  ;;  %v5720_v14 = vstv %s3392_s24  ;;  %s5724_s24 = sld [smem:[#allocation139_spill]] }
 0x26a   : > { %v766_v19 = vmul.f32 %v5718_v57, %v694_v17  ;;  %v5719_v15 = vmov %v5718_v57  ;;  %v779_v26 = vmul.f32 %v5720_v14, %v3739_v36  ;;  %v5721_v27 = vstv %s5715_s20  ;;  %s4093_s18 = sld [smem:[#allocation2 + $0x1]] }
 0x26b   : > { %v767_v42 = vmul.f32 %v5719_v15, %v697_v33  ;;  %v790_v55 = vmul.f32 %v5721_v27, %v694_v17  ;;  %v5722_v12 = vmov %v5721_v27  ;;  %v733_v23 = vadd.f32 %v731_v11, %v727_v5  ;;  %s4101_s20 = sld [smem:[#allocation2 + $0x2c]] }
 0x26c   : > { %v791_v28 = vmul.f32 %v5722_v12, %v697_v33  ;;  %v3848_v40 = vadd.f32 %v742_v56, %v738_v50  ;;  %v3850_v62 = vadd.f32 %v743_v9, %v739_v39  ;;  %v763_v63 = vadd.f32 %v761_v60, %v3637_v29 }
 0x26d   : > { %v780_v57 = vadd.f32 %v3753_v8, %v774_v38  ;;  %v781_v59 = vadd.f32 %v779_v26, %v775_v4  ;;  %v787_v2 = vadd.f32 %v785_v47, %v3641_v41  ;;  %v1030_v36 = vsel %vm230_vm7, %v1025_v10, 0.0  ;;  %v1035_v8 = vpop.permute.xlu2 %1034 }
 0x26e   : > { %v3857_v13 = vadd.f32 %v766_v19, %v762_v0  ;;  %v3859_v17 = vadd.f32 %v767_v42, %v763_v63  ;;  %v3862_v56 = vadd.f32 %v3092_v48, %v708_v43  ;;  %v3865_v50 = vadd.f32 %v3082_v44, %v709_v54 }
 0x26f   : > { %v3868_v60 = vadd.f32 %v790_v55, %v3763_v6  ;;  %v3870_v29 = vadd.f32 %v791_v28, %v787_v2  ;;  %v3873_v41 = vadd.f32 %v3094_v49, %v732_v34  ;;  %v1031_v42 = vsel %vm230_vm7, %v1027_v3, 0.0 }
 0x270   : > { %v3878_v48 = vadd.f32 %v3084_v45, %v733_v23  ;;  %v1046_v44 = vrot.slane %v1030_v36, 1  ;;  %v1041_v54 = vrot.slane %v1031_v42, 7  ;;  %v1047_v6 = vrot.slane %v1031_v42, 1 }
 0x271   : > { %v3883_v49 = vadd.f32 %v3096_v51, %v756_v31  ;;  %v3886_v0 = vadd.f32 %v3086_v46, %v757_v25  ;;  %v3889_v33 = vadd.f32 %v3098_v52, %v780_v57  ;;  %v3892_v45 = vadd.f32 %v3102_v53, %v781_v59 }
 0x272   : > { %v1040_v11 = vrot.slane %v1030_v36, 7  ;;  %v5726_v34 = vstv %s3504_s8  ;;  %v5728_v51 = vstv %s5723_s3  ;;  %v1049_v25 = vsel %vm693_vm4, %v1047_v6, %v1046_v44  ;;  %s5747_s8 = sld [smem:[#allocation160_spill]] }
 0x273   : > { %v3898_v10 = vmul.f32 %v5726_v34, %v1030_v36  ;;  %v3902_v21 = vmul.f32 %v5728_v51, %v1030_v36  ;;  %v5730_v46 = vstv %s5658_s21  ;;  %v5731_v53 = vstv %s5659_s28  ;;  %s3968_s21 = sld [smem:[#allocation2 + $0x5e]] }
 0x274   : > { %v3910_v52 = vmul.f32 %v5730_v46, %v1030_v36  ;;  %v3914_v39 = vmul.f32 %v5731_v53, %v1030_v36  ;;  %v5733_v5 = vstv %s5724_s24  ;;  %v5735_v9 = vstv %s5725_s30  ;;  %s4020_s28 = sld [smem:[#allocation2 + $0xb0]] }
 0x275   : > { %5727 = vst [vmem:[#allocation170_spill] sm:$0xff] %v3898_v10  ;;  %v3918_v1 = vmul.f32 %v5733_v5, %v1030_v36  ;;  %v3922_v31 = vmul.f32 %v5735_v9, %v1030_v36  ;;  %v5737_v38 = vstv %s5662_s1  ;;  %v5739_v7 = vstv %s3588_s17  ;;  %s4117_s3 = sld [smem:[#allocation2 + $0x5]] }
 0x276   : > { %5729 = vst [vmem:[#allocation171_spill] sm:$0xff] %v3902_v21  ;;  %v3926_v4 = vmul.f32 %v5737_v38, %v1030_v36  ;;  %v3930_v47 = vmul.f32 %v5739_v7, %v1030_v36  ;;  %v1043_v43 = vsel %vm686_vm3, %v1041_v54, %v1040_v11  ;;  %v1048_v19 = vsel %vm693_vm4, %v1046_v44, %v1047_v6  ;;  %s4132_s24 = sld [smem:[#allocation2 + $0xbc]] }
 0x277   : > { %5732 = vst [vmem:[#allocation172_spill] sm:$0xff] %v3914_v39  ;;  %v1051_v15 = vsel %vm235_vm5, %v1049_v25, 0.0  ;;  %v5742_v14 = vmov %v5726_v34  ;;  %v5744_v27 = vmov %v5728_v51  ;;  %v5745_v12 = vmov %v5730_v46  ;;  %s4141_s30 = sld [smem:[#allocation2 + $0x9]] }
 0x278   : > { %5734 = vst [vmem:[#allocation173_spill] sm:$0xff] %v3918_v1  ;;  %v3940_v26 = vmul.f32 %v5742_v14, %v1031_v42  ;;  %v3944_v55 = vmul.f32 %v5744_v27, %v1031_v42  ;;  %v3948_v28 = vmul.f32 %v5745_v12, %v1031_v42  ;;  %v3954_v23 = vsel %vm686_vm3, %v1040_v11, %v1041_v54 }
 0x279   : > { %5736 = vst [vmem:[#allocation174_spill] sm:$0xff] %v3922_v31  ;;  %v5746_v63 = vmov %v5731_v53  ;;  %v5748_v57 = vmov %v5733_v5  ;;  %v5749_v2 = vmov %v5735_v9  ;;  %v3972_v44 = vsel %vm232_vm2, %v1043_v43, 0.0 }
 0x27a   : > { %5738 = vst [vmem:[#allocation175_spill] sm:$0xff] %v3926_v4  ;;  %v3958_v3 = vmul.f32 %v5746_v63, %v1031_v42  ;;  %v3962_v59 = vmul.f32 %v5748_v57, %v1031_v42  ;;  %v3966_v36 = vmul.f32 %v5749_v2, %v1031_v42  ;;  %v5750_v54 = vstv %s5663_s25  ;;  %s4065_s25 = sld [smem:[#allocation2 + $0x28]] }
 0x27b   : > { %5741 = vst [vmem:[#allocation176_spill] sm:$0xff] %v3930_v47  ;;  %v3976_v6 = vmul.f32 %v5750_v54, %v1048_v19  ;;  %v5752_v11 = vstv %s5740_s26  ;;  %v3984_v51 = vsel %vm231_vm6, %v1035_v8, 0.0  ;;  %v5755_v25 = vmov %v5750_v54  ;;  %s4161_s26 = sld [smem:[#allocation2 + $0xd]] }
 0x27c   : > { %v3980_v34 = vmul.f32 %v5752_v11, %v1048_v19  ;;  %5754 = vst [vmem:[#allocation179_spill] sm:$0xff] %v3984_v51  ;;  %v3988_v46 = vmul.f32 %v5755_v25, %v1051_v15  ;;  %v5756_v53 = vmov %v5752_v11  ;;  %v5757_v9 = vstv %s5743_s27  ;;  %v1387_v11 = vpop.permute.xlu2 %1386  ;;  %s5814_s27 = sld [smem:[#allocation23_spill]] }
 0x27d   : > { %5751 = vst [vmem:[#allocation177_spill] sm:$0xff] %v3976_v6  ;;  %v3992_v5 = vmul.f32 %v5756_v53, %v1051_v15  ;;  %v3996_v38 = vmul.f32 %v5757_v9, %v1048_v19  ;;  %v5759_v7 = vmov %v5757_v9  ;;  %v5761_v14 = vstv %s5662_s1  ;;  %s4044_s1 = sld [smem:[#allocation2 + $0xb4]] }
 0x27e   : > { %5753 = vst [vmem:[#allocation178_spill] sm:$0xff] %v3980_v34  ;;  %v4000_v43 = vmul.f32 %v5759_v7, %v1051_v15  ;;  %v4006_v8 = vmul.f32 %v5761_v14, %v1031_v42  ;;  %v5762_v27 = vstv %s3588_s17  ;;  %v5763_v63 = vstv %s5747_s8  ;;  %s4026_s17 = sld [smem:[#allocation2 + $0x24]] }
 0x27f   : > { %5758 = vst [vmem:[#allocation180_spill] sm:$0xff] %v3996_v38  ;;  %v4010_v12 = vmul.f32 %v5762_v27, %v1031_v42  ;;  %v4014_v57 = vmul.f32 %v5763_v63, %v1048_v19  ;;  %v5765_v2 = vmov %v5763_v63  ;;  %v5767_v7 = vstv %s3654_s23  ;;  %s5819_s8 = sld [smem:[#allocation27_spill]] }
 0x280   : > { %5760 = vst [vmem:[#allocation181_spill] sm:$0xff] %v4000_v43  ;;  %v4018_v54 = vmul.f32 %v5765_v2, %v1051_v15  ;;  %v4032_v15 = vmul.f32 %v5767_v7, %v3984_v51  ;;  %v5769_v14 = vstv %s3663_s19  ;;  %v5771_v63 = vstv %s3669_s29 }
 0x281   : > { %5764 = vst [vmem:[#allocation182_spill] sm:$0xff] %v4014_v57  ;;  %v4037_v27 = vmul.f32 %v5769_v14, %v3984_v51  ;;  %v4042_v2 = vmul.f32 %v5771_v63, %v3984_v51  ;;  %v5773_v53 = vstv %s3676_s4  ;;  %v5775_v19 = vstv %s3682_s11 }
 0x282   : > { %5766 = vst [vmem:[#allocation183_spill] sm:$0xff] %v4018_v54  ;;  %v4049_v42 = vmul.f32 %v5773_v53, %v3984_v51  ;;  %v4054_v9 = vmul.f32 %v5775_v19, %v3984_v51  ;;  %v5777_v7 = vstv %s3700_s22  ;;  %v4063_v14 = vsel %vm231_vm6, %v1387_v11, 0.0 }
 0x283   : > { %5768 = vst [vmem:[#allocation184_spill] sm:$0xff] %v4032_v15  ;;  %v4059_v25 = vmul.f32 %v5777_v7, %v3984_v51  ;;  %v5780_v63 = vstv %s3716_s0  ;;  %v5782_v53 = vstv %s3880_s7  ;;  %v822_v7 = vadd.f32 %v3015_v24, %v3828_v20  ;;  %v5789_v20 = vld [vmem:[#allocation48_spill] sm:$0xff] }
 0x284   : > { %5770 = vst [vmem:[#allocation185_spill] sm:$0xff] %v4037_v27  ;;  %v4070_v27 = vmul.f32 %v5780_v63, %v3984_v51  ;;  %v4075_v19 = vmul.f32 %v5782_v53, %v3984_v51  ;;  %v4089_v63 = vadd.f32 %v3061_v32, %v3865_v50  ;;  %v846_v53 = vadd.f32 %v3027_v16, %v3848_v40  ;;  %v5788_v50 = vld [vmem:[#allocation43_spill] sm:$0xff] }
 0x285   : > { %5772 = vst [vmem:[#allocation186_spill] sm:$0xff] %v4042_v2  ;;  %v823_v11 = vadd.f32 %v3064_v37, %v3839_v18  ;;  %v5784_v32 = vstv %s3894_s9  ;;  %v5786_v16 = vstv %s3906_s10  ;;  %v847_v24 = vadd.f32 %v5788_v50, %v3850_v62  ;;  %v5796_v62 = vld [vmem:[#allocation38_spill] sm:$0xff] }
 0x286   : > { %5774 = vst [vmem:[#allocation187_spill] sm:$0xff] %v4049_v42  ;;  %v4111_v40 = vmul.f32 %v5786_v16, %v4063_v14  ;;  %v871_v42 = vadd.f32 %v5789_v20, %v3859_v17  ;;  %v5792_v18 = vstv %s3968_s21  ;;  %v5795_v16 = vld [vmem:[#allocation41_spill] sm:$0xff]  ;;  %v840_v17 = vadd.f32 %v5796_v62, %v3873_v41  ;;  %v5797_v20 = vld [vmem:[#allocation42_spill] sm:$0xff]  ;;  %v5802_v41 = vld [vmem:[#allocation44_spill] sm:$0xff] }
 0x287   : > { %5776 = vst [vmem:[#allocation188_spill] sm:$0xff] %v4054_v9  ;;  %v841_v50 = vadd.f32 %v5797_v20, %v3878_v48  ;;  %v865_v62 = vadd.f32 %v5802_v41, %v3886_v0  ;;  %v679_v0 = vpop.permute.xlu1 %678  ;;  %v963_v2 = vstv %s4065_s25  ;;  %v5813_v9 = vld [vmem:[#allocation169_spill] sm:$0xff]  ;;  %v5820_v47 = vstv %s5665_s13  ;;  %s5829_s13 = sld [smem:[#allocation28_spill]] }
 0x288   : > { %5778 = vst [vmem:[#allocation189_spill] sm:$0xff] %v4059_v25  ;;  %v4085_v25 = vadd.f32 %v3012_v22, %v3862_v56  ;;  %v870_v22 = vadd.f32 %v3038_v30, %v3857_v13  ;;  %v4106_v56 = vmul.f32 %v5784_v32, %v4063_v14  ;;  %v5790_v30 = vstv %s3950_s16  ;;  %v5794_v32 = vld [vmem:[#allocation46_spill] sm:$0xff]  ;;  %s4334_s25 = sld [smem:[#allocation2 + $0x25]] }
 0x289   : > { %5779 = vst [vmem:[#allocation190_spill] sm:$0xff] %v4063_v14  ;;  %v4122_v37 = vmul.f32 %v5790_v30, %v4063_v14  ;;  %v4127_v13 = vmul.f32 %v5792_v18, %v4063_v14  ;;  %v5798_v30 = vld [vmem:[#allocation47_spill] sm:$0xff]  ;;  %v5821_v31 = vstv %s5814_s27  ;;  %v5822_v1 = vstv %s5635_s15  ;;  %s4246_s15 = sld [smem:[#allocation2 + $0x32]] }
 0x28a   : > { %5781 = vst [vmem:[#allocation191_spill] sm:$0xff] %v4070_v27  ;;  %v5812_v27 = vld [vmem:[#allocation167_spill] sm:$0xff]  ;;  %v5827_v43 = vstv %s4020_s28  ;;  %s4677_s27 = sld [smem:[#allocation2 + $0x92]] }
 0x28b   : > { %5783 = vst [vmem:[#allocation192_spill] sm:$0xff] %v4075_v19  ;;  %v5799_v19 = vld [vmem:[#allocation56_spill] sm:$0xff] }
 0x28c   : > { %5785 = vst [vmem:[#allocation193_spill] sm:$0xff] %v4106_v56  ;;  %v828_v56 = vadd.f32 %v5794_v32, %v822_v7  ;;  %v895_v18 = vadd.f32 %v5799_v19, %v3870_v29  ;;  %v5800_v7 = vld [vmem:[#allocation50_spill] sm:$0xff]  ;;  %v5801_v32 = vld [vmem:[#allocation39_spill] sm:$0xff] }
 0x28d   : > { %5787 = vst [vmem:[#allocation194_spill] sm:$0xff] %v4111_v40  ;;  %v894_v40 = vadd.f32 %v5795_v16, %v3868_v60  ;;  %v829_v60 = vadd.f32 %v5800_v7, %v823_v11  ;;  %v864_v16 = vadd.f32 %v5801_v32, %v3883_v49  ;;  %v5806_v19 = vld [vmem:[#allocation40_spill] sm:$0xff]  ;;  %v5809_v7 = vld [vmem:[#allocation163_spill] sm:$0xff] }
 0x28e   : > { %5791 = vst [vmem:[#allocation43_spill] sm:$0xff] %v4122_v37  ;;  %v852_v37 = vadd.f32 %v5798_v30, %v846_v53  ;;  %v5804_v53 = vld [vmem:[#allocation51_spill] sm:$0xff]  ;;  %v5805_v30 = vld [vmem:[#allocation54_spill] sm:$0xff]  ;;  %v4155_v14 = vadd.f32 %v5806_v19, %v3889_v33  ;;  %v5807_v11 = vld [vmem:[#allocation55_spill] sm:$0xff]  ;;  %v1053_v19 = vstv %s4093_s18  ;;  %s4348_s18 = sld [smem:[#allocation2 + $0x29]] }
 0x28f   : > { %5793 = vst [vmem:[#allocation48_spill] sm:$0xff] %v4127_v13  ;;  %v5803_v13 = vld [vmem:[#allocation52_spill] sm:$0xff]  ;;  %v853_v20 = vadd.f32 %v5804_v53, %v847_v24  ;;  %v4151_v29 = vadd.f32 %v5805_v30, %v871_v42  ;;  %v4159_v49 = vadd.f32 %v5807_v11, %v3892_v45  ;;  %v915_v24 = vstv %s4002_s2  ;;  %v5810_v33 = vld [vmem:[#allocation58_spill] sm:$0xff]  ;;  %v5811_v30 = vld [vmem:[#allocation165_spill] sm:$0xff]  ;;  %s4275_s2 = sld [smem:[#allocation2 + $0x3a]] }
 0x290   : > { %v876_v48 = vadd.f32 %v5803_v13, %v870_v22  ;;  %v5808_v22 = vld [vmem:[#allocation57_spill] sm:$0xff]  ;;  %v4166_v42 = vadd.f32 %v5809_v7, %v828_v56  ;;  %v4170_v41 = vadd.f32 %v5810_v33, %v895_v18  ;;  %v939_v53 = vstv %s4026_s17  ;;  %s4288_s17 = sld [smem:[#allocation2 + $0x3e]] }
 0x291   : > { %v900_v13 = vadd.f32 %v5808_v22, %v894_v40  ;;  %v4174_v45 = vadd.f32 %v5811_v30, %v852_v37  ;;  %v683_v56 = vsel %vm231_vm6, %v679_v0, 0.0  ;;  %v1077_v7 = vstv %s4117_s3  ;;  %v5815_v0 = vld [vmem:[#allocation161_spill] sm:$0xff]  ;;  %s4454_s3 = sld [smem:[#allocation2 + $0x6]] }
 0x292   : > { %v4180_v40 = vadd.f32 %v5812_v27, %v876_v48  ;;  %v903_v32 = vrot.slane %v683_v56, 7  ;;  %v909_v18 = vrot.slane %v683_v56, 1  ;;  %v987_v33 = vstv %s4101_s20  ;;  %s4354_s20 = sld [smem:[#allocation2 + $0x2d]] }
 0x293   : > { %v4188_v15 = vadd.f32 %v5813_v9, %v900_v13  ;;  %v4192_v30 = vmul.f32 %v1053_v19, %v3972_v44  ;;  %v1055_v27 = vmul.f32 %v1053_v19, %v3954_v23  ;;  %v1101_v48 = vstv %s4141_s30  ;;  %s4650_s30 = sld [smem:[#allocation2 + $0x8b]] }
 0x294   : > { %v5816_v22 = vrot.slane %v5815_v0, 7  ;;  %v4205_v13 = vmul.f32 %v1077_v7, %v3972_v44  ;;  %v5818_v19 = vrot.slane %v5815_v0, 1  ;;  %v923_v6 = vmul.f32 %v5820_v47, %v683_v56 }
 0x295   : > { %v929_v10 = vmul.f32 %v5821_v31, %v683_v56  ;;  %v4223_v39 = vmul.f32 %v1101_v48, %v3972_v44  ;;  %v5823_v47 = vstv %s4161_s26 }
 0x296   : > { %v904_v11 = vsel %vm686_vm3, %v5816_v22, %v903_v32  ;;  %v5817_v51 = vmov %v5816_v22  ;;  %v911_v57 = vsel %vm693_vm4, %v909_v18, %v5818_v19  ;;  %v1079_v22 = vmul.f32 %v1077_v7, %v3954_v23 }
 0x297   : > { %v905_v9 = vsel %vm686_vm3, %v903_v32, %v5817_v51  ;;  %v917_v38 = vmul.f32 %v915_v24, %v904_v11  ;;  %v941_v4 = vmul.f32 %v939_v53, %v904_v11  ;;  %v1103_v19 = vmul.f32 %v1101_v48, %v3954_v23  ;;  %v5826_v48 = vld [vmem:[#allocation164_spill] sm:$0xff] }
 0x298   : > { %v906_v37 = vsel %vm232_vm2, %v905_v9, 0.0  ;;  %v953_v9 = vmul.f32 %v5822_v1, %v683_v56  ;;  %v913_v7 = vsel %vm235_vm5, %v911_v57, 0.0  ;;  %v5825_v1 = vrot.slane %v5815_v0, 1 }
 0x299   : > { %v940_v51 = vmul.f32 %v939_v53, %v906_v37  ;;  %v919_v32 = vadd.f32 %v917_v38, %v4089_v63  ;;  %v1127_v38 = vmul.f32 %v5823_v47, %v3954_v23  ;;  %v943_v31 = vadd.f32 %v941_v4, %v841_v50 }
 0x29a   : > { %v5824_v53 = vstv %s5819_s8  ;;  %v910_v35 = vsel %vm693_vm4, %v5825_v1, %v909_v18  ;;  %v964_v61 = vmul.f32 %v963_v2, %v906_v37  ;;  %v965_v57 = vmul.f32 %v963_v2, %v904_v11  ;;  %s4685_s8 = sld [smem:[#allocation2 + $0xb6]] }
 0x29b   : > { %v942_v34 = vadd.f32 %v940_v51, %v840_v17  ;;  %v925_v63 = vadd.f32 %v923_v6, %v919_v32  ;;  %v947_v21 = vmul.f32 %v5824_v53, %v683_v56  ;;  %v916_v17 = vmul.f32 %v915_v24, %v906_v37  ;;  %v5832_v24 = vld [vmem:[#allocation166_spill] sm:$0xff] }
 0x29c   : > { %v931_v51 = vadd.f32 %v929_v10, %v829_v60  ;;  %v935_v23 = vmul.f32 %v5827_v43, %v913_v7  ;;  %v955_v6 = vadd.f32 %v953_v9, %v853_v20  ;;  %v966_v32 = vadd.f32 %v964_v61, %v864_v16 }
 0x29d   : > { %v948_v54 = vadd.f32 %v5826_v48, %v942_v34  ;;  %v967_v4 = vadd.f32 %v965_v57, %v865_v62  ;;  %v5828_v50 = vstv %s5666_s6  ;;  %v5830_v0 = vstv %s5641_s14  ;;  %s4253_s6 = sld [smem:[#allocation2 + $0x62]] }
 0x29e   : > { %v971_v47 = vmul.f32 %v5828_v50, %v683_v56  ;;  %v977_v53 = vmul.f32 %v5830_v0, %v683_v56  ;;  %v949_v58 = vadd.f32 %v947_v21, %v943_v31  ;;  %v5831_v18 = vstv %s4044_s1  ;;  %v5837_v50 = vld [vmem:[#allocation168_spill] sm:$0xff]  ;;  %s4265_s14 = sld [smem:[#allocation2 + $0x36]] }
 0x29f   : > { %v959_v34 = vmul.f32 %v5831_v18, %v913_v7  ;;  %v988_v1 = vmul.f32 %v987_v33, %v906_v37  ;;  %v989_v2 = vmul.f32 %v987_v33, %v904_v11  ;;  %v972_v10 = vadd.f32 %v5832_v24, %v966_v32  ;;  %s4294_s1 = sld [smem:[#allocation2 + $0x6e]] }
 0x2a0   : > { %v973_v60 = vadd.f32 %v971_v47, %v967_v4  ;;  %v5833_v43 = vstv %s4080_s5  ;;  %v5834_v61 = vstv %s5667_s12  ;;  %v918_v62 = vadd.f32 %v916_v17, %v4085_v25  ;;  %s4270_s12 = sld [smem:[#allocation2 + $0x66]] }
 0x2a1   : > { %v983_v20 = vmul.f32 %v5833_v43, %v913_v7  ;;  %v1001_v16 = vmul.f32 %v5834_v61, %v683_v56  ;;  %v990_v21 = vadd.f32 %v988_v1, %v4155_v14  ;;  %v991_v9 = vadd.f32 %v989_v2, %v4159_v49  ;;  %s4342_s5 = sld [smem:[#allocation2 + $0x21]] }
 0x2a2   : > { %v5835_v37 = vstv %s5829_s13  ;;  %v937_v33 = vadd.f32 %v935_v23, %v931_v51  ;;  %v979_v31 = vadd.f32 %v977_v53, %v4151_v29  ;;  %v5836_v48 = vstv %s4132_s24  ;;  %s4632_s24 = sld [smem:[#allocation2 + $0x9b]] }
 0x2a3   : > { %v995_v11 = vmul.f32 %v5835_v37, %v683_v56  ;;  %v1007_v57 = vmul.f32 %v5836_v48, %v913_v7  ;;  %v1057_v32 = vadd.f32 %v1055_v27, %v925_v63  ;;  %v961_v4 = vadd.f32 %v959_v34, %v955_v6  ;;  %v5839_v27 = vld [vmem:[#allocation162_spill] sm:$0xff]  ;;  %v5850_v37 = vld [vmem:[#allocation171_spill] sm:$0xff]  ;;  %s4698_s13 = sld [smem:[#allocation2 + $0x67]] }
 0x2a4   : > { %v996_v47 = vadd.f32 %v5837_v50, %v990_v21  ;;  %v1003_v25 = vadd.f32 %v1001_v16, %v4170_v41  ;;  %v5838_v14 = vstv %s4020_s28  ;;  %v985_v56 = vadd.f32 %v983_v20, %v979_v31  ;;  %s4282_s28 = sld [smem:[#allocation2 + $0x6a]]  ;;  %v1379_v20 = vpop.permute.xlu0 %1378  ;;  %v5847_v21 = vld [vmem:[#allocation183_spill] sm:$0xff]  ;;  %v5852_v50 = vld [vmem:[#allocation172_spill] sm:$0xff] }
 0x2a5   : > { %v997_v0 = vadd.f32 %v995_v11, %v991_v9  ;;  %v934_v49 = vmul.f32 %v5838_v14, %v910_v35  ;;  %v1063_v17 = vadd.f32 %v3940_v26, %v1057_v32  ;;  %v1081_v29 = vadd.f32 %v1079_v22, %v949_v58  ;;  %v5848_v9 = vld [vmem:[#allocation64_spill] sm:$0xff]  ;;  %v5854_v14 = vld [vmem:[#allocation175_spill] sm:$0xff] }
 0x2a6   : > { %v924_v7 = vadd.f32 %v5839_v27, %v918_v62  ;;  %v5840_v63 = vmov %v5831_v18  ;;  %v1009_v23 = vadd.f32 %v1007_v57, %v1003_v25  ;;  %v1105_v6 = vadd.f32 %v1103_v19, %v973_v60  ;;  %v5855_v27 = vld [vmem:[#allocation170_spill] sm:$0xff] }
 0x2a7   : > { %v958_v51 = vmul.f32 %v5840_v63, %v910_v35  ;;  %v5841_v41 = vmov %v5833_v43  ;;  %v5842_v18 = vmov %v5836_v48  ;;  %v1069_v26 = vadd.f32 %v3944_v55, %v937_v33  ;;  %v5851_v33 = vld [vmem:[#allocation65_spill] sm:$0xff] }
 0x2a8   : > { %v982_v53 = vmul.f32 %v5841_v41, %v910_v35  ;;  %v1006_v34 = vmul.f32 %v5842_v18, %v910_v35  ;;  %v1129_v1 = vadd.f32 %v1127_v38, %v997_v0  ;;  %v1080_v58 = vadd.f32 %v4205_v13, %v948_v54  ;;  %v5853_v0 = vld [vmem:[#allocation173_spill] sm:$0xff]  ;;  %v5856_v63 = vld [vmem:[#allocation174_spill] sm:$0xff] }
 0x2a9   : > { %v1093_v22 = vadd.f32 %v3958_v3, %v961_v4  ;;  %v1111_v2 = vadd.f32 %v3962_v59, %v1105_v6  ;;  %v1413_v24 = vstv %s4246_s15  ;;  %v1087_v19 = vadd.f32 %v3948_v28, %v1081_v29  ;;  %s4703_s15 = sld [smem:[#allocation2 + $0x87]] }
 0x2aa   : > { %v1117_v60 = vadd.f32 %v3966_v36, %v985_v56  ;;  %v1135_v35 = vadd.f32 %v4006_v8, %v1129_v1  ;;  %v1419_v43 = vstv %s4253_s6  ;;  %v5843_v55 = vstv %s4161_s26  ;;  %v1033_v56 = vpop.permute.xlu1 %1032  ;;  %v5859_v1 = vld [vmem:[#allocation176_spill] sm:$0xff]  ;;  %s4663_s26 = sld [smem:[#allocation2 + $0xbb]] }
 0x2ab   : > { %v1126_v38 = vmul.f32 %v5843_v55, %v3972_v44  ;;  %v936_v3 = vadd.f32 %v934_v49, %v4166_v42  ;;  %v960_v59 = vadd.f32 %v958_v51, %v4174_v45  ;;  %v1141_v54 = vadd.f32 %v4010_v12, %v1009_v23  ;;  %v5862_v55 = vld [vmem:[#allocation80_spill] sm:$0xff]  ;;  %s4717_s6 = sld [smem:[#allocation2 + $0x97]] }
 0x2ac   : > { %v984_v13 = vadd.f32 %v982_v53, %v4180_v40  ;;  %v1008_v28 = vadd.f32 %v1006_v34, %v4188_v15  ;;  %v1056_v36 = vadd.f32 %v4192_v30, %v924_v7  ;;  %v4306_v8 = vadd.f32 %v3988_v46, %v1069_v26  ;;  %v5844_v40 = vld [vmem:[#allocation181_spill] sm:$0xff]  ;;  %v5845_v30 = vld [vmem:[#allocation62_spill] sm:$0xff]  ;;  %v5846_v46 = vld [vmem:[#allocation63_spill] sm:$0xff] }
 0x2ad   : > { %v4309_v44 = vadd.f32 %v3992_v5, %v1093_v22  ;;  %v1104_v42 = vadd.f32 %v4223_v39, %v972_v10  ;;  %v1128_v45 = vadd.f32 %v1126_v38, %v996_v47  ;;  %v1086_v12 = vadd.f32 %v3910_v52, %v1080_v58  ;;  %v5857_v53 = vld [vmem:[#allocation177_spill] sm:$0xff] }
 0x2ae   : > { %v4314_v15 = vadd.f32 %v5844_v40, %v1117_v60  ;;  %v4317_v61 = vadd.f32 %v5845_v30, %v1063_v17  ;;  %v4320_v16 = vadd.f32 %v5846_v46, %v1087_v19  ;;  %v1437_v62 = vstv %s4265_s14  ;;  %v5861_v60 = vld [vmem:[#allocation178_spill] sm:$0xff]  ;;  %v5867_v40 = vld [vmem:[#allocation76_spill] sm:$0xff]  ;;  %v5868_v46 = vld [vmem:[#allocation86_spill] sm:$0xff]  ;;  %s4725_s14 = sld [smem:[#allocation2 + $0xb7]] }
 0x2af   : > { %v4324_v5 = vadd.f32 %v5847_v21, %v1141_v54  ;;  %v4327_v39 = vadd.f32 %v5848_v9, %v1111_v2  ;;  %v4331_v52 = vsel %vm230_vm7, %v1379_v20, 0.0  ;;  %v1068_v11 = vadd.f32 %v5850_v37, %v936_v3  ;;  %v5866_v20 = vld [vmem:[#allocation60_spill] sm:$0xff]  ;;  %v5869_v9 = vld [vmem:[#allocation182_spill] sm:$0xff] }
 0x2b0   : > { %v4337_v31 = vadd.f32 %v5851_v33, %v1135_v35  ;;  %v5417_v48 = vstv %s4270_s12  ;;  %v1461_v57 = vstv %s4275_s2  ;;  %v5416_v32 = vstv %s4282_s28  ;;  %s4759_s2 = sld [smem:[#allocation2 + $0xb2]] }
 0x2b1   : > { %v1485_v4 = vstv %s4288_s17  ;;  %v1092_v47 = vadd.f32 %v5852_v50, %v960_v59  ;;  %v1110_v25 = vadd.f32 %v5853_v0, %v1104_v42  ;;  %v1134_v49 = vadd.f32 %v5854_v14, %v1128_v45  ;;  %v5864_v59 = vld [vmem:[#allocation180_spill] sm:$0xff]  ;;  %v5871_v50 = vld [vmem:[#allocation179_spill] sm:$0xff]  ;;  %s4778_s17 = sld [smem:[#allocation2 + $0x93]] }
 0x2b2   : > { %v5415_v17 = vstv %s4294_s1  ;;  %v1394_v29 = vrot.slane %v4331_v52, 7  ;;  %v1062_v7 = vadd.f32 %v5855_v27, %v1056_v36  ;;  %v1116_v51 = vadd.f32 %v5856_v63, %v984_v13  ;;  %v5865_v13 = vld [vmem:[#allocation83_spill] sm:$0xff]  ;;  %v5874_v14 = vld [vmem:[#allocation66_spill] sm:$0xff]  ;;  %v5875_v63 = vld [vmem:[#allocation68_spill] sm:$0xff] }
 0x2b3   : > { %v1400_v23 = vrot.slane %v4331_v52, 1  ;;  %v4360_v6 = vmul.f32 %v1413_v24, %v4331_v52  ;;  %v4365_v41 = vmul.f32 %v1419_v43, %v4331_v52  ;;  %v1074_v18 = vadd.f32 %v5857_v53, %v1068_v11  ;;  %v5870_v11 = vld [vmem:[#allocation61_spill] sm:$0xff] }
 0x2b4   : > { %v4371_v34 = vmul.f32 %v1437_v62, %v4331_v52  ;;  %v4376_v26 = vmul.f32 %v5417_v48, %v4331_v52  ;;  %v1140_v58 = vadd.f32 %v5859_v1, %v1008_v28  ;;  %v4381_v22 = vsel %vm231_vm6, %v1033_v56, 0.0 }
 0x2b5   : > { %v4386_v2 = vmul.f32 %v1461_v57, %v4331_v52  ;;  %v4391_v19 = vmul.f32 %v5416_v32, %v4331_v52  ;;  %v1098_v35 = vadd.f32 %v5861_v60, %v1092_v47  ;;  %v1188_v38 = vadd.f32 %v5862_v55, %v1086_v12  ;;  %v5877_v60 = vld [vmem:[#allocation59_spill] sm:$0xff]  ;;  %v1735_v32 = vpop.permute.xlu2 %1734 }
 0x2b6   : > { %5858 = vst [vmem:[#allocation46_spill] sm:$0xff] %v4371_v34  ;;  %v4398_v3 = vmul.f32 %v1485_v4, %v4331_v52  ;;  %v1122_v54 = vadd.f32 %v5864_v59, %v1116_v51  ;;  %v1212_v28 = vadd.f32 %v5865_v13, %v1110_v25  ;;  %v1256_v36 = vrot.slane %v4381_v22, 7  ;;  %v5879_v13 = vld [vmem:[#allocation69_spill] sm:$0xff] }
 0x2b7   : > { %5860 = vst [vmem:[#allocation41_spill] sm:$0xff] %v4386_v2  ;;  %v1176_v42 = vadd.f32 %v5866_v20, %v1074_v18  ;;  %v1293_v45 = vstv %s4334_s25  ;;  %v1164_v30 = vadd.f32 %v5867_v40, %v1062_v7  ;;  %v1236_v21 = vadd.f32 %v5868_v46, %v1134_v49  ;;  %v5876_v18 = vld [vmem:[#allocation67_spill] sm:$0xff]  ;;  %v5880_v40 = vld [vmem:[#allocation70_spill] sm:$0xff]  ;;  %s4793_s25 = sld [smem:[#allocation2 + $0xb3]] }
 0x2b8   : > { %5863 = vst [vmem:[#allocation38_spill] sm:$0xff] %v4398_v3  ;;  %v4410_v12 = vmul.f32 %v5415_v17, %v4331_v52  ;;  %v1146_v37 = vadd.f32 %v5869_v9, %v1140_v58  ;;  %v1194_v33 = vadd.f32 %v5870_v11, %v1188_v38  ;;  %v5872_v47 = vrot.slane %v5871_v50, 7  ;;  %v5878_v38 = vld [vmem:[#allocation77_spill] sm:$0xff] }
 0x2b9   : > { %v1200_v56 = vadd.f32 %v5874_v14, %v1098_v35  ;;  %v1269_v27 = vstv %s4342_s5  ;;  %v1317_v7 = vstv %s4348_s18  ;;  %v1224_v51 = vadd.f32 %v5875_v63, %v1122_v54  ;;  %v5884_v63 = vld [vmem:[#allocation84_spill] sm:$0xff]  ;;  %s5960_s5 = smov 32   ;;  %s4858_s18 = sld [smem:[#allocation2 + $0xbd]] }
 0x2ba   : > { %v1259_v25 = vsel %vm686_vm3, %v5872_v47, %v1256_v36  ;;  %v1341_v53 = vstv %s4354_s20  ;;  %v1218_v1 = vadd.f32 %v5876_v18, %v1212_v28  ;;  %v1170_v55 = vadd.f32 %v5877_v60, %v1164_v30  ;;  %s4878_s20 = sld [smem:[#allocation2 + $0x9e]] }
 0x2bb   : > { %v1260_v49 = vsel %vm232_vm2, %v1259_v25, 0.0  ;;  %v1182_v59 = vadd.f32 %v5878_v38, %v1176_v42  ;;  %v1242_v20 = vadd.f32 %v5879_v13, %v1236_v21  ;;  %v1262_v35 = vrot.slane %v4381_v22, 1  ;;  %v5882_v25 = vld [vmem:[#allocation81_spill] sm:$0xff] }
 0x2bc   : > { %v1294_v58 = vmul.f32 %v1293_v45, %v1260_v49  ;;  %v1248_v46 = vadd.f32 %v5880_v40, %v1146_v37  ;;  %v5881_v11 = vstv %s3669_s29  ;;  %v1318_v47 = vmul.f32 %v1317_v7, %v1260_v49  ;;  %s4445_s29 = sld [smem:[#allocation2 + $0x2]]  ;;  %v5889_v40 = vld [vmem:[#allocation89_spill] sm:$0xff] }
 0x2bd   : > { %v1300_v54 = vmul.f32 %v5881_v11, %v4381_v22  ;;  %v1206_v28 = vadd.f32 %v5882_v25, %v1200_v56  ;;  %v5883_v14 = vrot.slane %v5871_v50, 7  ;;  %v1270_v30 = vmul.f32 %v1269_v27, %v1260_v49  ;;  %v1381_v25 = vpop.permute.xlu1 %1380 }
 0x2be   : > { %v1296_v9 = vadd.f32 %v1294_v58, %v1194_v33  ;;  %v1342_v21 = vmul.f32 %v1341_v53, %v1260_v49  ;;  %v1230_v18 = vadd.f32 %v5884_v63, %v1224_v51  ;;  %v1320_v33 = vadd.f32 %v1318_v47, %v1218_v1 }
 0x2bf   : > { %v1258_v42 = vsel %vm686_vm3, %v1256_v36, %v5883_v14  ;;  %v5886_v58 = vstv %s3682_s11  ;;  %v5887_v56 = vrot.slane %v5871_v50, 1  ;;  %v1272_v38 = vadd.f32 %v1270_v30, %v1170_v55  ;;  %s4462_s11 = sld [smem:[#allocation2 + $0xa]] }
 0x2c0   : > { %v4440_v37 = vadd.f32 %v1300_v54, %v1296_v9  ;;  %v1324_v60 = vmul.f32 %v5886_v58, %v4381_v22  ;;  %v1344_v49 = vadd.f32 %v1342_v21, %v1242_v20  ;;  %v5888_v51 = vstv %s3716_s0  ;;  %s4554_s0 = sld [smem:[#allocation2 + $0x8a]] }
 0x2c1   : > { %v1265_v36 = vsel %vm693_vm4, %v5887_v56, %v1262_v35  ;;  %v1348_v13 = vmul.f32 %v5888_v51, %v4381_v22  ;;  %v1254_v1 = vadd.f32 %v5889_v40, %v1248_v46  ;;  %v1271_v9 = vmul.f32 %v1269_v27, %v1258_v42  ;;  %v1389_v27 = vpop.permute.xlu0 %1388 }
 0x2c2   : > { %5885 = vst [vmem:[#allocation42_spill] sm:$0xff] %v4440_v37  ;;  %v5890_v11 = vstv %s3663_s19  ;;  %v4460_v47 = vadd.f32 %v1324_v60, %v1320_v33  ;;  %v5892_v14 = vstv %s3654_s23  ;;  %v5893_v20 = vstv %s3676_s4  ;;  %s4487_s4 = sld [smem:[#allocation2 + $0xe]]  ;;  %v5947_v37 = vld [vmem:[#allocation79_spill] sm:$0xff] }
 0x2c3   : > { %v1282_v54 = vmul.f32 %v5890_v11, %v4381_v22  ;;  %v1276_v55 = vmul.f32 %v5892_v14, %v4381_v22  ;;  %v1306_v30 = vmul.f32 %v5893_v20, %v4381_v22  ;;  %v5894_v21 = vstv %s3700_s22  ;;  %s4534_s23 = sld [smem:[#allocation2 + $0xb9]] }
 0x2c4   : > { %5891 = vst [vmem:[#allocation47_spill] sm:$0xff] %v4460_v47  ;;  %v1330_v63 = vmul.f32 %v5894_v21, %v4381_v22  ;;  %v4473_v46 = vadd.f32 %v1348_v13, %v1344_v49  ;;  %v5896_v58 = vmov %v5887_v56  ;;  %v4483_v56 = vsel %vm235_vm5, %v1265_v36, 0.0  ;;  %v5898_v36 = vld [vmem:[#allocation71_spill] sm:$0xff]  ;;  %s4538_s19 = sld [smem:[#allocation2 + $0x9a]] }
 0x2c5   : > { %v4479_v33 = vsel %vm693_vm4, %v1262_v35, %v5896_v58  ;;  %v4485_v51 = vadd.f32 %v1282_v54, %v1182_v59  ;;  %v1295_v40 = vmul.f32 %v1293_v45, %v1258_v42  ;;  %v4489_v11 = vadd.f32 %v1276_v55, %v1272_v38  ;;  %v5899_v45 = vld [vmem:[#allocation73_spill] sm:$0xff]  ;;  %v5901_v55 = vld [vmem:[#allocation75_spill] sm:$0xff]  ;;  %s4564_s22 = sld [smem:[#allocation2 + $0x86]] }
 0x2c6   : > { %5895 = vst [vmem:[#allocation56_spill] sm:$0xff] %v4473_v46  ;;  %v4491_v49 = vadd.f32 %v1306_v30, %v1206_v28  ;;  %v1319_v50 = vmul.f32 %v1317_v7, %v1258_v42  ;;  %v4493_v13 = vadd.f32 %v1330_v63, %v1230_v18  ;;  %v1343_v35 = vmul.f32 %v1341_v53, %v1258_v42  ;;  %v5902_v18 = vld [vmem:[#allocation87_spill] sm:$0xff] }
 0x2c7   : > { %v4497_v14 = vsel %vm231_vm6, %v1389_v27, 0.0  ;;  %v1171_v59 = vadd.f32 %v5898_v36, %v4317_v61  ;;  %v1195_v54 = vadd.f32 %v5899_v45, %v4320_v16  ;;  %v5900_v38 = vstv %s3880_s7  ;;  %v5903_v58 = vld [vmem:[#allocation184_spill] sm:$0xff]  ;;  %v5907_v45 = vld [vmem:[#allocation191_spill] sm:$0xff]  ;;  %s4574_s7 = sld [smem:[#allocation2 + $0xb5]] }
 0x2c8   : > { %v1354_v28 = vmul.f32 %v5900_v38, %v4381_v22  ;;  %v1219_v7 = vadd.f32 %v5901_v55, %v4327_v39  ;;  %v1243_v53 = vadd.f32 %v5902_v18, %v4337_v31  ;;  %v4512_v42 = vsel %vm230_vm7, %v1381_v25, 0.0  ;;  %v5908_v55 = vld [vmem:[#allocation186_spill] sm:$0xff] }
 0x2c9   : > { %v1407_v20 = vstv %s4445_s29  ;;  %v1273_v30 = vadd.f32 %v1271_v9, %v1171_v59  ;;  %v1297_v61 = vadd.f32 %v1295_v40, %v1195_v54  ;;  %v1395_v16 = vrot.slane %v4512_v42, 7  ;;  %s4915_s29 = sld [smem:[#allocation2 + $0x8e]] }
 0x2ca   : > { %v1611_v21 = vrot.slane %v4497_v14, 7  ;;  %v1431_v22 = vstv %s4454_s3  ;;  %v1321_v63 = vadd.f32 %v1319_v50, %v1219_v7  ;;  %v1345_v27 = vadd.f32 %v1343_v35, %v1243_v53  ;;  %v5906_v50 = vld [vmem:[#allocation188_spill] sm:$0xff]  ;;  %s4920_s3 = sld [smem:[#allocation2 + $0xbe]] }
 0x2cb   : > { %v1455_v31 = vstv %s4462_s11  ;;  %v1279_v36 = vadd.f32 %v5903_v58, %v1273_v30  ;;  %v1396_v9 = vsel %vm686_vm3, %v1394_v29, %v1395_v16  ;;  %v4525_v25 = vadd.f32 %v1354_v28, %v1254_v1  ;;  %v1733_v1 = vpop.permute.xlu1 %1732  ;;  %s4932_s11 = sld [smem:[#allocation2 + $0x6f]] }
 0x2cc   : > { %v5904_v40 = vstv %s3894_s9  ;;  %v1327_v35 = vadd.f32 %v5906_v50, %v1321_v63  ;;  %v1351_v54 = vadd.f32 %v5907_v45, %v1345_v27  ;;  %v1479_v38 = vstv %s4487_s4  ;;  %s4584_s9 = sld [smem:[#allocation2 + $0xba]] }
 0x2cd   : > { %v4530_v59 = vmul.f32 %v5904_v40, %v4497_v14  ;;  %v1303_v7 = vadd.f32 %v5908_v55, %v1297_v61  ;;  %v1409_v18 = vmul.f32 %v1407_v20, %v1396_v9  ;;  %v1433_v53 = vmul.f32 %v1431_v22, %v1396_v9  ;;  %v5912_v40 = vld [vmem:[#allocation190_spill] sm:$0xff]  ;;  %s4936_s4 = sld [smem:[#allocation2 + $0x9f]] }
 0x2ce   : > { %v5909_v28 = vstv %s3906_s10  ;;  %v5910_v63 = vstv %s3950_s16  ;;  %v1397_v58 = vsel %vm686_vm3, %v1395_v16, %v1394_v29  ;;  %v1457_v61 = vmul.f32 %v1455_v31, %v1396_v9  ;;  %s4593_s10 = sld [smem:[#allocation2 + $0x96]] }
 0x2cf   : > { %5905 = vst [vmem:[#allocation50_spill] sm:$0xff] %v4530_v59  ;;  %v4543_v30 = vmul.f32 %v5909_v28, %v4497_v14  ;;  %v4548_v27 = vmul.f32 %v5910_v63, %v4497_v14  ;;  %v5913_v50 = vrot.slane %v5912_v40, 7  ;;  %v1401_v55 = vrot.slane %v4512_v42, 1  ;;  %s4613_s16 = sld [smem:[#allocation2 + $0x6b]] }
 0x2d0   : > { %v1411_v28 = vadd.f32 %v1409_v18, %v1279_v36  ;;  %v1415_v63 = vmul.f32 %v1413_v24, %v4512_v42  ;;  %v5914_v39 = vstv %s3968_s21  ;;  %v1459_v16 = vadd.f32 %v1457_v61, %v1327_v35  ;;  %s4624_s21 = sld [smem:[#allocation2 + $0xb1]] }
 0x2d1   : > { %5911 = vst [vmem:[#allocation39_spill] sm:$0xff] %v4548_v27  ;;  %v1613_v45 = vsel %vm686_vm3, %v1611_v21, %v5913_v50  ;;  %v4569_v29 = vmul.f32 %v5914_v39, %v4497_v14  ;;  %v1463_v17 = vmul.f32 %v1461_v57, %v4512_v42  ;;  %v1481_v50 = vmul.f32 %v1479_v38, %v1396_v9 }
 0x2d2   : > { %v5916_v36 = vrot.slane %v5912_v40, 7  ;;  %v1398_v39 = vsel %vm232_vm2, %v1397_v58, 0.0  ;;  %v1417_v35 = vadd.f32 %v1415_v63, %v1411_v28  ;;  %v1435_v18 = vadd.f32 %v1433_v53, %v1303_v7 }
 0x2d3   : > { %5915 = vst [vmem:[#allocation44_spill] sm:$0xff] %v4569_v29  ;;  %v4588_v57 = vsel %vm232_vm2, %v1613_v45, 0.0  ;;  %v1465_v9 = vadd.f32 %v1463_v17, %v1459_v16  ;;  %v1483_v61 = vadd.f32 %v1481_v50, %v1351_v54  ;;  %v1487_v48 = vmul.f32 %v1485_v4, %v4512_v42  ;;  %v1741_v45 = vpop.permute.xlu0 %1740  ;;  %v1743_v28 = vpop.permute.xlu1 %1742 }
 0x2d4   : > { %v4580_v24 = vsel %vm686_vm3, %v5916_v36, %v1611_v21  ;;  %v4599_v21 = vsel %vm693_vm4, %v1401_v55, %v1400_v23  ;;  %v4604_v7 = vmul.f32 %v1419_v43, %v4512_v42  ;;  %v1439_v17 = vmul.f32 %v1437_v62, %v4512_v42 }
 0x2d5   : > { %v4611_v4 = vsel %vm230_vm7, %v1735_v32, 0.0  ;;  %v4615_v54 = vmul.f32 %v1407_v20, %v1398_v39  ;;  %v1489_v53 = vadd.f32 %v1487_v48, %v1483_v61  ;;  %v5419_v58 = vstv %s4534_s23 }
 0x2d6   : > { %v4622_v43 = vsel %vm693_vm4, %v1400_v23, %v1401_v55  ;;  %v4626_v62 = vmul.f32 %v1431_v22, %v1398_v39  ;;  %v1441_v32 = vadd.f32 %v1439_v17, %v1435_v18  ;;  %v1336_v20 = vmul.f32 %v5419_v58, %v4479_v33  ;;  %v5923_v17 = vld [vmem:[#allocation91_spill] sm:$0xff] }
 0x2d7   : > { %v5418_v48 = vstv %s4538_s19  ;;  %v5918_v52 = vstv %s4270_s12  ;;  %v4639_v23 = vmul.f32 %v1455_v31, %v1398_v39  ;;  %v5920_v55 = vstv %s4282_s28  ;;  %s4740_s12 = sld [smem:[#allocation2 + $0x82]] }
 0x2d8   : > { %5917 = vst [vmem:[#allocation52_spill] sm:$0xff] %v4626_v62  ;;  %v4637_v63 = vmul.f32 %v5918_v52, %v4512_v42  ;;  %v4644_v16 = vmul.f32 %v5920_v55, %v4512_v42  ;;  %v4648_v22 = vsel %vm230_vm7, %v1733_v1, 0.0  ;;  %v4652_v50 = vmul.f32 %v1479_v38, %v1398_v39  ;;  %s4773_s28 = sld [smem:[#allocation2 + $0x63]] }
 0x2d9   : > { %5919 = vst [vmem:[#allocation51_spill] sm:$0xff] %v4639_v23  ;;  %v5922_v36 = vstv %s4294_s1  ;;  %v1338_v31 = vadd.f32 %v1336_v20, %v4493_v13  ;;  %v1474_v61 = vmul.f32 %v5418_v48, %v4622_v43  ;;  %v4666_v52 = vadd.f32 %v5923_v17, %v1417_v35  ;;  %v5925_v13 = vld [vmem:[#allocation92_spill] sm:$0xff]  ;;  %v5930_v35 = vld [vmem:[#allocation94_spill] sm:$0xff]  ;;  %s4786_s1 = sld [smem:[#allocation2 + $0x83]]  ;;  %v5948_v23 = vld [vmem:[#allocation99_spill] sm:$0xff] }
 0x2da   : > { %5921 = vst [vmem:[#allocation54_spill] sm:$0xff] %v4652_v50  ;;  %v4657_v18 = vmul.f32 %v5922_v36, %v4512_v42  ;;  %v4671_v38 = vsel %vm231_vm6, %v1741_v45, 0.0  ;;  %v4675_v42 = vsel %vm231_vm6, %v1743_v28, 0.0  ;;  %v4680_v39 = vadd.f32 %v5925_v13, %v1441_v32 }
 0x2db   : > { %5924 = vst [vmem:[#allocation40_spill] sm:$0xff] %v4666_v52  ;;  %v1470_v20 = vadd.f32 %v4391_v19, %v1338_v31  ;;  %v5421_v55 = vstv %s4554_s0  ;;  %v5926_v45 = vrot.slane %v4497_v14, 1  ;;  %v5927_v10 = vrot.slane %v5912_v40, 1 }
 0x2dc   : > { %v5420_v32 = vstv %s4584_s9  ;;  %v5424_v36 = vrot.slane %v4648_v22, 1  ;;  %v5423_v17 = vrot.slane %v4611_v4, 1  ;;  %v5422_v13 = vstv %s4574_s7 }
 0x2dd   : > { %v4693_v28 = vsel %vm693_vm4, %v5927_v10, %v5926_v45  ;;  %v1476_v19 = vadd.f32 %v1474_v61, %v1470_v20  ;;  %v5425_v1 = vstv %s4593_s10  ;;  %v5928_v45 = vld [vmem:[#allocation93_spill] sm:$0xff]  ;;  %v4709_v48 = vadd.f32 %v5930_v35, %v1489_v53  ;;  %v5932_v20 = vld [vmem:[#allocation95_spill] sm:$0xff] }
 0x2de   : > { %v4706_v10 = vadd.f32 %v5928_v45, %v1465_v9  ;;  %v1684_v58 = vmul.f32 %v5421_v55, %v5912_v40  ;;  %v1312_v61 = vmul.f32 %v5422_v13, %v4479_v33  ;;  %v1690_v9 = vmul.f32 %v5420_v32, %v4693_v28  ;;  %v5933_v55 = vld [vmem:[#allocation96_spill] sm:$0xff] }
 0x2df   : > { %5931 = vst [vmem:[#allocation57_spill] sm:$0xff] %v4709_v48  ;;  %v1578_v31 = vadd.f32 %v5932_v20, %v1476_v19  ;;  %v5426_v35 = vrot.slane %v4671_v38, 1  ;;  %v4733_v45 = vsel %vm693_vm4, %v5424_v36, %v5423_v17  ;;  %v1450_v32 = vmul.f32 %v5425_v1, %v4622_v43 }
 0x2e0   : > { %5929 = vst [vmem:[#allocation55_spill] sm:$0xff] %v4706_v10  ;;  %v1314_v20 = vadd.f32 %v1312_v61, %v4491_v49  ;;  %v5934_v53 = vrot.slane %v4675_v42, 1  ;;  %v5427_v36 = vstv %s4650_s30  ;;  %v5935_v61 = vstv %s4613_s16 }
 0x2e1   : > { %v1584_v13 = vadd.f32 %v5933_v55, %v1578_v31  ;;  %v1822_v1 = vmul.f32 %v5935_v61, %v4648_v22  ;;  %v1287_v29 = vstv %s4624_s21  ;;  %v1425_v48 = vstv %s4677_s27  ;;  %s5021_s21 = sld [smem:[#allocation2 + $0x37]] }
 0x2e2   : > { %v4749_v17 = vsel %vm693_vm4, %v5426_v35, %v5934_v53  ;;  %v1446_v19 = vadd.f32 %v4376_v26, %v1314_v20  ;;  %v5936_v31 = vstv %s4632_s24  ;;  %v1288_v35 = vmul.f32 %v1287_v29, %v4479_v33  ;;  %s5050_s27 = sld [smem:[#allocation2 + $0xf]] }
 0x2e3   : > { %v1686_v55 = vadd.f32 %v1684_v58, %v1584_v13  ;;  %v1828_v27 = vmul.f32 %v5936_v31, %v4733_v45  ;;  %v2038_v49 = vmul.f32 %v5427_v36, %v4671_v38  ;;  %v5937_v61 = vstv %s4663_s26  ;;  %v5938_v36 = vld [vmem:[#allocation97_spill] sm:$0xff] }
 0x2e4   : > { %v2044_v26 = vmul.f32 %v5937_v61, %v4749_v17  ;;  %v1452_v20 = vadd.f32 %v1450_v32, %v1446_v19  ;;  %v1290_v31 = vadd.f32 %v1288_v35, %v4485_v51  ;;  %v1426_v53 = vmul.f32 %v1425_v48, %v4622_v43  ;;  %v5943_v19 = vld [vmem:[#allocation72_spill] sm:$0xff] }
 0x2e5   : > { %v1692_v58 = vadd.f32 %v1690_v9, %v1686_v55  ;;  %v5939_v61 = vstv %s4564_s22  ;;  %v5940_v51 = vstv %s4685_s8  ;;  %v5942_v52 = vstv %s4698_s13 }
 0x2e6   : > { %v1554_v10 = vadd.f32 %v5938_v36, %v1452_v20  ;;  %v1660_v32 = vmul.f32 %v5939_v61, %v5912_v40  ;;  %v1666_v35 = vmul.f32 %v5940_v51, %v4693_v28  ;;  %v1422_v13 = vadd.f32 %v4365_v41, %v1290_v31  ;;  %v5941_v36 = vld [vmem:[#allocation100_spill] sm:$0xff] }
 0x2e7   : > { %v1824_v9 = vadd.f32 %v1822_v1, %v1692_v58  ;;  %v1798_v61 = vmul.f32 %v5942_v52, %v4648_v22  ;;  %v1635_v59 = vstv %s4740_s12  ;;  %v1177_v34 = vadd.f32 %v5943_v19, %v4306_v8  ;;  %v5949_v8 = vld [vmem:[#allocation98_spill] sm:$0xff]  ;;  %s5114_s12 = sld [smem:[#allocation2 + $0xb]] }
 0x2e8   : > { %v1560_v20 = vadd.f32 %v5941_v36, %v1554_v10  ;;  %v5944_v1 = vstv %s4717_s6  ;;  %v5945_v51 = vstv %s4703_s15  ;;  %v1428_v41 = vadd.f32 %v1426_v53, %v1422_v13 }
 0x2e9   : > { %v1830_v62 = vadd.f32 %v1828_v27, %v1824_v9  ;;  %v1804_v58 = vmul.f32 %v5944_v1, %v4733_v45  ;;  %v2014_v55 = vmul.f32 %v5945_v51, %v4671_v38  ;;  %v5946_v10 = vstv %s4725_s14  ;;  %v5951_v51 = vld [vmem:[#allocation108_spill] sm:$0xff] }
 0x2ea   : > { %v1662_v31 = vadd.f32 %v1660_v32, %v1560_v20  ;;  %v2020_v36 = vmul.f32 %v5946_v10, %v4749_v17  ;;  %v1641_v52 = vstv %s4759_s2  ;;  %v1183_v2 = vadd.f32 %v5947_v37, %v1177_v34  ;;  %v5950_v32 = vld [vmem:[#allocation185_spill] sm:$0xff]  ;;  %v5952_v37 = vld [vmem:[#allocation101_spill] sm:$0xff]  ;;  %s6019_s2 = sld [smem:[#allocation12_spill]] }
 0x2eb   : > { %v1932_v47 = vadd.f32 %v5948_v23, %v1830_v62  ;;  %v1530_v27 = vadd.f32 %v5949_v8, %v1428_v41  ;;  %v1636_v19 = vmul.f32 %v1635_v59, %v5912_v40  ;;  %v4819_v9 = vsel %vm235_vm5, %v4599_v21, 0.0 }
 0x2ec   : > { %v1668_v53 = vadd.f32 %v1666_v35, %v1662_v31  ;;  %v1773_v13 = vstv %s4773_s28  ;;  %v1285_v20 = vadd.f32 %v5950_v32, %v1183_v2  ;;  %v1289_v1 = vmul.f32 %v1287_v29, %v4483_v56  ;;  %s5121_s28 = sld [smem:[#allocation2 + $0x3b]] }
 0x2ed   : > { %v1938_v34 = vadd.f32 %v5951_v51, %v1932_v47  ;;  %v1536_v62 = vadd.f32 %v5952_v37, %v1530_v27  ;;  %v1642_v23 = vmul.f32 %v1641_v52, %v4693_v28  ;;  %v1779_v41 = vstv %s4778_s17  ;;  %v5959_v37 = vld [vmem:[#allocation85_spill] sm:$0xff]  ;;  %s5126_s17 = sld [smem:[#allocation2 + $0x2b]] }
 0x2ee   : > { %v1800_v10 = vadd.f32 %v1798_v61, %v1668_v53  ;;  %v1989_v8 = vstv %s4786_s1  ;;  %v1291_v3 = vadd.f32 %v1289_v1, %v1285_v20  ;;  %v1427_v21 = vmul.f32 %v1425_v48, %v4819_v9  ;;  %v5955_v61 = vld [vmem:[#allocation78_spill] sm:$0xff] }
 0x2ef   : > { %v2040_v50 = vadd.f32 %v2038_v49, %v1938_v34  ;;  %v1638_v46 = vadd.f32 %v1636_v19, %v1536_v62  ;;  %v1774_v35 = vmul.f32 %v1773_v13, %v4648_v22  ;;  %v1995_v31 = vstv %s4793_s25  ;;  %s5153_s25 = sld [smem:[#allocation2 + $0x5b]] }
 0x2f0   : > { %v1806_v2 = vadd.f32 %v1804_v58, %v1800_v10  ;;  %v1423_v29 = vadd.f32 %v4604_v7, %v1291_v3  ;;  %v5953_v47 = vrot.slane %v5912_v40, 1  ;;  %v5954_v27 = vrot.slane %v4497_v14, 1  ;;  %v5956_v58 = vld [vmem:[#allocation103_spill] sm:$0xff]  ;;  %s215_s1 = sand.u32 1, %s6019_s2  }
 0x2f1   : > { %v1225_v53 = vadd.f32 %v5955_v61, %v4314_v15  ;;  %v2046_v20 = vadd.f32 %v2044_v26, %v2040_v50  ;;  %v1644_v48 = vadd.f32 %v1642_v23, %v1638_v46  ;;  %v1780_v49 = vmul.f32 %v1779_v41, %v4733_v45  ;;  %v5961_v23 = vld [vmem:[#allocation111_spill] sm:$0xff] }
 0x2f2   : > { %v1619_v32 = vsel %vm693_vm4, %v5954_v27, %v5953_v47  ;;  %v1990_v19 = vmul.f32 %v1989_v8, %v4671_v38  ;;  %v1908_v1 = vadd.f32 %v5956_v58, %v1806_v2  ;;  %v1429_v3 = vadd.f32 %v1427_v21, %v1423_v29  ;;  %v5962_v21 = vld [vmem:[#allocation102_spill] sm:$0xff]  ;;  %v5963_v29 = vld [vmem:[#allocation189_spill] sm:$0xff] }
 0x2f3   : > { %v5957_v7 = vrot.slane %v4648_v22, 1  ;;  %v5958_v51 = vrot.slane %v4611_v4, 1  ;;  %v1231_v62 = vadd.f32 %v5959_v37, %v1225_v53  ;;  %2104 = vrot.lane.b32.xlu0 %v2046_v20, %s5960_s5  ;;  %v1776_v15 = vadd.f32 %v1774_v35, %v1644_v48  ;;  %v5967_v48 = vld [vmem:[#allocation74_spill] sm:$0xff]  ;;  %v5970_v37 = vld [vmem:[#allocation109_spill] sm:$0xff] }
 0x2f4   : > { %v1996_v46 = vmul.f32 %v1995_v31, %v4749_v17  ;;  %v4855_v50 = vsel %vm235_vm5, %v1619_v32, 0.0  ;;  %v1637_v26 = vmul.f32 %v1635_v59, %v4497_v14  ;;  %v1914_v10 = vadd.f32 %v5961_v23, %v1908_v1 }
 0x2f5   : > { %v1757_v34 = vsel %vm693_vm4, %v5958_v51, %v5957_v7  ;;  %v1531_v2 = vadd.f32 %v5962_v21, %v1429_v3  ;;  %v1333_v47 = vadd.f32 %v5963_v29, %v1231_v62  ;;  %v5964_v27 = vstv %s4534_s23  ;;  %v5968_v3 = vld [vmem:[#allocation105_spill] sm:$0xff]  ;;  %v5971_v21 = vld [vmem:[#allocation82_spill] sm:$0xff]  ;;  %s4948_s23 = sld [smem:[#allocation2 + $0xbf]] }
 0x2f6   : > { %v1337_v35 = vmul.f32 %v5964_v27, %v4483_v56  ;;  %v1782_v61 = vadd.f32 %v1780_v49, %v1776_v15  ;;  %v4868_v53 = vsel %vm235_vm5, %v1757_v34, 0.0  ;;  %v5965_v32 = vrot.slane %v4671_v38, 1 }
 0x2f7   : > { %v5966_v59 = vrot.slane %v4675_v42, 1  ;;  %v1201_v58 = vadd.f32 %v5967_v48, %v4309_v44  ;;  %v2016_v1 = vadd.f32 %v2014_v55, %v1914_v10  ;;  %v1537_v49 = vadd.f32 %v5968_v3, %v1531_v2  ;;  %v5972_v2 = vld [vmem:[#allocation117_spill] sm:$0xff] }
 0x2f8   : > { %v1339_v7 = vadd.f32 %v1337_v35, %v1333_v47  ;;  %v5969_v51 = vstv %s4538_s19  ;;  %v1884_v62 = vadd.f32 %v5970_v37, %v1782_v61  ;;  %v1643_v15 = vmul.f32 %v1641_v52, %v4855_v50  ;;  %v5973_v61 = vld [vmem:[#allocation187_spill] sm:$0xff]  ;;  %s4955_s19 = sld [smem:[#allocation2 + $0x8f]] }
 0x2f9   : > { %v1973_v20 = vsel %vm693_vm4, %v5966_v59, %v5965_v32  ;;  %v1475_v34 = vmul.f32 %v5969_v51, %v4819_v9  ;;  %v1775_v23 = vmul.f32 %v1773_v13, %v4611_v4  ;;  %v1207_v29 = vadd.f32 %v5971_v21, %v1201_v58  ;;  %v5978_v37 = vld [vmem:[#allocation90_spill] sm:$0xff] }
 0x2fa   : > { %v2022_v44 = vadd.f32 %v2020_v36, %v2016_v1  ;;  %v1639_v27 = vadd.f32 %v1637_v26, %v1537_v49  ;;  %v1781_v55 = vmul.f32 %v1779_v41, %v4868_v53  ;;  %v1471_v10 = vadd.f32 %v4644_v16, %v1339_v7  ;;  %v5975_v16 = vld [vmem:[#allocation88_spill] sm:$0xff] }
 0x2fb   : > { %v1890_v47 = vadd.f32 %v5972_v2, %v1884_v62  ;;  %v4893_v35 = vsel %vm235_vm5, %v1973_v20, 0.0  ;;  %v1309_v52 = vadd.f32 %v5973_v61, %v1207_v29  ;;  %v5974_v13 = vstv %s4574_s7  ;;  %v5977_v7 = vld [vmem:[#allocation104_spill] sm:$0xff]  ;;  %v5980_v29 = vld [vmem:[#allocation106_spill] sm:$0xff]  ;;  %s4994_s7 = sld [smem:[#allocation2 + $0x26]] }
 0x2fc   : > { %v1313_v32 = vmul.f32 %v5974_v13, %v4483_v56  ;;  %2091 = vrot.lane.b32.xlu1 %v2022_v44, %s5960_s5  ;;  %v1645_v36 = vadd.f32 %v1643_v15, %v1639_v27  ;;  %v1991_v41 = vmul.f32 %v1989_v8, %v4675_v42  ;;  %v1477_v26 = vadd.f32 %v1475_v34, %v1471_v10  ;;  %v5981_v44 = vld [vmem:[#allocation192_spill] sm:$0xff] }
 0x2fd   : > { %v1249_v59 = vadd.f32 %v5975_v16, %v4324_v5  ;;  %v1992_v48 = vadd.f32 %v1990_v19, %v1890_v47  ;;  %v5976_v20 = vstv %s4593_s10  ;;  %v1359_v1 = vstv %s4858_s18  ;;  %s5003_s10 = sld [smem:[#allocation2 + $0x53]] }
 0x2fe   : > { %v1315_v60 = vadd.f32 %v1313_v32, %v1309_v52  ;;  %v1451_v58 = vmul.f32 %v5976_v20, %v4819_v9  ;;  %v1777_v3 = vadd.f32 %v1775_v23, %v1645_v36  ;;  %v1997_v49 = vmul.f32 %v1995_v31, %v4893_v35  ;;  %v5985_v52 = vld [vmem:[#allocation113_spill] sm:$0xff] }
 0x2ff   : > { %v1579_v51 = vadd.f32 %v5977_v7, %v1477_v26  ;;  %v1255_v8 = vadd.f32 %v5978_v37, %v1249_v59  ;;  %v1998_v34 = vadd.f32 %v1996_v46, %v1992_v48  ;;  %v5979_v62 = vstv %s4554_s0  ;;  %v5990_v7 = vld [vmem:[#allocation118_spill] sm:$0xff]  ;;  %s4980_s0 = sld [smem:[#allocation2 + $0x22]] }
 0x300   : > { %v1685_v5 = vmul.f32 %v5979_v62, %v4497_v14  ;;  %v1447_v19 = vadd.f32 %v4637_v63, %v1315_v60  ;;  %v1497_v15 = vstv %s4878_s20  ;;  %v1783_v21 = vadd.f32 %v1781_v55, %v1777_v3  ;;  %v5988_v60 = vld [vmem:[#allocation107_spill] sm:$0xff]  ;;  %v5992_v62 = vld [vmem:[#allocation110_spill] sm:$0xff]  ;;  %s6052_s20 = sld [smem:[#allocation20_spill]] }
 0x301   : > { %v1585_v23 = vadd.f32 %v5980_v29, %v1579_v51  ;;  %v1357_v31 = vadd.f32 %v5981_v44, %v1255_v8  ;;  %v1361_v27 = vmul.f32 %v1359_v1, %v4483_v56  ;;  %2077 = vrot.lane.b32.xlu2 %v1998_v34, %s5960_s5  ;;  %v5982_v46 = vstv %s4584_s9  ;;  %s4999_s9 = sld [smem:[#allocation2 + $0x33]] }
 0x302   : > { %v1691_v63 = vmul.f32 %v5982_v46, %v4855_v50  ;;  %v5983_v10 = vstv %s4613_s16  ;;  %v5984_v55 = vstv %s4632_s24  ;;  %v1453_v61 = vadd.f32 %v1451_v58, %v1447_v19  ;;  %s5016_s16 = sld [smem:[#allocation2 + $0x7]] }
 0x303   : > { %v1823_v2 = vmul.f32 %v5983_v10, %v4611_v4  ;;  %v1829_v47 = vmul.f32 %v5984_v55, %v4868_v53  ;;  %v1885_v56 = vadd.f32 %v5985_v52, %v1783_v21  ;;  %v1687_v13 = vadd.f32 %v1685_v5, %v1585_v23  ;;  %s5031_s24 = sld [smem:[#allocation2 + $0x23]] }
 0x304   : > { %v1363_v32 = vadd.f32 %v1361_v27, %v1357_v31  ;;  %v1499_v36 = vmul.f32 %v1497_v15, %v4819_v9  ;;  %v5986_v26 = vstv %s4650_s30  ;;  %v5987_v59 = vstv %s4663_s26  ;;  %s5037_s30 = sld [smem:[#allocation2 + $0x2e]] }
 0x305   : > { %v2039_v16 = vmul.f32 %v5986_v26, %v4675_v42  ;;  %v2045_v48 = vmul.f32 %v5987_v59, %v4893_v35  ;;  %v1555_v20 = vadd.f32 %v5988_v60, %v1453_v61  ;;  %v5989_v58 = vstv %s4564_s22  ;;  %v5998_v60 = vld [vmem:[#allocation114_spill] sm:$0xff]  ;;  %s4989_s22 = sld [smem:[#allocation2 + $0x3]] }
 0x306   : > { %v1661_v3 = vmul.f32 %v5989_v58, %v4497_v14  ;;  %v1891_v51 = vadd.f32 %v5990_v7, %v1885_v56  ;;  %v1693_v9 = vadd.f32 %v1691_v63, %v1687_v13  ;;  %v5991_v37 = vstv %s4685_s8  ;;  %s5045_s26 = sld [smem:[#allocation2 + $0x57]] }
 0x307   : > { %v1667_v8 = vmul.f32 %v5991_v37, %v4855_v50  ;;  %v1495_v34 = vadd.f32 %v4657_v18, %v1363_v32  ;;  %v1561_v5 = vadd.f32 %v5992_v62, %v1555_v20  ;;  %v5993_v19 = vstv %s4698_s13  ;;  %v5999_v20 = vld [vmem:[#allocation115_spill] sm:$0xff]  ;;  %s5058_s8 = sld [smem:[#allocation2 + $0x27]] }
 0x308   : > { %v1799_v21 = vmul.f32 %v5993_v19, %v4611_v4  ;;  %v5994_v29 = vstv %s4717_s6  ;;  %v1360_v44 = vmul.f32 %v1359_v1, %v4479_v33  ;;  %v1993_v31 = vadd.f32 %v1991_v41, %v1891_v51  ;;  %v5997_v33 = vld [vmem:[#allocation112_spill] sm:$0xff]  ;;  %v6000_v51 = vld [vmem:[#allocation119_spill] sm:$0xff]  ;;  %s5068_s13 = sld [smem:[#allocation2 + $0x3f]] }
 0x309   : > { %v1805_v23 = vmul.f32 %v5994_v29, %v4868_v53  ;;  %v1825_v27 = vadd.f32 %v1823_v2, %v1693_v9  ;;  %v5995_v46 = vstv %s4703_s15  ;;  %v1501_v63 = vadd.f32 %v1499_v36, %v1495_v34  ;;  %s5080_s15 = sld [smem:[#allocation2 + $0x2f]] }
 0x30a   : > { %v2015_v18 = vmul.f32 %v5995_v46, %v4675_v42  ;;  %v1663_v10 = vadd.f32 %v1661_v3, %v1561_v5  ;;  %v5996_v55 = vstv %s4725_s14  ;;  %v1362_v52 = vadd.f32 %v1360_v44, %v4525_v25  ;;  %v6001_v5 = vld [vmem:[#allocation116_spill] sm:$0xff]  ;;  %s5093_s6 = sld [smem:[#allocation2 + $0x5f]] }
 0x30b   : > { %v4971_v61 = vmul.f32 %v5996_v55, %v4893_v35  ;;  %v1498_v56 = vmul.f32 %v1497_v15, %v4622_v43  ;;  %v1999_v13 = vadd.f32 %v1997_v49, %v1993_v31  ;;  %v1831_v32 = vadd.f32 %v1829_v47, %v1825_v27  ;;  %v6002_v31 = vld [vmem:[#allocation120_spill] sm:$0xff]  ;;  %s5104_s14 = sld [smem:[#allocation2 + $0x2a]] }
 0x30c   : > { %v1603_v41 = vadd.f32 %v5997_v33, %v1501_v63  ;;  %v1713_v1 = vstv %s4920_s3  ;;  %v1669_v2 = vadd.f32 %v1667_v8, %v1663_v10  ;;  %v1707_v26 = vstv %s4915_s29  ;;  %s6063_s29 = sld [smem:[#allocation15_spill]] }
 0x30d   : > { %v1845_v59 = vstv %s4932_s11  ;;  %v1494_v36 = vadd.f32 %v4410_v12, %v1362_v52  ;;  %2079 = vrot.lane.b32.xlu0 %v1999_v13, %s5960_s5  ;;  %v1933_v25 = vadd.f32 %v5998_v60, %v1831_v32  ;;  %v1709_v49 = vmul.f32 %v1707_v26, %v4497_v14 }
 0x30e   : > { %v1609_v43 = vadd.f32 %v5999_v20, %v1603_v41  ;;  %v1851_v15 = vstv %s4936_s4  ;;  %v1801_v47 = vadd.f32 %v1799_v21, %v1669_v2  ;;  %v1715_v58 = vmul.f32 %v1713_v1, %v4855_v50 }
 0x30f   : > { %v2067_v3 = vstv %s4948_s23  ;;  %v1500_v7 = vadd.f32 %v1498_v56, %v1494_v36  ;;  %v1939_v12 = vadd.f32 %v6000_v51, %v1933_v25  ;;  %v1847_v37 = vmul.f32 %v1845_v59, %v4611_v4  ;;  %v6006_v56 = vld [vmem:[#allocation122_spill] sm:$0xff] }
 0x310   : > { %v1711_v9 = vadd.f32 %v1709_v49, %v1609_v43  ;;  %v2061_v8 = vstv %s4955_s19  ;;  %v1807_v34 = vadd.f32 %v1805_v23, %v1801_v47  ;;  %v1853_v62 = vmul.f32 %v1851_v15, %v4868_v53  ;;  %v6003_v23 = vld [vmem:[#allocation125_spill] sm:$0xff]  ;;  %s6065_s19 = sld [smem:[#allocation199_spill]] }
 0x311   : > { %v2063_v14 = vmul.f32 %v2061_v8, %v4675_v42  ;;  %v1602_v19 = vadd.f32 %v6001_v5, %v1500_v7  ;;  %v2041_v50 = vadd.f32 %v2039_v16, %v1939_v12  ;;  %v2069_v29 = vmul.f32 %v2067_v3, %v4893_v35 }
 0x312   : > { %v1717_v21 = vadd.f32 %v1715_v58, %v1711_v9  ;;  %v1708_v44 = vmul.f32 %v1707_v26, %v5912_v40  ;;  %v1909_v27 = vadd.f32 %v6002_v31, %v1807_v34  ;;  %v1714_v53 = vmul.f32 %v1713_v1, %v4693_v28  ;;  %v6010_v9 = vld [vmem:[#allocation127_spill] sm:$0xff]  ;;  %v6011_v34 = vld [vmem:[#allocation121_spill] sm:$0xff]  ;;  %s2448_s11 = sshll.u32 %s6063_s29, 6 }
 0x313   : > { %v1608_v46 = vadd.f32 %v6003_v23, %v1602_v19  ;;  %v6004_v63 = vrot.slane %v4648_v22, 7  ;;  %v6005_v10 = vrot.slane %v4611_v4, 7  ;;  %v2047_v55 = vadd.f32 %v2045_v48, %v2041_v50 }
 0x314   : > { %v1849_v52 = vadd.f32 %v1847_v37, %v1717_v21  ;;  %v1846_v35 = vmul.f32 %v1845_v59, %v4648_v22  ;;  %v1852_v40 = vmul.f32 %v1851_v15, %v4733_v45  ;;  %v1915_v13 = vadd.f32 %v6006_v56, %v1909_v27  ;;  %v6008_v15 = vld [vmem:[#allocation140_spill] sm:$0xff] }
 0x315   : > { %v1751_v16 = vsel %vm686_vm3, %v6005_v10, %v6004_v63  ;;  %v1710_v32 = vadd.f32 %v1708_v44, %v1608_v46  ;;  %v2062_v28 = vmul.f32 %v2061_v8, %v4671_v38  ;;  %v1623_v33 = vstv %s4980_s0  ;;  %2106 = vrot.lane.b32.xlu1 %v2047_v55, %s5960_s5  ;;  %v6014_v44 = vld [vmem:[#allocation130_spill] sm:$0xff] }
 0x316   : > { %v1855_v48 = vadd.f32 %v1853_v62, %v1849_v52  ;;  %v5025_v41 = vmul.f32 %v2067_v3, %v4749_v17  ;;  %v5029_v45 = vsel %vm232_vm2, %v1751_v16, 0.0  ;;  %v1410_v1 = vadd.f32 %v4615_v54, %v4489_v11  ;;  %v6007_v17 = vld [vmem:[#allocation134_spill] sm:$0xff]  ;;  %s2137_s0 = scalar_lea.hbm %s6065_s19, %s2448_s11 }
 0x317   : > { %v2017_v2 = vadd.f32 %v2015_v18, %v1915_v13  ;;  %v1716_v26 = vadd.f32 %v1714_v53, %v1710_v32  ;;  %v1761_v59 = vstv %s4989_s22  ;;  %v1965_v36 = vrot.slane %v4675_v42, 7  ;;  %v6009_v3 = vld [vmem:[#allocation126_spill] sm:$0xff]  ;;  %v6017_v32 = vld [vmem:[#allocation56_spill] sm:$0xff] }
 0x318   : > { %v1957_v60 = vadd.f32 %v6007_v17, %v1855_v48  ;;  %v1624_v25 = vmul.f32 %v1623_v33, %v4588_v57  ;;  %v1416_v20 = vadd.f32 %v4360_v6, %v1410_v1  ;;  %v1647_v43 = vstv %s4994_s7  ;;  %v6018_v48 = vld [vmem:[#allocation54_spill] sm:$0xff]  ;;  %s2140_s7 = sshll.u32 %s2137_s0, 4  ;;  %s2141_s7 = int_to_ptr.hbm [resolvable:$true] %s2140_s7 }
 0x319   : > { %v2023_v11 = vadd.f32 %v4971_v61, %v2017_v2  ;;  %v1848_v54 = vadd.f32 %v1846_v35, %v1716_v26  ;;  %v1767_v18 = vstv %s4999_s9  ;;  %v1964_v49 = vrot.slane %v4671_v38, 7  ;;  %v6016_v35 = vld [vmem:[#allocation193_spill] sm:$0xff]  ;;  %s2126_s9 = scalar_lea.sflag [#allocation3], %s215_s1 }
 0x31a   : > { %v1963_v47 = vadd.f32 %v6008_v15, %v1957_v60  ;;  %v1762_v58 = vmul.f32 %v1761_v59, %v5029_v45  ;;  %v1983_v6 = vstv %s5003_s10  ;;  %v1518_v7 = vadd.f32 %v6009_v3, %v1416_v20  ;;  %v6021_v3 = vld [vmem:[#allocation128_spill] sm:$0xff]  ;;  %s2562_s10 = sshra.s32 %s2141_s7, 4  ;;  %s2563_s10 = int_to_ptr.hbm [resolvable:$true] %s2562_s10 }
 0x31b   : > { %2093 = vrot.lane.b32.xlu2 %v2023_v11, %s5960_s5  ;;  %v1854_v61 = vadd.f32 %v1852_v40, %v1848_v54  ;;  %v1967_v51 = vsel %vm686_vm3, %v1965_v36, %v1964_v49  ;;  %v1649_v12 = vmul.f32 %v1647_v43, %v4580_v24  ;;  %v1549_v37 = vadd.f32 %v6010_v9, %v4680_v39  ;;  %v6020_v11 = vld [vmem:[#allocation38_spill] sm:$0xff]  ;;  %p2569_p3 = scmp.lt.s32.totalorder %s2563_s10, %s6065_s19 }
 0x31c   : > { %v2065_v8 = vadd.f32 %v2063_v14, %v1963_v47  ;;  %v1524_v62 = vadd.f32 %v6011_v34, %v1518_v7  ;;  %v6012_v5 = vmov %v6005_v10  ;;  %v6013_v19 = vmov %v6004_v63  ;;  %v6015_v10 = vld [vmem:[#allocation144_spill] sm:$0xff] }
 0x31d   : > { %v5077_v50 = vsel %vm686_vm3, %v6013_v19, %v6012_v5  ;;  %v1785_v21 = vstv %s5016_s16  ;;  %v1956_v31 = vadd.f32 %v6014_v44, %v1854_v61  ;;  %v1768_v39 = vmul.f32 %v1767_v18, %v4648_v22  ;;  %v6022_v61 = vld [vmem:[#allocation151_spill] sm:$0xff]  ;;  %v6025_v19 = vld [vmem:[#allocation47_spill] sm:$0xff]  ;;  %v6026_v44 = vld [vmem:[#allocation51_spill] sm:$0xff]  ;;  %s2564_s16 = scalar_lea.hbm %s2563_s10, 64 }
 0x31e   : > { %v1791_v14 = vstv %s5021_s21  ;;  %v1651_v27 = vadd.f32 %v1649_v12, %v1549_v37  ;;  %v2071_v23 = vadd.f32 %v2069_v29, %v2065_v8  ;;  %v1977_v46 = vstv %s5031_s24  ;;  %v6023_v37 = vld [vmem:[#allocation150_spill] sm:$0xff]  ;;  %p2565_p0 = scmp.ne.s32.totalorder %s2563_s10, %s2564_s16 }
 0x31f   : > { %v5091_v53 = vmul.f32 %v1983_v6, %v4671_v38  ;;  %v1626_v63 = vadd.f32 %v1624_v25, %v1524_v62  ;;  %v1962_v16 = vadd.f32 %v6015_v10, %v1956_v31  ;;  %v5098_v55 = vsel %vm232_vm2, %v1967_v51, 0.0  ;;  %v6024_v62 = vld [vmem:[#allocation123_spill] sm:$0xff] }
 0x320   : > { %v1787_v52 = vmul.f32 %v1785_v21, %v5077_v50  ;;  %v1657_v29 = vadd.f32 %v4543_v30, %v1651_v27  ;;  %2119 = vrot.lane.b32.xlu0 %v2071_v23, %s5960_s5  ;;  %v1793_v56 = vmul.f32 %v1791_v14, %v4611_v4  ;;  %v2007_v13 = vstv %s5045_s26  ;;  %p2566_p1 = pnand %p2565_p0, %p2690_p5 }
 0x321   : > { %v1632_v40 = vadd.f32 %v6016_v35, %v1626_v63  ;;  %v1482_v1 = vadd.f32 %v6018_v48, %v6017_v32  ;;  %v2064_v30 = vadd.f32 %v2062_v28, %v1962_v16  ;;  %v5118_v2 = vsel %vm686_vm3, %v1964_v49, %v1965_v36  ;;  %v6028_v16 = vld [vmem:[#allocation132_spill] sm:$0xff] }
 0x322   : > { %v1789_v26 = vadd.f32 %v1787_v52, %v1657_v29  ;;  %v1695_v17 = vstv %s5037_s30  ;;  %v2001_v25 = vstv %s5058_s8  ;;  %v1833_v20 = vstv %s5050_s27  ;;  %p2567_p2 = pneg %p2566_p1  ;;  %s2568_s30 = scalar_lea.hbm %s6065_s19, 128 }
 0x323   : > { %v1764_v60 = vadd.f32 %v1762_v58, %v1632_v40  ;;  %v1488_v54 = vadd.f32 %v6020_v11, %v1482_v1  ;;  %v2070_v0 = vadd.f32 %v5025_v41, %v2064_v30  ;;  %v1978_v28 = vmul.f32 %v1977_v46, %v5098_v55  ;;  %v6029_v40 = vld [vmem:[#allocation41_spill] sm:$0xff]  ;;  %v6030_v30 = vld [vmem:[#allocation42_spill] sm:$0xff]  ;;  %p2570_p4 = scmp.lt.s32.totalorder %s2568_s30, %s2564_s16 }
 0x324   : > { %v2009_v36 = vmul.f32 %v2007_v13, %v4675_v42  ;;  %v1795_v49 = vadd.f32 %v1793_v56, %v1789_v26  ;;  %v1839_v47 = vstv %s5068_s13  ;;  %v2049_v58 = vstv %s5080_s15  ;;  %v6031_v26 = vld [vmem:[#allocation52_spill] sm:$0xff] }
 0x325   : > { %v1770_v15 = vadd.f32 %v1768_v39, %v1764_v60  ;;  %v1590_v7 = vadd.f32 %v6021_v3, %v1488_v54  ;;  %2117 = vrot.lane.b32.xlu2 %v2070_v0, %s5960_s5  ;;  %v2003_v41 = vmul.f32 %v2001_v25, %v5118_v2  ;;  %v1696_v12 = vmul.f32 %v1695_v17, %v4588_v57  ;;  %s2233_s5 = sshll.u32 %s215_s1, 6  ;;  %v6027_v39 = vld [vmem:[#allocation145_spill] sm:$0xff]  ;;  %p2571_p7 = por %p2570_p4, %p2569_p3 }
 0x326   : > { %v1897_v51 = vadd.f32 %v6022_v61, %v1795_v49  ;;  %v1834_v9 = vmul.f32 %v1833_v20, %v5029_v45  ;;  %v2055_v34 = vstv %s5093_s6  ;;  %v1458_v31 = vadd.f32 %v6026_v44, %v6025_v19  ;;  %v6032_v54 = vld [vmem:[#allocation48_spill] sm:$0xff]  ;;  %s5185_s18 = scalar_lea.vmem [#allocation7], %s2233_s5  ;;  %v6036_v19 = vld [vmem:[#allocation135_spill] sm:$0xff] }
 0x327   : > { %v1872_v8 = vadd.f32 %v6023_v37, %v1770_v15  ;;  %v1596_v5 = vadd.f32 %v6024_v62, %v1590_v7  ;;  %v1840_v23 = vmul.f32 %v1839_v47, %v4648_v22  ;;  %v2050_v63 = vmul.f32 %v2049_v58, %v5098_v55  ;;  %v6033_v15 = vld [vmem:[#allocation131_spill] sm:$0xff]  ;;  %v6035_v62 = vld [vmem:[#allocation124_spill] sm:$0xff]  ;;  %s2138_s22 = sshll.u32 %s5185_s18, 4  ;;  %p2572_p8 = pnand %p2571_p7, %p2567_p2  ;;  %s2139_s22 = int_to_ptr.vmem [resolvable:$true] %s2138_s22 }
 0x328   : > { %v1903_v27 = vadd.f32 %v6027_v39, %v1897_v51  ;;  %v1671_v10 = vstv %s5104_s14  ;;  %v1809_v35 = vstv %s5114_s12  ;;  %v1464_v56 = vadd.f32 %v6029_v40, %v1458_v31  ;;  %v6034_v51 = vld [vmem:[#allocation46_spill] sm:$0xff]  ;;  %v6039_v40 = vld [vmem:[#allocation129_spill] sm:$0xff] }
 0x329   : > { %v1878_v52 = vadd.f32 %v6028_v16, %v1872_v8  ;;  %v1698_v29 = vadd.f32 %v1696_v12, %v1596_v5  ;;  %v2056_v48 = vmul.f32 %v2055_v34, %v4671_v38  ;;  %v1815_v1 = vstv %s5121_s28  ;;  %v6038_v31 = vld [vmem:[#allocation136_spill] sm:$0xff] }
 0x32a   : > { %v2005_v32 = vadd.f32 %v2003_v41, %v1903_v27  ;;  %v1434_v60 = vadd.f32 %v6031_v26, %v6030_v30  ;;  %v2025_v49 = vstv %s5126_s17  ;;  %v1566_v3 = vadd.f32 %v6033_v15, %v1464_v56  ;;  %v6040_v26 = vld [vmem:[#allocation55_spill] sm:$0xff] }
 0x32b   : > { %v1980_v11 = vadd.f32 %v1978_v28, %v1878_v52  ;;  %v1704_v0 = vadd.f32 %v6032_v54, %v1698_v29  ;;  %v1672_v61 = vmul.f32 %v1671_v10, %v4588_v57  ;;  %v1810_v41 = vmul.f32 %v1809_v35, %v5029_v45 }
 0x32c   : > { %v2011_v7 = vadd.f32 %v2009_v36, %v2005_v32  ;;  %v1440_v12 = vadd.f32 %v6034_v51, %v1434_v60  ;;  %v1816_v28 = vmul.f32 %v1815_v1, %v4648_v22  ;;  %v1572_v5 = vadd.f32 %v6035_v62, %v1566_v3  ;;  %v6045_v51 = vld [vmem:[#allocation133_spill] sm:$0xff] }
 0x32d   : > { %v1986_v37 = vadd.f32 %v5091_v53, %v1980_v11  ;;  %v1836_v8 = vadd.f32 %v1834_v9, %v1704_v0  ;;  %v2026_v36 = vmul.f32 %v2025_v49, %v5098_v55  ;;  %v1625_v53 = vmul.f32 %v1623_v33, %v4580_v24  ;;  %v6037_v9 = vld [vmem:[#allocation40_spill] sm:$0xff]  ;;  %v6041_v33 = vld [vmem:[#allocation142_spill] sm:$0xff]  ;;  %v6043_v0 = vld [vmem:[#allocation43_spill] sm:$0xff] }
 0x32e   : > { %2431 = vst.msk [vmem:[%s5185_s18 + $0x18] sm:$0xff] %vm2072_vm8, %v2011_v7  ;;  %v1542_v44 = vadd.f32 %v6036_v19, %v1440_v12  ;;  %v1525_v39 = vadd.f32 %v6038_v31, %v6037_v9  ;;  %v2031_v16 = vstv %s5153_s25  ;;  %v1674_v52 = vadd.f32 %v1672_v61, %v1572_v5  ;;  %v6042_v11 = vld [vmem:[#allocation152_spill] sm:$0xff]  ;;  %v6044_v7 = vld [vmem:[#allocation50_spill] sm:$0xff]  ;;  %v6047_v5 = vld [vmem:[#allocation39_spill] sm:$0xff] }
 0x32f   : > { %2073 = vst.msk [vmem:[%s5185_s18] sm:$0xff] %vm2072_vm8, %v1986_v37  ;;  %v1842_v27 = vadd.f32 %v1840_v23, %v1836_v8  ;;  %v1648_v29 = vmul.f32 %v1647_v43, %v4588_v57  ;;  %v1673_v30 = vmul.f32 %v1671_v10, %v4580_v24  ;;  %v1573_v60 = vadd.f32 %v6041_v33, %v6040_v26  ;;  %v6054_v26 = vld [vmem:[#allocation141_spill] sm:$0xff] }
 0x330   : > { %v1548_v56 = vadd.f32 %v6039_v40, %v1542_v44  ;;  %v1627_v32 = vadd.f32 %v1625_v53, %v1525_v39  ;;  %v1680_v15 = vadd.f32 %v6043_v0, %v1674_v52  ;;  %v1786_v23 = vmul.f32 %v1785_v21, %v5029_v45  ;;  %v6046_v21 = vld [vmem:[#allocation194_spill] sm:$0xff] }
 0x331   : > { %v1944_v54 = vadd.f32 %v6042_v11, %v1842_v27  ;;  %v1763_v57 = vmul.f32 %v1761_v59, %v5077_v50  ;;  %v1769_v3 = vmul.f32 %v1767_v18, %v4611_v4  ;;  %v1675_v61 = vadd.f32 %v1673_v30, %v1573_v60  ;;  %v6048_v44 = vld [vmem:[#allocation57_spill] sm:$0xff]  ;;  %v6049_v18 = vld [vmem:[#allocation147_spill] sm:$0xff] }
 0x332   : > { %v1650_v43 = vadd.f32 %v1648_v29, %v1548_v56  ;;  %v1633_v10 = vadd.f32 %v6044_v7, %v1627_v32  ;;  %v1812_v37 = vadd.f32 %v1810_v41, %v1680_v15  ;;  %v1811_v8 = vmul.f32 %v1809_v35, %v5077_v50  ;;  %v6050_v29 = vld [vmem:[#allocation153_spill] sm:$0xff]  ;;  %v6053_v32 = vld [vmem:[#allocation44_spill] sm:$0xff]  ;;  %v6056_v11 = vld [vmem:[#allocation156_spill] sm:$0xff] }
 0x333   : > { %v1950_v12 = vadd.f32 %v6045_v51, %v1944_v54  ;;  %v1697_v45 = vmul.f32 %v1695_v17, %v4580_v24  ;;  %v1681_v19 = vadd.f32 %v6047_v5, %v1675_v61  ;;  %v1597_v53 = vadd.f32 %v6049_v18, %v6048_v44  ;;  %v6057_v0 = vld [vmem:[#allocation157_spill] sm:$0xff] }
 0x334   : > { %v1656_v62 = vadd.f32 %v6046_v21, %v1650_v43  ;;  %v1765_v59 = vadd.f32 %v1763_v57, %v1633_v10  ;;  %v1818_v31 = vadd.f32 %v1816_v28, %v1812_v37  ;;  %v1792_v41 = vmul.f32 %v1791_v14, %v4648_v22  ;;  %v6051_v22 = vld [vmem:[#allocation155_spill] sm:$0xff]  ;;  %v6061_v10 = vld [vmem:[#allocation158_spill] sm:$0xff] }
 0x335   : > { %v2052_v9 = vadd.f32 %v2050_v63, %v1950_v12  ;;  %v1817_v35 = vmul.f32 %v1815_v1, %v4611_v4  ;;  %v1813_v17 = vadd.f32 %v1811_v8, %v1681_v19  ;;  %v1699_v27 = vadd.f32 %v1697_v45, %v1597_v53 }
 0x336   : > { %v1788_v39 = vadd.f32 %v1786_v23, %v1656_v62  ;;  %v1771_v24 = vadd.f32 %v1769_v3, %v1765_v59  ;;  %v1920_v40 = vadd.f32 %v6050_v29, %v1818_v31  ;;  %v1979_v56 = vmul.f32 %v1977_v46, %v5118_v2 }
 0x337   : > { %v2058_v52 = vadd.f32 %v2056_v48, %v2052_v9  ;;  %v1835_v63 = vmul.f32 %v1833_v20, %v5077_v50  ;;  %v1819_v1 = vadd.f32 %v1817_v35, %v1813_v17  ;;  %v1705_v30 = vadd.f32 %v6053_v32, %v1699_v27  ;;  %v6055_v20 = vld [vmem:[#allocation154_spill] sm:$0xff] }
 0x338   : > { %v1794_v28 = vadd.f32 %v1792_v41, %v1788_v39  ;;  %v1873_v14 = vadd.f32 %v6051_v22, %v1771_v24  ;;  %v1926_v48 = vadd.f32 %v6054_v26, %v1920_v40  ;;  %v2002_v33 = vmul.f32 %v2001_v25, %v5098_v55  ;;  %v6058_v25 = vld [vmem:[#allocation138_spill] sm:$0xff] }
 0x339   : > { %2438 = vst.msk [vmem:[%s5185_s18 + $0x30] sm:$0xff] %vm2072_vm8, %v2058_v52  ;;  %v2027_v46 = vmul.f32 %v2025_v49, %v5118_v2  ;;  %v1841_v50 = vmul.f32 %v1839_v47, %v4611_v4  ;;  %v1921_v15 = vadd.f32 %v6057_v0, %v1819_v1  ;;  %v1837_v23 = vadd.f32 %v1835_v63, %v1705_v30  ;;  %v6060_v4 = vld [vmem:[#allocation146_spill] sm:$0xff] }
 0x33a   : > { %v1896_v60 = vadd.f32 %v6055_v20, %v1794_v28  ;;  %v1879_v54 = vadd.f32 %v6056_v11, %v1873_v14  ;;  %v2032_v57 = vmul.f32 %v2031_v16, %v4671_v38  ;;  %v2028_v43 = vadd.f32 %v2026_v36, %v1926_v48 }
 0x33b   : > { %v1985_v55 = vmul.f32 %v1983_v6, %v4675_v42  ;;  %v6059_v49 = vstv %s6052_s20  ;;  %v1927_v61 = vadd.f32 %v6061_v10, %v1921_v15  ;;  %v1843_v51 = vadd.f32 %v1841_v50, %v1837_v23 }
 0x33c   : > { %v1943_v3 = vmul.f32 %v6059_v49, %v6058_v25  ;;  %v1902_v47 = vadd.f32 %v6060_v4, %v1896_v60  ;;  %v1981_v7 = vadd.f32 %v1979_v56, %v1879_v54  ;;  %v2034_v12 = vadd.f32 %v2032_v57, %v2028_v43 }
 0x33d   : > { %v2008_v36 = vmul.f32 %v2007_v13, %v4671_v38  ;;  %v2033_v37 = vmul.f32 %v2031_v16, %v4675_v42  ;;  %v2051_v6 = vmul.f32 %v2049_v58, %v5118_v2  ;;  %v2029_v21 = vadd.f32 %v2027_v46, %v1927_v61  ;;  %v6062_v38 = vld [vmem:[#allocation159_spill] sm:$0xff] }
 0x33e   : > { %v2004_v8 = vadd.f32 %v2002_v33, %v1902_v47  ;;  %v1987_v45 = vadd.f32 %v1985_v55, %v1981_v7  ;;  %v1945_v62 = vadd.f32 %v1943_v3, %v1843_v51  ;;  %2434 = vst.msk [vmem:[%s5185_s18 + $0x20] sm:$0xff] %vm2072_vm8, %v2034_v12  ;;  %v2057_v2 = vmul.f32 %v2055_v34, %v4675_v42 }
 0x33f   : > { %v2035_v5 = vadd.f32 %v2033_v37, %v2029_v21 }
 0x340   : > { %v2010_v59 = vadd.f32 %v2008_v36, %v2004_v8  ;;  %2074 = vst.msk [vmem:[%s5185_s18 + $0x8] sm:$0xff] %vm2072_vm8, %v1987_v45  ;;  %v1951_v13 = vadd.f32 %v6062_v38, %v1945_v62 }
 0x341   : > { %2435 = vst.msk [vmem:[%s5185_s18 + $0x28] sm:$0xff] %vm2072_vm8, %v2035_v5 }
 0x342   : > { %2430 = vst.msk [vmem:[%s5185_s18 + $0x10] sm:$0xff] %vm2072_vm8, %v2010_v59  ;;  %v2053_v58 = vadd.f32 %v2051_v6, %v1951_v13 }
 0x344   : > { %v2059_v16 = vadd.f32 %v2057_v2, %v2053_v58 }
 0x346   : > { %2439 = vst.msk [vmem:[%s5185_s18 + $0x38] sm:$0xff] %vm2072_vm8, %v2059_v16 }
 0x35b   : > { %v2078_v19 = vpop.permute.xlu2 %2077 }
 0x35c   : > { %2084 = vst.msk [vmem:[%s5185_s18] sm:$0xff] %vm2083_vm9, %v2078_v19 }
 0x365   : > { %v2105_v44 = vpop.permute.xlu0 %2104 }
 0x366   : > { %2436 = vst.msk [vmem:[%s5185_s18 + $0x20] sm:$0xff] %vm2083_vm9, %v2105_v44 }
 0x36e   : > { %v2092_v18 = vpop.permute.xlu1 %2091 }
 0x36f   : > { %2432 = vst.msk [vmem:[%s5185_s18 + $0x10] sm:$0xff] %vm2083_vm9, %v2092_v18 }
 0x375   : > { %v2094_v42 = vpop.permute.xlu2 %2093 }
 0x376   : > { %2433 = vst.msk [vmem:[%s5185_s18 + $0x18] sm:$0xff] %vm2083_vm9, %v2094_v42 }
 0x37f   : > { %v2118_v34 = vpop.permute.xlu2 %2117  ;;  %v2080_v53 = vpop.permute.xlu0 %2079 }
 0x380   : > { %2440 = vst.msk [vmem:[%s5185_s18 + $0x30] sm:$0xff] %vm2083_vm9, %v2118_v34 }
 0x381   : > { %2085 = vst.msk [vmem:[%s5185_s18 + $0x8] sm:$0xff] %vm2083_vm9, %v2080_v53 }
 0x387   : > { %v2107_v9 = vpop.permute.xlu1 %2106 }
 0x388   : > { %2437 = vst.msk [vmem:[%s5185_s18 + $0x28] sm:$0xff] %vm2083_vm9, %v2107_v9 }
 0x392   : > { %v2120_v31 = vpop.permute.xlu0 %2119 }
 0x393   : > { %2441 = vst.msk [vmem:[%s5185_s18 + $0x38] sm:$0xff] %vm2083_vm9, %v2120_v31 }
 0x394   : > { %2575 = shalt.err (!%p2572_p8)
}
 0x395   : > { %s2625_s8 = smov 128   ;;  %s2626_s13 = smov 8  }
 0x396   : > { %2461 = dma.vmem_to_hbm [thread:$0]  (%p2690_p5), %s2139_s22, 1024, %s2141_s7, %s2126_s9, %s2625_s8, %s2625_s8, %s2626_s13  }
 0x397 PF: > { %s6066_s15 = sld [smem:[#allocation14_spill]] }
 0x398   : > { %s6067_s6 = sld [smem:[#allocation11_spill]] }
 0x39d   : > { %p2478_p9 = scmp.ge.s32.totalorder %s6066_s15, 2 }
 0x39e   : > { %s2155_s12 = sand.u32 1, %s6067_s6  }
 0x39f   : > { %p2471_p10 = pnand %p2478_p9, %p2694_p6  ;;  %s2156_s2 = scalar_lea.sflag [#allocation3], %s2155_s12 }
 0x3a1   : > { %p2472_p11 = pneg %p2471_p10 }
 0x3a3   : > { %2601 = dma.done.wait (%p2472_p11), %s2156_s2, 1024  }
 0x3a4   : > { %2603 = vsyncadd (%p2472_p11), %s2156_s2, 4294966272  ;;  %s6069_s18 = sld [smem:[#allocation16_spill]] }
 0x3a5   : > { %s6070_s15 = sld [smem:[#allocation12_spill]] }
 0x3a6   : > { %s6071_s16 = sld [smem:[#allocation13_spill]] }
 0x3a7   : > { %s6072_s17 = sld [smem:[#allocation17_spill]] }
 0x3aa   : > { %p16_p12 = scmp.ge.s32.totalorder %s6069_s18, 4  }
 0x3ac   :  { %18 = sbr.rel (!%p16_p12) target bundleno = 11 (0xb), region = 83 }
 0x3b1   :  { %2162 = vsyncpa [#allocation3], 1 }
 0x3b2   :  { %2164 = vsyncpa [#allocation3 + $0x1], 1 }
 0x3b3   :  { %2165 = vsyncpa [#allocation4], 1 }
 0x3b4   :  { %2167 = vsyncpa [#allocation4 + $0x1], 1 }
 0x3b5   :  { %2168 = vsyncpa [#allocation6], 1 }

</bundles_post_ra>
